<compile_context>
chip_gen: v7x
topology: tpu7x:2x2x1
jax: 0.10.0
libtpu: 0.0.40
codegen_flags: <defaults>
</compile_context>

<pallas_src>
import functools

import numpy as np
import jax
import jax.numpy as jnp
from jax import lax
from jax.experimental import pallas as pl
from jax.experimental.pallas import tpu as pltpu


def _round_up(x, m):
    return (x + m - 1) // m * m


# ----------------------------------------------------------------------------
# Kernel 1: fused conv2d (valid, stride 1) + bias + ReLU + 2x2 maxpool.
# Bt images per grid step; per image one (Cout,Kpad)@(Kpad,L) MXU contraction.
# ----------------------------------------------------------------------------
def _conv_relu_pool_kernel(x_ref, w_ref, b_ref, s_ref, o_ref, *,
                           Bt, kh, kw, W, L, Lp, Kpad, out_pad):
    # x_ref: (Bt, Cin, H*W + kw-1) bf16     w_ref: (Cout, Kpad) bf16
    # b_ref: (Cout, 1) f32                  s_ref: (Lp, P) bf16 (0/1 selection)
    # o_ref: (Bt, Cout, P + out_pad) bf16
    cout = w_ref.shape[0]
    cin = x_ref.shape[1]
    K = cin * kh * kw
    w = w_ref[...]        # loop-invariant loads hoisted out of the image loop
    bias = b_ref[...]
    sel = s_ref[...]

    def body(b, carry):
        x_img = x_ref[b].astype(jnp.bfloat16)               # (Cin, HWpad), cast once
        # Stack the kh*kw shifted slices into one (Kpad, L) operand (tap-major K).
        slabs = [x_img[:, ki * W + kj: ki * W + kj + L]
                 for ki in range(kh) for kj in range(kw)]    # each (Cin, L)
        if Kpad > K:
            slabs.append(jnp.zeros((Kpad - K, L), jnp.bfloat16))
        xk = jnp.concatenate(slabs, axis=0)                  # (Kpad, L)
        acc = jnp.dot(w, xk, preferred_element_type=jnp.float32)   # (Cout, L)
        acc = jnp.maximum(acc + bias, 0.0)                   # bias + ReLU
        # 2x2 stride-2 max pool: max over flat offsets {0, 1, W, W+1}.
        v = jnp.maximum(jnp.maximum(acc[:, 0:Lp], acc[:, 1:Lp + 1]),
                        jnp.maximum(acc[:, W:W + Lp], acc[:, W + 1:W + 1 + Lp]))
        # Compact the strided pooled positions with a 0/1 bf16 selection matmul
        # (each output column picks exactly one v column -> exact).
        pooled = jnp.dot(v.astype(jnp.bfloat16), sel,
                         preferred_element_type=jnp.float32)       # (Cout, P)
        out = pooled.astype(jnp.bfloat16)
        if out_pad:  # producer-side zero tail so the consumer needs no XLA pad
            out = jnp.concatenate(
                [out, jnp.zeros((cout, out_pad), jnp.bfloat16)], axis=-1)
        o_ref[b] = out
        return carry

    lax.fori_loop(0, Bt, body, 0)


def conv_relu_pool(x, w2d, b_col, sel, *, H, W, kh, kw, Bt, out_pad):
    """x: (B_pad, Cin, H*W + kw-1) bf16 -> (B_pad, Cout, Hp*Wp + out_pad) bf16."""
    Bp, Cin, HWpad = x.shape
    Cout, Kpad = w2d.shape
    Ho, Wo = H - kh + 1, W - kw + 1
    Hp, Wp = Ho // 2, Wo // 2
    L = Ho * W
    Lp = (Ho - 2) * W + (Wo - 2) + 1
    P = Hp * Wp
    assert Bp % Bt == 0
    assert HWpad == H * W + kw - 1
    assert sel.shape == (Lp, P)
    kernel = functools.partial(_conv_relu_pool_kernel, Bt=Bt, kh=kh, kw=kw,
                               W=W, L=L, Lp=Lp, Kpad=Kpad, out_pad=out_pad)
    return pl.pallas_call(
        kernel,
        out_shape=jax.ShapeDtypeStruct((Bp, Cout, P + out_pad), jnp.bfloat16),
        grid=(Bp // Bt,),
        in_specs=[
            pl.BlockSpec((Bt, Cin, HWpad), lambda i: (i, 0, 0)),
            pl.BlockSpec((Cout, Kpad), lambda i: (0, 0)),
            pl.BlockSpec((Cout, 1), lambda i: (0, 0)),
            pl.BlockSpec((Lp, P), lambda i: (0, 0)),
        ],
        out_specs=pl.BlockSpec((Bt, Cout, P + out_pad), lambda i: (i, 0, 0)),
        compiler_params=pltpu.CompilerParams(dimension_semantics=("parallel",)),
    )(x, w2d, b_col, sel)


# ----------------------------------------------------------------------------
# Kernel 2: fused fc1(+ReLU) -> fc2(+ReLU) -> fc3, tiled over the batch.
# Intermediates stay on-chip; weights pre-transposed / zero-padded to 128.
# ----------------------------------------------------------------------------
def _fc_kernel(x_ref, w1_ref, b1_ref, w2_ref, b2_ref, w3_ref, b3_ref, o_ref):
    h = jnp.dot(x_ref[...].astype(jnp.bfloat16), w1_ref[...],
                preferred_element_type=jnp.float32) + b1_ref[...]
    h = jnp.maximum(h, 0.0)
    h = jnp.dot(h.astype(jnp.bfloat16), w2_ref[...],
                preferred_element_type=jnp.float32) + b2_ref[...]
    h = jnp.maximum(h, 0.0)
    o_ref[...] = jnp.dot(h.astype(jnp.bfloat16), w3_ref[...],
                         preferred_element_type=jnp.float32) + b3_ref[...]


def fc_forward(x, prep):
    B, K = x.shape
    # Batch tile: multiple of 8, up to 512, and >=2 grid steps once B >= 16.
    tm = max(8, min(512, _round_up(max((B + 1) // 2, 1), 8)))
    B_pad = _round_up(B, tm)
    if B_pad != B:
        x = jnp.pad(x, ((0, B_pad - B), (0, 0)))

    def full(a):
        return pl.BlockSpec(a.shape, lambda i: (0,) * a.ndim)

    out = pl.pallas_call(
        _fc_kernel,
        out_shape=jax.ShapeDtypeStruct((B_pad, 128), jnp.float32),  # lane-dense
        grid=(B_pad // tm,),
        in_specs=[
            pl.BlockSpec((tm, K), lambda i: (i, 0)),
            full(prep["fc1_w"]), full(prep["fc1_b"]),
            full(prep["fc2_w"]), full(prep["fc2_b"]),
            full(prep["fc3_w"]), full(prep["fc3_b"]),
        ],
        out_specs=pl.BlockSpec((tm, 128), lambda i: (i, 0)),
        compiler_params=pltpu.CompilerParams(dimension_semantics=("parallel",)),
    )(x, prep["fc1_w"], prep["fc1_b"], prep["fc2_w"], prep["fc2_b"],
      prep["fc3_w"], prep["fc3_b"])
    return out


# ----------------------------------------------------------------------------
# Parameter init (PyTorch-matching shapes) + one-time packing for the kernels
# ----------------------------------------------------------------------------
def init_params(key):
    ks = jax.random.split(key, 10)

    def u(k, shape, fan_in):
        bound = 1.0 / jnp.sqrt(fan_in)
        return jax.random.uniform(k, shape, jnp.float32, -bound, bound)

    return {
        "conv1_w": u(ks[0], (6, 3, 5, 5), 3 * 5 * 5),
        "conv1_b": u(ks[1], (6,), 3 * 5 * 5),
        "conv2_w": u(ks[2], (16, 6, 5, 5), 6 * 5 * 5),
        "conv2_b": u(ks[3], (16,), 6 * 5 * 5),
        "fc1_w": u(ks[4], (120, 400), 400),   # torch Linear: (out, in)
        "fc1_b": u(ks[5], (120,), 400),
        "fc2_w": u(ks[6], (84, 120), 120),
        "fc2_b": u(ks[7], (84,), 120),
        "fc3_w": u(ks[8], (10, 84), 84),
        "fc3_b": u(ks[9], (10,), 84),
    }


def _pool_select_matrix(W, Ho, Wo):
    """0/1 matrix selecting flat column 2*ph*W + 2*pw into position ph*Wp + pw."""
    Hp, Wp = Ho // 2, Wo // 2
    Lp = (Ho - 2) * W + (Wo - 2) + 1
    S = np.zeros((Lp, Hp * Wp), np.float32)
    for ph in range(Hp):
        for pw in range(Wp):
            S[2 * ph * W + 2 * pw, ph * Wp + pw] = 1.0
    return jnp.asarray(S, dtype=jnp.bfloat16)     # 0/1 exact in bf16


def prepare_params(params):
    """Conv weights packed to (Cout, Kpad) bf16 with tap-major K (k = (ki*kw+kj)*Cin + c),
    FC weights pre-transposed to (in,out) and zero-padded to 128-wide dims."""
    def conv_prep(w, b):
        Cout, Cin, kh, kw = w.shape
        K = Cin * kh * kw
        Kpad = _round_up(K, 16)
        w2d = jnp.transpose(w, (0, 2, 3, 1)).reshape(Cout, K)     # (o, ki, kj, c)
        w2d = jnp.pad(w2d, ((0, 0), (0, Kpad - K))).astype(jnp.bfloat16)
        return w2d, b.reshape(Cout, 1).astype(jnp.float32)

    def fc_prep(w, b, k_pad, n_pad):
        n_out, k_in = w.shape
        wp = jnp.zeros((k_pad, n_pad), jnp.float32).at[:k_in, :n_out].set(w.T)
        bp = jnp.zeros((1, n_pad), jnp.float32).at[0, :n_out].set(b)
        return wp.astype(jnp.bfloat16), bp

    c1w, c1b = conv_prep(params["conv1_w"], params["conv1_b"])
    c2w, c2b = conv_prep(params["conv2_w"], params["conv2_b"])
    f1w, f1b = fc_prep(params["fc1_w"], params["fc1_b"], 400, 128)
    f2w, f2b = fc_prep(params["fc2_w"], params["fc2_b"], 128, 128)
    f3w, f3b = fc_prep(params["fc3_w"], params["fc3_b"], 128, 128)   # out padded to 128
    return {
        "c1_w": c1w, "c1_b": c1b, "c1_s": _pool_select_matrix(32, 28, 28),
        "c2_w": c2w, "c2_b": c2b, "c2_s": _pool_select_matrix(14, 10, 10),
        "fc1_w": f1w, "fc1_b": f1b,
        "fc2_w": f2w, "fc2_b": f2b,
        "fc3_w": f3w, "fc3_b": f3b,
    }


# ----------------------------------------------------------------------------
# Forward pass
# ----------------------------------------------------------------------------
@jax.jit
def net_forward(prep, x):
    # x: (B, 3, 32, 32) NCHW f32
    B = x.shape[0]
    Bt = max(8, min(32, _round_up(max((B + 1) // 2, 1), 8)))   # conv batch block
    B_pad = _round_up(B, Bt)
    # Flatten, pad +4 lanes (kw-1), pad batch, cast to bf16 — one fused XLA pass.
    x = x.reshape(B, 3, 32 * 32)
    x = jnp.pad(x, ((0, B_pad - B), (0, 0), (0, 4))).astype(jnp.bfloat16)
    x = conv_relu_pool(x, prep["c1_w"], prep["c1_b"], prep["c1_s"],
                       H=32, W=32, kh=5, kw=5, Bt=Bt, out_pad=4)   # (B_pad, 6, 200)
    x = conv_relu_pool(x, prep["c2_w"], prep["c2_b"], prep["c2_s"],
                       H=14, W=14, kh=5, kw=5, Bt=Bt, out_pad=0)   # (B_pad, 16, 25)
    x = x.reshape(B_pad, 16 * 5 * 5)          # NCHW flatten, matches torch .view
    logits = fc_forward(x, prep)              # (B_fc_pad, 128) f32
    return logits[:B, :10]


# ----------------------------------------------------------------------------
# Pure-JAX reference (f32, XLA) for a sanity check
# ----------------------------------------------------------------------------
def reference_forward(params, x):
    def conv(x, w, b):
        y = lax.conv_general_dilated(x, w, (1, 1), "VALID",
                                     dimension_numbers=("NCHW", "OIHW", "NCHW"))
        return y + b.reshape(1, -1, 1, 1)

    def pool(x):
        return lax.reduce_window(x, -jnp.inf, lax.max,
                                 (1, 1, 2, 2), (1, 1, 2, 2), "VALID")

    x = pool(jax.nn.relu(conv(x, params["conv1_w"], params["conv1_b"])))
    x = pool(jax.nn.relu(conv(x, params["conv2_w"], params["conv2_b"])))
    x = x.reshape(x.shape[0], -1)
    x = jax.nn.relu(x @ params["fc1_w"].T + params["fc1_b"])
    x = jax.nn.relu(x @ params["fc2_w"].T + params["fc2_b"])
    return x @ params["fc3_w"].T + params["fc3_b"]


if __name__ == "__main__":
    key = jax.random.PRNGKey(0)
    pkey, xkey = jax.random.split(key)
    params = init_params(pkey)
    prep = prepare_params(params)
    x = jax.random.normal(xkey, (2, 3, 32, 32), jnp.float32)

    out = jax.block_until_ready(net_forward(prep, x))
    assert out.shape == (2, 10), out.shape
    assert bool(jnp.all(jnp.isfinite(out)))
    ref = reference_forward(params, x)
    err = float(jnp.max(jnp.abs(out - ref)))
    assert err < 0.1, f"max abs error vs reference: {err}"
    print("KERNEL_OK")
</pallas_src>

<mosaic_0001>
module attributes {stable_mosaic.version = 11 : i64} {
  func.func @_conv_relu_pool_kernel(%arg0: i32, %arg1: memref<8x3x1028xbf16, #tpu.memory_space<vmem>>, %arg2: memref<6x80xbf16, #tpu.memory_space<vmem>>, %arg3: memref<6x1xf32, #tpu.memory_space<vmem>>, %arg4: memref<859x196xbf16, #tpu.memory_space<vmem>>, %arg5: memref<8x6x200xbf16, #tpu.memory_space<vmem>>) attributes {dimension_semantics = [#tpu.dimension_semantics<parallel>], iteration_bounds = array<i64: 1>, scalar_prefetch = 0 : i64, scratch_operands = 0 : i64, tpu.core_type = #tpu.core_type<tc>, window_params = [{transform_indices = @transform_0, window_bounds = array<i64: 8, 3, 1028>}, {pipeline_mode = #tpu.pipeline_mode<synchronous>, transform_indices = @transform_1, window_bounds = array<i64: 6, 80>}, {pipeline_mode = #tpu.pipeline_mode<synchronous>, transform_indices = @transform_2, window_bounds = array<i64: 6, 1>}, {pipeline_mode = #tpu.pipeline_mode<synchronous>, transform_indices = @transform_3, window_bounds = array<i64: 859, 196>}, {transform_indices = @transform_4, window_bounds = array<i64: 8, 6, 200>}]} {
    %c0 = arith.constant 0 : index
    %c0_0 = arith.constant 0 : index
    %0 = vector.load %arg2[%c0, %c0_0] : memref<6x80xbf16, #tpu.memory_space<vmem>>, vector<6x80xbf16>
    %c0_1 = arith.constant 0 : index
    %c0_2 = arith.constant 0 : index
    %1 = vector.load %arg3[%c0_1, %c0_2] : memref<6x1xf32, #tpu.memory_space<vmem>>, vector<6x1xf32>
    %c0_3 = arith.constant 0 : index
    %c0_4 = arith.constant 0 : index
    %2 = vector.load %arg4[%c0_3, %c0_4] : memref<859x196xbf16, #tpu.memory_space<vmem>>, vector<859x196xbf16>
    %c0_i32 = arith.constant 0 : i32
    %c8_i32 = arith.constant 8 : i32
    %3 = arith.addi %c0_i32, %c8_i32 : i32
    %c1_i32 = arith.constant 1 : i32
    scf.for %arg6 = %c0_i32 to %3 step %c1_i32  : i32 {
      %4 = arith.index_cast %arg6 : i32 to index
      %c0_6 = arith.constant 0 : index
      %c0_7 = arith.constant 0 : index
      %5 = vector.load %arg1[%4, %c0_6, %c0_7] : memref<8x3x1028xbf16, #tpu.memory_space<vmem>>, vector<1x3x1028xbf16>
      %6 = vector.shape_cast %5 : vector<1x3x1028xbf16> to vector<3x1028xbf16>
      %7 = vector.extract_strided_slice %6 {offsets = [0, 0], sizes = [3, 896], strides = [1, 1]} : vector<3x1028xbf16> to vector<3x896xbf16>
      %8 = vector.extract_strided_slice %6 {offsets = [0, 1], sizes = [3, 896], strides = [1, 1]} : vector<3x1028xbf16> to vector<3x896xbf16>
      %9 = vector.extract_strided_slice %6 {offsets = [0, 2], sizes = [3, 896], strides = [1, 1]} : vector<3x1028xbf16> to vector<3x896xbf16>
      %10 = vector.extract_strided_slice %6 {offsets = [0, 3], sizes = [3, 896], strides = [1, 1]} : vector<3x1028xbf16> to vector<3x896xbf16>
      %11 = vector.extract_strided_slice %6 {offsets = [0, 4], sizes = [3, 896], strides = [1, 1]} : vector<3x1028xbf16> to vector<3x896xbf16>
      %12 = vector.extract_strided_slice %6 {offsets = [0, 32], sizes = [3, 896], strides = [1, 1]} : vector<3x1028xbf16> to vector<3x896xbf16>
      %13 = vector.extract_strided_slice %6 {offsets = [0, 33], sizes = [3, 896], strides = [1, 1]} : vector<3x1028xbf16> to vector<3x896xbf16>
      %14 = vector.extract_strided_slice %6 {offsets = [0, 34], sizes = [3, 896], strides = [1, 1]} : vector<3x1028xbf16> to vector<3x896xbf16>
      %15 = vector.extract_strided_slice %6 {offsets = [0, 35], sizes = [3, 896], strides = [1, 1]} : vector<3x1028xbf16> to vector<3x896xbf16>
      %16 = vector.extract_strided_slice %6 {offsets = [0, 36], sizes = [3, 896], strides = [1, 1]} : vector<3x1028xbf16> to vector<3x896xbf16>
      %17 = vector.extract_strided_slice %6 {offsets = [0, 64], sizes = [3, 896], strides = [1, 1]} : vector<3x1028xbf16> to vector<3x896xbf16>
      %18 = vector.extract_strided_slice %6 {offsets = [0, 65], sizes = [3, 896], strides = [1, 1]} : vector<3x1028xbf16> to vector<3x896xbf16>
      %19 = vector.extract_strided_slice %6 {offsets = [0, 66], sizes = [3, 896], strides = [1, 1]} : vector<3x1028xbf16> to vector<3x896xbf16>
      %20 = vector.extract_strided_slice %6 {offsets = [0, 67], sizes = [3, 896], strides = [1, 1]} : vector<3x1028xbf16> to vector<3x896xbf16>
      %21 = vector.extract_strided_slice %6 {offsets = [0, 68], sizes = [3, 896], strides = [1, 1]} : vector<3x1028xbf16> to vector<3x896xbf16>
      %22 = vector.extract_strided_slice %6 {offsets = [0, 96], sizes = [3, 896], strides = [1, 1]} : vector<3x1028xbf16> to vector<3x896xbf16>
      %23 = vector.extract_strided_slice %6 {offsets = [0, 97], sizes = [3, 896], strides = [1, 1]} : vector<3x1028xbf16> to vector<3x896xbf16>
      %24 = vector.extract_strided_slice %6 {offsets = [0, 98], sizes = [3, 896], strides = [1, 1]} : vector<3x1028xbf16> to vector<3x896xbf16>
      %25 = vector.extract_strided_slice %6 {offsets = [0, 99], sizes = [3, 896], strides = [1, 1]} : vector<3x1028xbf16> to vector<3x896xbf16>
      %26 = vector.extract_strided_slice %6 {offsets = [0, 100], sizes = [3, 896], strides = [1, 1]} : vector<3x1028xbf16> to vector<3x896xbf16>
      %27 = vector.extract_strided_slice %6 {offsets = [0, 128], sizes = [3, 896], strides = [1, 1]} : vector<3x1028xbf16> to vector<3x896xbf16>
      %28 = vector.extract_strided_slice %6 {offsets = [0, 129], sizes = [3, 896], strides = [1, 1]} : vector<3x1028xbf16> to vector<3x896xbf16>
      %29 = vector.extract_strided_slice %6 {offsets = [0, 130], sizes = [3, 896], strides = [1, 1]} : vector<3x1028xbf16> to vector<3x896xbf16>
      %30 = vector.extract_strided_slice %6 {offsets = [0, 131], sizes = [3, 896], strides = [1, 1]} : vector<3x1028xbf16> to vector<3x896xbf16>
      %31 = vector.extract_strided_slice %6 {offsets = [0, 132], sizes = [3, 896], strides = [1, 1]} : vector<3x1028xbf16> to vector<3x896xbf16>
      %cst = arith.constant 0.000000e+00 : bf16
      %32 = vector.broadcast %cst : bf16 to vector<5x896xbf16>
      %33 = tpu.concatenate %7, %8, %9, %10, %11, %12, %13, %14, %15, %16, %17, %18, %19, %20, %21, %22 in 0 : vector<3x896xbf16>, vector<3x896xbf16>, vector<3x896xbf16>, vector<3x896xbf16>, vector<3x896xbf16>, vector<3x896xbf16>, vector<3x896xbf16>, vector<3x896xbf16>, vector<3x896xbf16>, vector<3x896xbf16>, vector<3x896xbf16>, vector<3x896xbf16>, vector<3x896xbf16>, vector<3x896xbf16>, vector<3x896xbf16>, vector<3x896xbf16> -> vector<48x896xbf16>
      %34 = tpu.concatenate %23, %24, %25, %26, %27, %28, %29, %30, %31, %32 in 0 : vector<3x896xbf16>, vector<3x896xbf16>, vector<3x896xbf16>, vector<3x896xbf16>, vector<3x896xbf16>, vector<3x896xbf16>, vector<3x896xbf16>, vector<3x896xbf16>, vector<3x896xbf16>, vector<5x896xbf16> -> vector<32x896xbf16>
      %35 = tpu.concatenate %33, %34 in 0 : vector<48x896xbf16>, vector<32x896xbf16> -> vector<80x896xbf16>
      %cst_8 = arith.constant dense<0.000000e+00> : vector<6x896xf32>
      %36 = tpu.matmul %0, %35, %cst_8 {dimension_numbers = #tpu.dot_dimension_numbers<[1], [0], [0], [1], [0, 0, 1, 1], [], []>} : vector<6x80xbf16>, vector<80x896xbf16>, vector<6x896xf32> -> vector<6x896xf32>
      %37 = vector.broadcast %1 : vector<6x1xf32> to vector<6x896xf32>
      %38 = arith.addf %36, %37 : vector<6x896xf32>
      %cst_9 = arith.constant 0.000000e+00 : f32
      %39 = vector.broadcast %cst_9 : f32 to vector<6x896xf32>
      %40 = arith.maximumf %38, %39 : vector<6x896xf32>
      %41 = vector.extract_strided_slice %40 {offsets = [0, 0], sizes = [6, 859], strides = [1, 1]} : vector<6x896xf32> to vector<6x859xf32>
      %42 = vector.extract_strided_slice %40 {offsets = [0, 1], sizes = [6, 859], strides = [1, 1]} : vector<6x896xf32> to vector<6x859xf32>
      %43 = arith.maximumf %41, %42 : vector<6x859xf32>
      %44 = vector.extract_strided_slice %40 {offsets = [0, 32], sizes = [6, 859], strides = [1, 1]} : vector<6x896xf32> to vector<6x859xf32>
      %45 = vector.extract_strided_slice %40 {offsets = [0, 33], sizes = [6, 859], strides = [1, 1]} : vector<6x896xf32> to vector<6x859xf32>
      %46 = arith.maximumf %44, %45 : vector<6x859xf32>
      %47 = arith.maximumf %43, %46 : vector<6x859xf32>
      %48 = arith.truncf %47 : vector<6x859xf32> to vector<6x859xbf16>
      %cst_10 = arith.constant dense<0.000000e+00> : vector<6x196xf32>
      %49 = tpu.matmul %48, %2, %cst_10 {dimension_numbers = #tpu.dot_dimension_numbers<[1], [0], [0], [1], [0, 0, 1, 1], [], []>} : vector<6x859xbf16>, vector<859x196xbf16>, vector<6x196xf32> -> vector<6x196xf32>
      %50 = arith.truncf %49 : vector<6x196xf32> to vector<6x196xbf16>
      %cst_11 = arith.constant 0.000000e+00 : bf16
      %51 = vector.broadcast %cst_11 : bf16 to vector<6x4xbf16>
      %52 = tpu.concatenate %50, %51 in 1 : vector<6x196xbf16>, vector<6x4xbf16> -> vector<6x200xbf16>
      %53 = arith.index_cast %arg6 : i32 to index
      %c0_12 = arith.constant 0 : index
      %c0_13 = arith.constant 0 : index
      %54 = vector.load %arg5[%53, %c0_12, %c0_13] : memref<8x6x200xbf16, #tpu.memory_space<vmem>>, vector<1x6x200xbf16>
      %55 = vector.shape_cast %54 : vector<1x6x200xbf16> to vector<6x200xbf16>
      %56 = vector.shape_cast %52 : vector<6x200xbf16> to vector<1x6x200xbf16>
      tpu.vector_store %arg5[%53, %c0_12, %c0_13], %56 {strides = array<i32>} : memref<8x6x200xbf16, #tpu.memory_space<vmem>>, vector<1x6x200xbf16>,
    }
    %c8_i32_5 = arith.constant 8 : i32
    return
  }
  func.func @transform_0(%arg0: i32) -> (i32, i32, i32) {
    %c0_i32 = arith.constant 0 : i32
    %c0_i32_0 = arith.constant 0 : i32
    %c0_i32_1 = arith.constant 0 : i32
    return %arg0, %c0_i32, %c0_i32_0 : i32, i32, i32
  }
  func.func @transform_1(%arg0: i32) -> (i32, i32) {
    %c0_i32 = arith.constant 0 : i32
    %c0_i32_0 = arith.constant 0 : i32
    %c0_i32_1 = arith.constant 0 : i32
    return %c0_i32, %c0_i32_0 : i32, i32
  }
  func.func @transform_2(%arg0: i32) -> (i32, i32) {
    %c0_i32 = arith.constant 0 : i32
    %c0_i32_0 = arith.constant 0 : i32
    %c0_i32_1 = arith.constant 0 : i32
    return %c0_i32, %c0_i32_0 : i32, i32
  }
  func.func @transform_3(%arg0: i32) -> (i32, i32) {
    %c0_i32 = arith.constant 0 : i32
    %c0_i32_0 = arith.constant 0 : i32
    %c0_i32_1 = arith.constant 0 : i32
    return %c0_i32, %c0_i32_0 : i32, i32
  }
  func.func @transform_4(%arg0: i32) -> (i32, i32, i32) {
    %c0_i32 = arith.constant 0 : i32
    %c0_i32_0 = arith.constant 0 : i32
    %c0_i32_1 = arith.constant 0 : i32
    return %arg0, %c0_i32, %c0_i32_0 : i32, i32, i32
  }
}

module attributes {stable_mosaic.version = 11 : i64} {
  func.func @_conv_relu_pool_kernel(%arg0: i32, %arg1: memref<8x6x200xbf16, #tpu.memory_space<vmem>>, %arg2: memref<16x160xbf16, #tpu.memory_space<vmem>>, %arg3: memref<16x1xf32, #tpu.memory_space<vmem>>, %arg4: memref<121x25xbf16, #tpu.memory_space<vmem>>, %arg5: memref<8x16x25xbf16, #tpu.memory_space<vmem>>) attributes {dimension_semantics = [#tpu.dimension_semantics<parallel>], iteration_bounds = array<i64: 1>, scalar_prefetch = 0 : i64, scratch_operands = 0 : i64, tpu.core_type = #tpu.core_type<tc>, window_params = [{transform_indices = @transform_0, window_bounds = array<i64: 8, 6, 200>}, {pipeline_mode = #tpu.pipeline_mode<synchronous>, transform_indices = @transform_1, window_bounds = array<i64: 16, 160>}, {pipeline_mode = #tpu.pipeline_mode<synchronous>, transform_indices = @transform_2, window_bounds = array<i64: 16, 1>}, {pipeline_mode = #tpu.pipeline_mode<synchronous>, transform_indices = @transform_3, window_bounds = array<i64: 121, 25>}, {transform_indices = @transform_4, window_bounds = array<i64: 8, 16, 25>}]} {
    %c0 = arith.constant 0 : index
    %c0_0 = arith.constant 0 : index
    %0 = vector.load %arg2[%c0, %c0_0] : memref<16x160xbf16, #tpu.memory_space<vmem>>, vector<16x160xbf16>
    %c0_1 = arith.constant 0 : index
    %c0_2 = arith.constant 0 : index
    %1 = vector.load %arg3[%c0_1, %c0_2] : memref<16x1xf32, #tpu.memory_space<vmem>>, vector<16x1xf32>
    %c0_3 = arith.constant 0 : index
    %c0_4 = arith.constant 0 : index
    %2 = vector.load %arg4[%c0_3, %c0_4] : memref<121x25xbf16, #tpu.memory_space<vmem>>, vector<121x25xbf16>
    %c0_i32 = arith.constant 0 : i32
    %c8_i32 = arith.constant 8 : i32
    %3 = arith.addi %c0_i32, %c8_i32 : i32
    %c1_i32 = arith.constant 1 : i32
    scf.for %arg6 = %c0_i32 to %3 step %c1_i32  : i32 {
      %4 = arith.index_cast %arg6 : i32 to index
      %c0_6 = arith.constant 0 : index
      %c0_7 = arith.constant 0 : index
      %5 = vector.load %arg1[%4, %c0_6, %c0_7] : memref<8x6x200xbf16, #tpu.memory_space<vmem>>, vector<1x6x200xbf16>
      %6 = vector.shape_cast %5 : vector<1x6x200xbf16> to vector<6x200xbf16>
      %7 = vector.extract_strided_slice %6 {offsets = [0, 0], sizes = [6, 140], strides = [1, 1]} : vector<6x200xbf16> to vector<6x140xbf16>
      %8 = vector.extract_strided_slice %6 {offsets = [0, 1], sizes = [6, 140], strides = [1, 1]} : vector<6x200xbf16> to vector<6x140xbf16>
      %9 = vector.extract_strided_slice %6 {offsets = [0, 2], sizes = [6, 140], strides = [1, 1]} : vector<6x200xbf16> to vector<6x140xbf16>
      %10 = vector.extract_strided_slice %6 {offsets = [0, 3], sizes = [6, 140], strides = [1, 1]} : vector<6x200xbf16> to vector<6x140xbf16>
      %11 = vector.extract_strided_slice %6 {offsets = [0, 4], sizes = [6, 140], strides = [1, 1]} : vector<6x200xbf16> to vector<6x140xbf16>
      %12 = vector.extract_strided_slice %6 {offsets = [0, 14], sizes = [6, 140], strides = [1, 1]} : vector<6x200xbf16> to vector<6x140xbf16>
      %13 = vector.extract_strided_slice %6 {offsets = [0, 15], sizes = [6, 140], strides = [1, 1]} : vector<6x200xbf16> to vector<6x140xbf16>
      %14 = vector.extract_strided_slice %6 {offsets = [0, 16], sizes = [6, 140], strides = [1, 1]} : vector<6x200xbf16> to vector<6x140xbf16>
      %15 = vector.extract_strided_slice %6 {offsets = [0, 17], sizes = [6, 140], strides = [1, 1]} : vector<6x200xbf16> to vector<6x140xbf16>
      %16 = vector.extract_strided_slice %6 {offsets = [0, 18], sizes = [6, 140], strides = [1, 1]} : vector<6x200xbf16> to vector<6x140xbf16>
      %17 = vector.extract_strided_slice %6 {offsets = [0, 28], sizes = [6, 140], strides = [1, 1]} : vector<6x200xbf16> to vector<6x140xbf16>
      %18 = vector.extract_strided_slice %6 {offsets = [0, 29], sizes = [6, 140], strides = [1, 1]} : vector<6x200xbf16> to vector<6x140xbf16>
      %19 = vector.extract_strided_slice %6 {offsets = [0, 30], sizes = [6, 140], strides = [1, 1]} : vector<6x200xbf16> to vector<6x140xbf16>
      %20 = vector.extract_strided_slice %6 {offsets = [0, 31], sizes = [6, 140], strides = [1, 1]} : vector<6x200xbf16> to vector<6x140xbf16>
      %21 = vector.extract_strided_slice %6 {offsets = [0, 32], sizes = [6, 140], strides = [1, 1]} : vector<6x200xbf16> to vector<6x140xbf16>
      %22 = vector.extract_strided_slice %6 {offsets = [0, 42], sizes = [6, 140], strides = [1, 1]} : vector<6x200xbf16> to vector<6x140xbf16>
      %23 = vector.extract_strided_slice %6 {offsets = [0, 43], sizes = [6, 140], strides = [1, 1]} : vector<6x200xbf16> to vector<6x140xbf16>
      %24 = vector.extract_strided_slice %6 {offsets = [0, 44], sizes = [6, 140], strides = [1, 1]} : vector<6x200xbf16> to vector<6x140xbf16>
      %25 = vector.extract_strided_slice %6 {offsets = [0, 45], sizes = [6, 140], strides = [1, 1]} : vector<6x200xbf16> to vector<6x140xbf16>
      %26 = vector.extract_strided_slice %6 {offsets = [0, 46], sizes = [6, 140], strides = [1, 1]} : vector<6x200xbf16> to vector<6x140xbf16>
      %27 = vector.extract_strided_slice %6 {offsets = [0, 56], sizes = [6, 140], strides = [1, 1]} : vector<6x200xbf16> to vector<6x140xbf16>
      %28 = vector.extract_strided_slice %6 {offsets = [0, 57], sizes = [6, 140], strides = [1, 1]} : vector<6x200xbf16> to vector<6x140xbf16>
      %29 = vector.extract_strided_slice %6 {offsets = [0, 58], sizes = [6, 140], strides = [1, 1]} : vector<6x200xbf16> to vector<6x140xbf16>
      %30 = vector.extract_strided_slice %6 {offsets = [0, 59], sizes = [6, 140], strides = [1, 1]} : vector<6x200xbf16> to vector<6x140xbf16>
      %31 = vector.extract_strided_slice %6 {offsets = [0, 60], sizes = [6, 140], strides = [1, 1]} : vector<6x200xbf16> to vector<6x140xbf16>
      %cst = arith.constant 0.000000e+00 : bf16
      %32 = vector.broadcast %cst : bf16 to vector<10x140xbf16>
      %33 = tpu.concatenate %7, %8, %9, %10, %11, %12, %13, %14, %15, %16, %17, %18, %19, %20, %21, %22 in 0 : vector<6x140xbf16>, vector<6x140xbf16>, vector<6x140xbf16>, vector<6x140xbf16>, vector<6x140xbf16>, vector<6x140xbf16>, vector<6x140xbf16>, vector<6x140xbf16>, vector<6x140xbf16>, vector<6x140xbf16>, vector<6x140xbf16>, vector<6x140xbf16>, vector<6x140xbf16>, vector<6x140xbf16>, vector<6x140xbf16>, vector<6x140xbf16> -> vector<96x140xbf16>
      %34 = tpu.concatenate %23, %24, %25, %26, %27, %28, %29, %30, %31, %32 in 0 : vector<6x140xbf16>, vector<6x140xbf16>, vector<6x140xbf16>, vector<6x140xbf16>, vector<6x140xbf16>, vector<6x140xbf16>, vector<6x140xbf16>, vector<6x140xbf16>, vector<6x140xbf16>, vector<10x140xbf16> -> vector<64x140xbf16>
      %35 = tpu.concatenate %33, %34 in 0 : vector<96x140xbf16>, vector<64x140xbf16> -> vector<160x140xbf16>
      %cst_8 = arith.constant dense<0.000000e+00> : vector<16x140xf32>
      %36 = tpu.matmul %0, %35, %cst_8 {dimension_numbers = #tpu.dot_dimension_numbers<[1], [0], [0], [1], [0, 0, 1, 1], [], []>} : vector<16x160xbf16>, vector<160x140xbf16>, vector<16x140xf32> -> vector<16x140xf32>
      %37 = vector.broadcast %1 : vector<16x1xf32> to vector<16x140xf32>
      %38 = arith.addf %36, %37 : vector<16x140xf32>
      %cst_9 = arith.constant 0.000000e+00 : f32
      %39 = vector.broadcast %cst_9 : f32 to vector<16x140xf32>
      %40 = arith.maximumf %38, %39 : vector<16x140xf32>
      %41 = vector.extract_strided_slice %40 {offsets = [0, 0], sizes = [16, 121], strides = [1, 1]} : vector<16x140xf32> to vector<16x121xf32>
      %42 = vector.extract_strided_slice %40 {offsets = [0, 1], sizes = [16, 121], strides = [1, 1]} : vector<16x140xf32> to vector<16x121xf32>
      %43 = arith.maximumf %41, %42 : vector<16x121xf32>
      %44 = vector.extract_strided_slice %40 {offsets = [0, 14], sizes = [16, 121], strides = [1, 1]} : vector<16x140xf32> to vector<16x121xf32>
      %45 = vector.extract_strided_slice %40 {offsets = [0, 15], sizes = [16, 121], strides = [1, 1]} : vector<16x140xf32> to vector<16x121xf32>
      %46 = arith.maximumf %44, %45 : vector<16x121xf32>
      %47 = arith.maximumf %43, %46 : vector<16x121xf32>
      %48 = arith.truncf %47 : vector<16x121xf32> to vector<16x121xbf16>
      %cst_10 = arith.constant dense<0.000000e+00> : vector<16x25xf32>
      %49 = tpu.matmul %48, %2, %cst_10 {dimension_numbers = #tpu.dot_dimension_numbers<[1], [0], [0], [1], [0, 0, 1, 1], [], []>} : vector<16x121xbf16>, vector<121x25xbf16>, vector<16x25xf32> -> vector<16x25xf32>
      %50 = arith.truncf %49 : vector<16x25xf32> to vector<16x25xbf16>
      %51 = arith.index_cast %arg6 : i32 to index
      %c0_11 = arith.constant 0 : index
      %c0_12 = arith.constant 0 : index
      %52 = vector.load %arg5[%51, %c0_11, %c0_12] : memref<8x16x25xbf16, #tpu.memory_space<vmem>>, vector<1x16x25xbf16>
      %53 = vector.shape_cast %52 : vector<1x16x25xbf16> to vector<16x25xbf16>
      %54 = vector.shape_cast %50 : vector<16x25xbf16> to vector<1x16x25xbf16>
      tpu.vector_store %arg5[%51, %c0_11, %c0_12], %54 {strides = array<i32>} : memref<8x16x25xbf16, #tpu.memory_space<vmem>>, vector<1x16x25xbf16>,
    }
    %c8_i32_5 = arith.constant 8 : i32
    return
  }
  func.func @transform_0(%arg0: i32) -> (i32, i32, i32) {
    %c0_i32 = arith.constant 0 : i32
    %c0_i32_0 = arith.constant 0 : i32
    %c0_i32_1 = arith.constant 0 : i32
    return %arg0, %c0_i32, %c0_i32_0 : i32, i32, i32
  }
  func.func @transform_1(%arg0: i32) -> (i32, i32) {
    %c0_i32 = arith.constant 0 : i32
    %c0_i32_0 = arith.constant 0 : i32
    %c0_i32_1 = arith.constant 0 : i32
    return %c0_i32, %c0_i32_0 : i32, i32
  }
  func.func @transform_2(%arg0: i32) -> (i32, i32) {
    %c0_i32 = arith.constant 0 : i32
    %c0_i32_0 = arith.constant 0 : i32
    %c0_i32_1 = arith.constant 0 : i32
    return %c0_i32, %c0_i32_0 : i32, i32
  }
  func.func @transform_3(%arg0: i32) -> (i32, i32) {
    %c0_i32 = arith.constant 0 : i32
    %c0_i32_0 = arith.constant 0 : i32
    %c0_i32_1 = arith.constant 0 : i32
    return %c0_i32, %c0_i32_0 : i32, i32
  }
  func.func @transform_4(%arg0: i32) -> (i32, i32, i32) {
    %c0_i32 = arith.constant 0 : i32
    %c0_i32_0 = arith.constant 0 : i32
    %c0_i32_1 = arith.constant 0 : i32
    return %arg0, %c0_i32, %c0_i32_0 : i32, i32, i32
  }
}

module attributes {stable_mosaic.version = 11 : i64} {
  func.func @_fc_kernel(%arg0: i32, %arg1: memref<8x400xbf16, #tpu.memory_space<vmem>>, %arg2: memref<400x128xbf16, #tpu.memory_space<vmem>>, %arg3: memref<1x128xf32, #tpu.memory_space<vmem>>, %arg4: memref<128x128xbf16, #tpu.memory_space<vmem>>, %arg5: memref<1x128xf32, #tpu.memory_space<vmem>>, %arg6: memref<128x128xbf16, #tpu.memory_space<vmem>>, %arg7: memref<1x128xf32, #tpu.memory_space<vmem>>, %arg8: memref<8x128xf32, #tpu.memory_space<vmem>>) attributes {dimension_semantics = [#tpu.dimension_semantics<parallel>], iteration_bounds = array<i64: 1>, scalar_prefetch = 0 : i64, scratch_operands = 0 : i64, tpu.core_type = #tpu.core_type<tc>, window_params = [{transform_indices = @transform_0, window_bounds = array<i64: 8, 400>}, {pipeline_mode = #tpu.pipeline_mode<synchronous>, transform_indices = @transform_1, window_bounds = array<i64: 400, 128>}, {pipeline_mode = #tpu.pipeline_mode<synchronous>, transform_indices = @transform_2, window_bounds = array<i64: 1, 128>}, {pipeline_mode = #tpu.pipeline_mode<synchronous>, transform_indices = @transform_3, window_bounds = array<i64: 128, 128>}, {pipeline_mode = #tpu.pipeline_mode<synchronous>, transform_indices = @transform_4, window_bounds = array<i64: 1, 128>}, {pipeline_mode = #tpu.pipeline_mode<synchronous>, transform_indices = @transform_5, window_bounds = array<i64: 128, 128>}, {pipeline_mode = #tpu.pipeline_mode<synchronous>, transform_indices = @transform_6, window_bounds = array<i64: 1, 128>}, {transform_indices = @transform_7, window_bounds = array<i64: 8, 128>}]} {
    %c0 = arith.constant 0 : index
    %c0_0 = arith.constant 0 : index
    %0 = vector.load %arg1[%c0, %c0_0] : memref<8x400xbf16, #tpu.memory_space<vmem>>, vector<8x400xbf16>
    %c0_1 = arith.constant 0 : index
    %c0_2 = arith.constant 0 : index
    %1 = vector.load %arg2[%c0_1, %c0_2] : memref<400x128xbf16, #tpu.memory_space<vmem>>, vector<400x128xbf16>
    %cst = arith.constant dense<0.000000e+00> : vector<8x128xf32>
    %2 = tpu.matmul %0, %1, %cst {dimension_numbers = #tpu.dot_dimension_numbers<[1], [0], [0], [1], [0, 0, 1, 1], [], []>} : vector<8x400xbf16>, vector<400x128xbf16>, vector<8x128xf32> -> vector<8x128xf32>
    %c0_3 = arith.constant 0 : index
    %c0_4 = arith.constant 0 : index
    %3 = vector.load %arg3[%c0_3, %c0_4] : memref<1x128xf32, #tpu.memory_space<vmem>>, vector<1x128xf32>
    %4 = vector.broadcast %3 : vector<1x128xf32> to vector<8x128xf32>
    %5 = arith.addf %2, %4 : vector<8x128xf32>
    %cst_5 = arith.constant 0.000000e+00 : f32
    %6 = vector.broadcast %cst_5 : f32 to vector<8x128xf32>
    %7 = arith.maximumf %5, %6 : vector<8x128xf32>
    %8 = arith.truncf %7 : vector<8x128xf32> to vector<8x128xbf16>
    %c0_6 = arith.constant 0 : index
    %c0_7 = arith.constant 0 : index
    %9 = vector.load %arg4[%c0_6, %c0_7] : memref<128x128xbf16, #tpu.memory_space<vmem>>, vector<128x128xbf16>
    %cst_8 = arith.constant dense<0.000000e+00> : vector<8x128xf32>
    %10 = tpu.matmul %8, %9, %cst_8 {dimension_numbers = #tpu.dot_dimension_numbers<[1], [0], [0], [1], [0, 0, 1, 1], [], []>} : vector<8x128xbf16>, vector<128x128xbf16>, vector<8x128xf32> -> vector<8x128xf32>
    %c0_9 = arith.constant 0 : index
    %c0_10 = arith.constant 0 : index
    %11 = vector.load %arg5[%c0_9, %c0_10] : memref<1x128xf32, #tpu.memory_space<vmem>>, vector<1x128xf32>
    %12 = vector.broadcast %11 : vector<1x128xf32> to vector<8x128xf32>
    %13 = arith.addf %10, %12 : vector<8x128xf32>
    %cst_11 = arith.constant 0.000000e+00 : f32
    %14 = vector.broadcast %cst_11 : f32 to vector<8x128xf32>
    %15 = arith.maximumf %13, %14 : vector<8x128xf32>
    %16 = arith.truncf %15 : vector<8x128xf32> to vector<8x128xbf16>
    %c0_12 = arith.constant 0 : index
    %c0_13 = arith.constant 0 : index
    %17 = vector.load %arg6[%c0_12, %c0_13] : memref<128x128xbf16, #tpu.memory_space<vmem>>, vector<128x128xbf16>
    %cst_14 = arith.constant dense<0.000000e+00> : vector<8x128xf32>
    %18 = tpu.matmul %16, %17, %cst_14 {dimension_numbers = #tpu.dot_dimension_numbers<[1], [0], [0], [1], [0, 0, 1, 1], [], []>} : vector<8x128xbf16>, vector<128x128xbf16>, vector<8x128xf32> -> vector<8x128xf32>
    %c0_15 = arith.constant 0 : index
    %c0_16 = arith.constant 0 : index
    %19 = vector.load %arg7[%c0_15, %c0_16] : memref<1x128xf32, #tpu.memory_space<vmem>>, vector<1x128xf32>
    %20 = vector.broadcast %19 : vector<1x128xf32> to vector<8x128xf32>
    %21 = arith.addf %18, %20 : vector<8x128xf32>
    %c0_17 = arith.constant 0 : index
    %c0_18 = arith.constant 0 : index
    %22 = vector.load %arg8[%c0_17, %c0_18] : memref<8x128xf32, #tpu.memory_space<vmem>>, vector<8x128xf32>
    tpu.vector_store %arg8[%c0_17, %c0_18], %21 {strides = array<i32>} : memref<8x128xf32, #tpu.memory_space<vmem>>, vector<8x128xf32>,
    return
  }
  func.func @transform_0(%arg0: i32) -> (i32, i32) {
    %c0_i32 = arith.constant 0 : i32
    %c0_i32_0 = arith.constant 0 : i32
    return %arg0, %c0_i32 : i32, i32
  }
  func.func @transform_1(%arg0: i32) -> (i32, i32) {
    %c0_i32 = arith.constant 0 : i32
    %c0_i32_0 = arith.constant 0 : i32
    %c0_i32_1 = arith.constant 0 : i32
    return %c0_i32, %c0_i32_0 : i32, i32
  }
  func.func @transform_2(%arg0: i32) -> (i32, i32) {
    %c0_i32 = arith.constant 0 : i32
    %c0_i32_0 = arith.constant 0 : i32
    %c0_i32_1 = arith.constant 0 : i32
    return %c0_i32, %c0_i32_0 : i32, i32
  }
  func.func @transform_3(%arg0: i32) -> (i32, i32) {
    %c0_i32 = arith.constant 0 : i32
    %c0_i32_0 = arith.constant 0 : i32
    %c0_i32_1 = arith.constant 0 : i32
    return %c0_i32, %c0_i32_0 : i32, i32
  }
  func.func @transform_4(%arg0: i32) -> (i32, i32) {
    %c0_i32 = arith.constant 0 : i32
    %c0_i32_0 = arith.constant 0 : i32
    %c0_i32_1 = arith.constant 0 : i32
    return %c0_i32, %c0_i32_0 : i32, i32
  }
  func.func @transform_5(%arg0: i32) -> (i32, i32) {
    %c0_i32 = arith.constant 0 : i32
    %c0_i32_0 = arith.constant 0 : i32
    %c0_i32_1 = arith.constant 0 : i32
    return %c0_i32, %c0_i32_0 : i32, i32
  }
  func.func @transform_6(%arg0: i32) -> (i32, i32) {
    %c0_i32 = arith.constant 0 : i32
    %c0_i32_0 = arith.constant 0 : i32
    %c0_i32_1 = arith.constant 0 : i32
    return %c0_i32, %c0_i32_0 : i32, i32
  }
  func.func @transform_7(%arg0: i32) -> (i32, i32) {
    %c0_i32 = arith.constant 0 : i32
    %c0_i32_0 = arith.constant 0 : i32
    return %arg0, %c0_i32 : i32, i32
  }
}

</mosaic_0001>

<bundles_post_ra>
// kernel: net_forward.4
= control target key start
LH: loop header
LB: loop body
LE: loop exit
PB: predicated region body
PF: predicated region fallthrough
CT: control target
= control target key end

     0   :  { %s914_s0 = inlined_call_operand.vmem [shape: bf16[8,6,200], index: 0, kind: input, shape index: {}]   ;;  %s915_s1 = inlined_call_operand.vmem [shape: bf16[16,160], index: 1, kind: input, shape index: {}]   ;;  %s916_s2 = inlined_call_operand.vmem [shape: f32[16,1], index: 2, kind: input, shape index: {}]   ;;  %s917_s3 = inlined_call_operand.vmem [shape: bf16[121,25], index: 3, kind: input, shape index: {}]   ;;  %s918_s4 = inlined_call_operand.vmem [shape: bf16[8,16,25], index: 4, kind: output, shape index: {}]  }
   0x1   :  { %v688_v0 = vld [vmem:[%s915_s1] sm:$0xff]  ;;  %v693_v1 = vld [vmem:[%s915_s1 + $0x8] sm:$0xff]  ;;  %v728_v8 = vld [vmem:[%s917_s3 + $0x10] sm:$0xf]  ;;  %s785_s1 = smov 0  }
   0x2   :  { %v698_v2 = vld [vmem:[%s916_s2] sm:$0xff]  ;;  %v703_v3 = vld [vmem:[%s916_s2 + $0x8] sm:$0xff]  ;;  %v733_v9 = vld [vmem:[%s917_s3 + $0x14] sm:$0xf] }
   0x3   :  { %v708_v4 = vld [vmem:[%s917_s3] sm:$0xf]  ;;  %v713_v5 = vld [vmem:[%s917_s3 + $0x4] sm:$0xf]  ;;  %v718_v6 = vld [vmem:[%s917_s3 + $0x8] sm:$0xf] }
   0x4   :  { %v723_v7 = vld [vmem:[%s917_s3 + $0xc] sm:$0xf]  ;;  %v738_v10 = vld [vmem:[%s917_s3 + $0x18] sm:$0xf]  ;;  %v743_v11 = vld [vmem:[%s917_s3 + $0x1c] sm:$0xf] }
   0x5   :  { %v748_v12 = vld [vmem:[%s917_s3 + $0x20] sm:$0xf]  ;;  %v753_v13 = vld [vmem:[%s917_s3 + $0x24] sm:$0xf]  ;;  %v758_v14 = vld [vmem:[%s917_s3 + $0x28] sm:$0xf] }
   0x6   :  { %v763_v15 = vld [vmem:[%s917_s3 + $0x2c] sm:$0xf]  ;;  %v768_v16 = vld [vmem:[%s917_s3 + $0x30] sm:$0xf]  ;;  %v773_v17 = vld [vmem:[%s917_s3 + $0x34] sm:$0xf] }
   0x7   :  { %v778_v18 = vld [vmem:[%s917_s3 + $0x38] sm:$0xf]  ;;  %v783_v19 = vld [vmem:[%s917_s3 + $0x3c] sm:$0x1] }
   0x8 LB: > { %s545_s27 = sshll.u32 %s637_s1, 3  ;;  %s639_s3 = smov 126   ;;  %vm67_vm0 = vcmask 1031168   ;;  %vm59_vm1 = vcmask 1039360   ;;  %vm155_vm2 = vcmask 1042432   ;;  %vm162_vm3 = vcmask 1045504   ;;  %s637_s1 = sphi %s785_s1, %s43_s1  }
   0x9   : > { %s46_s2 = scalar_lea.vmem %s914_s0, %s545_s27  ;;  %s640_s30 = smov 127   ;;  %vm75_vm4 = vcmask 1022976   ;;  %vm238_vm5 = vcmask 941056   ;;  %vm169_vm6 = vcmask 1040384   ;;  %vm174_vm7 = vcmask 1043456  }
   0xa   : > { %v47_v20 = vld [vmem:[%s46_s2] sm:$0x77]  ;;  %s641_s5 = smov 125   ;;  %s642_s6 = smov 115   ;;  %vm89_vm8 = vcmask 932864   ;;  %vm179_vm9 = vcmask 1046528   ;;  %v531_v60 = vcombine.high %v688_v0, %v693_v1 }
   0xb   : > { %v796_v21 = vcombine.low %v47_v20, %v47_v20  ;;  %v798_v22 = vcombine.high %v47_v20, %v47_v20  ;;  %s643_s7 = smov 114   ;;  %s644_s8 = smov 113   ;;  %vm97_vm10 = vcmask 924672   ;;  %vm305_vm11 = vcmask 261120  }
   0xc   : > { %s645_s9 = smov 112   ;;  %s646_s10 = smov 111   ;;  %vm186_vm12 = vcmask 1041408   ;;  %532 = vmatprep.mubr.msk.bf16.mxu0 %vm305_vm11, %v531_v60  ;;  %vm105_vm13 = vcmask 916480   ;;  %vm191_vm14 = vcmask 1044480   ;;  %v656_v20 = vmov 0  }
   0xd   : > { %v61_v23 = vrot.slane %v796_v21, 2  ;;  %v53_v24 = vrot.slane %v796_v21, 5  ;;  %v62_v25 = vrot.slane %v798_v22, 2  ;;  %v54_v26 = vrot.slane %v798_v22, 5  ;;  %s647_s11 = smov 124   ;;  %s648_s12 = smov 110   ;;  %607 = vset.pattern.permute.xlu0 %v656_v20  ;;  %608 = vset.pattern.permute.xlu1 %v656_v20 }
   0xe   : > { %v70_v27 = vrot.slane %v798_v22, 7  ;;  %v69_v28 = vrot.slane %v796_v21, 7  ;;  %v84_v29 = vrot.slane %v798_v22, 1  ;;  %v83_v30 = vrot.slane %v796_v21, 1  ;;  %s649_s13 = smov 100   ;;  %s650_s14 = smov 99  }
   0xf   : > { %63 = vrot.lane.b32.xlu1 %v61_v23, %s639_s3  ;;  %55 = vrot.lane.b32.xlu0 %v53_v24, %s640_s30  ;;  %v92_v31 = vrot.slane %v798_v22, 6  ;;  %v91_v32 = vrot.slane %v796_v21, 6  ;;  %v100_v33 = vrot.slane %v798_v22, 3  ;;  %v99_v34 = vrot.slane %v796_v21, 3  ;;  %s651_s15 = smov 98   ;;  %s652_s16 = smov 97  }
  0x10   : > { %s653_s17 = smov 96   ;;  %s654_s18 = smov 86   ;;  %vm111_vm15 = vcmask 908288   ;;  %vm135_vm11 = vcmask 801792  }
  0x11   : > { %s655_s19 = smov 85   ;;  %s509_s22 = scalar_lea.vmem %s918_s4, %s545_s27 }
  0x12   : > { %s43_s1 = sadd.s32 1, %s637_s1  }
  0x13   : > { %65 = vrot.lane.b32.xlu1 %v62_v25, %s639_s3  ;;  %57 = vrot.lane.b32.xlu0 %v54_v26, %s640_s30  ;;  %p40_p0 = scmp.ge.s32.totalorder %s43_s1, 8  }
  0x17   : > { %73 = vrot.lane.b32.xlu1 %v70_v27, %s641_s5  ;;  %71 = vrot.lane.b32.xlu0 %v69_v28, %s641_s5 }
  0x1b   : > { %236 = vrot.lane.b32.xlu1 %v798_v22, %s642_s6  ;;  %234 = vrot.lane.b32.xlu0 %v796_v21, %s642_s6 }
  0x1f   : > { %87 = vrot.lane.b32.xlu1 %v84_v29, %s643_s7  ;;  %85 = vrot.lane.b32.xlu0 %v83_v30, %s643_s7 }
  0x23   : > { %95 = vrot.lane.b32.xlu1 %v92_v31, %s644_s8  ;;  %93 = vrot.lane.b32.xlu0 %v91_v32, %s644_s8 }
  0x27   : > { %103 = vrot.lane.b32.xlu1 %v100_v33, %s645_s9  ;;  %101 = vrot.lane.b32.xlu0 %v99_v34, %s645_s9 }
  0x2b   : > { %109 = vrot.lane.b32.xlu1 %v798_v22, %s646_s10  ;;  %107 = vrot.lane.b32.xlu0 %v796_v21, %s646_s10 }
  0x2f   : > { %79 = vrot.lane.b32.xlu1 %v798_v22, %s647_s11  ;;  %77 = vrot.lane.b32.xlu0 %v796_v21, %s647_s11 }
  0x33   : > { %115 = vrot.lane.b32.xlu1 %v54_v26, %s648_s12  ;;  %113 = vrot.lane.b32.xlu0 %v53_v24, %s648_s12 }
  0x37   : > { %121 = vrot.lane.b32.xlu1 %v62_v25, %s649_s13  ;;  %119 = vrot.lane.b32.xlu0 %v61_v23, %s649_s13 }
  0x3b   : > { %127 = vrot.lane.b32.xlu1 %v70_v27, %s650_s14  ;;  %125 = vrot.lane.b32.xlu0 %v69_v28, %s650_s14 }
  0x3f   : > { %133 = vrot.lane.b32.xlu1 %v798_v22, %s651_s15  ;;  %131 = vrot.lane.b32.xlu0 %v796_v21, %s651_s15 }
  0x43   : > { %139 = vrot.lane.b32.xlu1 %v84_v29, %s652_s16  ;;  %137 = vrot.lane.b32.xlu0 %v83_v30, %s652_s16 }
  0x47   : > { %145 = vrot.lane.b32.xlu1 %v92_v31, %s653_s17  ;;  %143 = vrot.lane.b32.xlu0 %v91_v32, %s653_s17 }
  0x4b   : > { %151 = vrot.lane.b32.xlu1 %v100_v33, %s654_s18  ;;  %149 = vrot.lane.b32.xlu0 %v99_v34, %s654_s18 }
  0x81   : > { %v64_v35 = vpop.permute.xlu1 %63  ;;  %v56_v36 = vpop.permute.xlu0 %55 }
  0x85   : > { %v66_v37 = vpop.permute.xlu1 %65  ;;  %v58_v38 = vpop.permute.xlu0 %57 }
  0x86   : > { %v68_v39 = vsel %vm67_vm0, %v64_v35, %v66_v37  ;;  %v60_v40 = vsel %vm59_vm1, %v56_v36, %v58_v38  ;;  %v161_v41 = vsel %vm155_vm2, %v798_v22, %v58_v38  ;;  %vm81_vm0 = vcmask 1014784  }
  0x87   : > { %v167_v42 = vsel %vm162_vm3, %v161_v41, %v66_v37  ;;  %v158_v43 = vsel %vm155_vm2, %v796_v21, %v60_v40 }
  0x88   : > { %259 = vrot.lane.b32.xlu1 %v167_v42, %s655_s19  ;;  %309 = vmatprep.subr.bf16.mxu0 %v167_v42  ;;  %v164_v44 = vsel %vm162_vm3, %v158_v43, %v68_v39 }
  0x89   : > { %v74_v45 = vpop.permute.xlu1 %73  ;;  %257 = vrot.lane.b32.xlu0 %v164_v44, %s655_s19  ;;  %310 = vmatpush1.bf16.msra.mxu0 %v164_v44  ;;  %v72_v46 = vpop.permute.xlu0 %71 }
  0x8a   : > { %v76_v49 = vsel %vm75_vm4, %v72_v46, %v74_v45  ;;  %v173_v51 = vsel %vm169_vm6, %v66_v37, %v74_v45  ;;  %vm117_vm4 = vcmask 900096  }
  0x8b   : > { %v171_v52 = vsel %vm169_vm6, %v68_v39, %v76_v49 }
  0x8d   : > { %v237_v47 = vpop.permute.xlu1 %236  ;;  %v235_v48 = vpop.permute.xlu0 %234 }
  0x8e   : > { %v239_v50 = vsel %vm238_vm5, %v235_v48, %v237_v47  ;;  %v243_v53 = vsel %vm174_vm7, %v173_v51, %v237_v47  ;;  %vm123_vm5 = vcmask 818176  }
  0x8f   : > { %v241_v58 = vsel %vm174_vm7, %v171_v52, %v239_v50 }
  0x91   : > { %v88_v54 = vpop.permute.xlu1 %87  ;;  %v86_v55 = vpop.permute.xlu0 %85 }
  0x92   : > { %v90_v56 = vsel %vm89_vm8, %v86_v55, %v88_v54  ;;  %v245_v57 = vsel %vm179_vm9, %v243_v53, %v88_v54 }
  0x93   : > { %263 = vrot.lane.b32.xlu1 %v245_v57, %s655_s19  ;;  %v244_v59 = vsel %vm179_vm9, %v241_v58, %v90_v56 }
  0x94   : > { %261 = vrot.lane.b32.xlu0 %v244_v59, %s655_s19 }
  0x95   : > { %v96_v61 = vpop.permute.xlu1 %95  ;;  %v94_v62 = vpop.permute.xlu0 %93 }
  0x96   : > { %v98_v63 = vsel %vm97_vm10, %v94_v62, %v96_v61  ;;  %v190_v21 = vsel %vm186_vm12, %v88_v54, %v96_v61  ;;  %vm129_vm10 = vcmask 809984  }
  0x97   : > { %v188_v26 = vsel %vm186_vm12, %v90_v56, %v98_v63 }
  0x99   : > { %v104_v22 = vpop.permute.xlu1 %103  ;;  %v102_v23 = vpop.permute.xlu0 %101 }
  0x9a   : > { %v106_v24 = vsel %vm105_vm13, %v102_v23, %v104_v22  ;;  %v196_v25 = vsel %vm191_vm14, %v190_v21, %v104_v22  ;;  %vm141_vm13 = vcmask 793600  }
  0x9b   : > { %267 = vrot.lane.b32.xlu1 %v196_v25, %s655_s19  ;;  %v193_v27 = vsel %vm191_vm14, %v188_v26, %v106_v24 }
  0x9c   : > { %265 = vrot.lane.b32.xlu0 %v193_v27, %s655_s19 }
  0x9d   : > { %v110_v28 = vpop.permute.xlu1 %109  ;;  %v108_v29 = vpop.permute.xlu0 %107 }
  0x9e   : > { %v112_v30 = vsel %vm111_vm15, %v108_v29, %v110_v28  ;;  %v248_v31 = vsel %vm155_vm2, %v110_v28, 0 }
  0x9f   : > { %271 = vrot.lane.b32.xlu1 %v248_v31, %s655_s19  ;;  %v247_v32 = vsel %vm155_vm2, %v112_v30, 0 }
  0xa0   : > { %269 = vrot.lane.b32.xlu0 %v247_v32, %s655_s19 }
  0xa1   : > { %v80_v33 = vpop.permute.xlu1 %79  ;;  %v78_v34 = vpop.permute.xlu0 %77 }
  0xa2   : > { %v178_v35 = vsel %vm174_vm7, %v173_v51, %v80_v33  ;;  %v82_v36 = vsel %vm81_vm0, %v78_v34, %v80_v33 }
  0xa3   : > { %v184_v37 = vsel %vm179_vm9, %v178_v35, %v88_v54  ;;  %v176_v38 = vsel %vm174_vm7, %v171_v52, %v82_v36  ;;  %293 = vperm.xlu1 %608, %v703_v3  }
  0xa4   : > { %311 = vmatprep.subr.bf16.mxu0 %v184_v37  ;;  %v181_v39 = vsel %vm179_vm9, %v176_v38, %v90_v56  ;;  %288 = vperm.xlu0 %607, %v698_v2  }
  0xa5   : > { %v116_v40 = vpop.permute.xlu1 %115  ;;  %312 = vmatpush1.bf16.msra.mxu0 %v181_v39  ;;  %v114_v41 = vpop.permute.xlu0 %113 }
  0xa6   : > { %313 = vmatprep.subr.bf16.mxu0 %v196_v25  ;;  %v118_v42 = vsel %vm117_vm4, %v114_v41, %v116_v40  ;;  %v203_v43 = vsel %vm155_vm2, %v110_v28, %v116_v40 }
  0xa7   : > { %v200_v48 = vsel %vm155_vm2, %v112_v30, %v118_v42  ;;  %vm147_vm2 = vcmask 785408  }
  0xa9   : > { %v122_v44 = vpop.permute.xlu1 %121  ;;  %314 = vmatpush1.bf16.msra.mxu0 %v193_v27  ;;  %v120_v45 = vpop.permute.xlu0 %119 }
  0xaa   : > { %v124_v46 = vsel %vm123_vm5, %v120_v45, %v122_v44  ;;  %v208_v47 = vsel %vm162_vm3, %v203_v43, %v122_v44  ;;  %v530_v43 = vcombine.low %v688_v0, %v693_v1 }
  0xab   : > { %315 = vmatprep.subr.bf16.mxu0 %v208_v47  ;;  %v205_v49 = vsel %vm162_vm3, %v200_v48, %v124_v46  ;;  %vm153_vm3 = vcmask 703488  }
  0xad   : > { %316 = vmatpush1.bf16.msra.mxu0 %v205_v49  ;;  %v128_v50 = vpop.permute.xlu1 %127  ;;  %v126_v51 = vpop.permute.xlu0 %125 }
  0xae   : > { %v130_v52 = vsel %vm129_vm10, %v126_v51, %v128_v50  ;;  %v213_v53 = vsel %vm169_vm6, %v122_v44, %v128_v50 }
  0xaf   : > { %v211_v54 = vsel %vm169_vm6, %v124_v46, %v130_v52  ;;  %vm273_vm6 = vcmask 695296  }
  0xb1   : > { %v134_v55 = vpop.permute.xlu1 %133  ;;  %v132_v56 = vpop.permute.xlu0 %131 }
  0xb2   : > { %v136_v57 = vsel %vm135_vm11, %v132_v56, %v134_v55  ;;  %v217_v58 = vsel %vm174_vm7, %v213_v53, %v134_v55 }
  0xb3   : > { %v215_v59 = vsel %vm174_vm7, %v211_v54, %v136_v57  ;;  %v533_v54 = vcombine.low %v708_v4, %v713_v5  ;;  %v657_v57 = vmov 0.0  }
  0xb4   : > { %558 = vmatprep.subr.bf16.mxu1 %v657_v57 }
  0xb5   : > { %v140_v60 = vpop.permute.xlu1 %139  ;;  %v138_v61 = vpop.permute.xlu0 %137  ;;  %559 = vmatpush3.bf16.msra.mxu1 %v533_v54 }
  0xb6   : > { %v142_v62 = vsel %vm141_vm13, %v138_v61, %v140_v60  ;;  %v222_v63 = vsel %vm179_vm9, %v217_v58, %v140_v60  ;;  %560 = vmatprep.subr.bf16.mxu1 %v657_v57 }
  0xb7   : > { %317 = vmatprep.subr.bf16.mxu0 %v222_v63  ;;  %v219_v20 = vsel %vm179_vm9, %v215_v59, %v142_v62  ;;  %v535_v63 = vcombine.low %v728_v8, %v733_v9  ;;  %vm659_vm9 = vmmov 0  }
  0xb8   : > { %318 = vmatpush1.bf16.msra.mxu0 %v219_v20  ;;  %v536_v20 = vcombine.low %v738_v10, %v743_v11  ;;  %574 = vmatprep.mubr.msk.bf16.mxu1 %vm659_vm9, %v657_v57 }
  0xb9   : > { %v146_v21 = vpop.permute.xlu1 %145  ;;  %v144_v22 = vpop.permute.xlu0 %143 }
  0xba   : > { %v148_v23 = vsel %vm147_vm2, %v144_v22, %v146_v21  ;;  %v227_v24 = vsel %vm186_vm12, %v140_v60, %v146_v21  ;;  %v534_v60 = vcombine.low %v718_v6, %v723_v7  ;;  %v537_v21 = vcombine.low %v748_v12, %v753_v13 }
  0xbb   : > { %v225_v25 = vsel %vm186_vm12, %v142_v62, %v148_v23  ;;  %v538_v22 = vcombine.low %v758_v14, %v763_v15  ;;  %v539_v23 = vcombine.low %v768_v16, %v773_v17 }
  0xbc   : > { %561 = vmatpush3.bf16.msra.mxu1 %v534_v60 }
  0xbd   : > { %v152_v26 = vpop.permute.xlu1 %151  ;;  %v150_v27 = vpop.permute.xlu0 %149  ;;  %562 = vmatprep.subr.bf16.mxu1 %v657_v57 }
  0xbe   : > { %v154_v28 = vsel %vm153_vm3, %v150_v27, %v152_v26  ;;  %v232_v29 = vsel %vm191_vm14, %v227_v24, %v152_v26  ;;  %v540_v24 = vcombine.low %v778_v18, %v783_v19 }
  0xbf   : > { %319 = vmatprep.subr.bf16.mxu0 %v232_v29  ;;  %v229_v30 = vsel %vm191_vm14, %v225_v25, %v154_v28  ;;  %v658_v25 = vmov 65535  }
  0xc0   : > { %320 = vmatpush1.bf16.msra.mxu0 %v229_v30  ;;  %563 = vmatpush3.bf16.msra.mxu1 %v535_v63  ;;  %v454_v26 = vsel %vm174_vm7, 4294967295, %v658_v25  ;;  %vm510_vm7 = vcmask 199680  }
  0xc1   : > { %564 = vmatprep.subr.bf16.mxu1 %v657_v57  ;;  %v455_v27 = vsel %vm191_vm14, %v454_v26, 0 }
  0xc2   : > { %v457_v28 = vand.u32 %v540_v24, %v455_v27 }
  0xc4   : > { %565 = vmatpush3.bf16.msra.mxu1 %v536_v20 }
  0xc5   : > { %566 = vmatprep.subr.bf16.mxu1 %v657_v57 }
  0xc8   : > { %567 = vmatpush3.bf16.msra.mxu1 %v537_v21 }
  0xc9   : > { %568 = vmatprep.subr.bf16.mxu1 %v657_v57 }
  0xcc   : > { %569 = vmatpush3.bf16.msra.mxu1 %v538_v22 }
  0xcd   : > { %570 = vmatprep.subr.bf16.mxu1 %v657_v57 }
  0xd0   : > { %571 = vmatpush3.bf16.msra.mxu1 %v539_v23 }
  0xd1   : > { %572 = vmatprep.subr.bf16.mxu1 %v657_v57 }
  0xd4   : > { %573 = vmatpush3.bf16.msra.mxu1 %v457_v28 }
  0xfa   : > { %v260_v31 = vpop.permute.xlu1 %259 }
  0xfb   : > { %321 = vmatprep.subr.bf16.mxu0 %v260_v31  ;;  %v258_v32 = vpop.permute.xlu0 %257 }
  0xfc   : > { %v274_v33 = vsel %vm273_vm6, %v258_v32, %v260_v31 }
  0xfd   : > { %322 = vmatpush1.bf16.msra.mxu0 %v274_v33 }
 0x105   : > { %v264_v34 = vpop.permute.xlu1 %263 }
 0x106   : > { %323 = vmatprep.subr.bf16.mxu0 %v264_v34  ;;  %v262_v35 = vpop.permute.xlu0 %261 }
 0x107   : > { %v275_v36 = vsel %vm273_vm6, %v262_v35, %v264_v34 }
 0x108   : > { %324 = vmatpush1.bf16.msra.mxu0 %v275_v36 }
 0x10d   : > { %v268_v37 = vpop.permute.xlu1 %267 }
 0x10e   : > { %325 = vmatprep.subr.bf16.mxu0 %v268_v37  ;;  %v266_v38 = vpop.permute.xlu0 %265 }
 0x10f   : > { %v276_v39 = vsel %vm273_vm6, %v266_v38, %v268_v37 }
 0x110   : > { %326 = vmatpush1.bf16.msra.mxu0 %v276_v39 }
 0x111   : > { %v272_v40 = vpop.permute.xlu1 %271 }
 0x112   : > { %327 = vmatprep.subr.bf16.mxu0 %v272_v40  ;;  %v270_v41 = vpop.permute.xlu0 %269 }
 0x113   : > { %v277_v42 = vsel %vm273_vm6, %v270_v41, %v272_v40 }
 0x114   : > { %328 = vmatpush1.bf16.msra.mxu0 %v277_v42 }
 0x117   : > { %342 = vmatmul.mubr.bf16.vlgmr.msra.gmra.mrb[0].mxu0 %v530_v43 }
 0x122   : > { %v294_v46 = vpop.permute.xlu1 %293 }
 0x123   : > { %v289_v44 = vpop.permute.xlu0 %288 }
 0x1ea   : > { %v343_v45 = vpop.f32.mrb[0].mxu0 }
 0x1eb   : > { %v344_v47 = vadd.f32 %v343_v45, %v289_v44  ;;  %v345_v48 = vpop.f32.mrb[1].mxu0 }
 0x1ec   : > { %v346_v49 = vadd.f32 %v345_v48, %v289_v44  ;;  %v347_v50 = vpop.f32.mrb[2].mxu0 }
 0x1ed   : > { %v348_v51 = vadd.f32 %v347_v50, %v294_v46  ;;  %v349_v52 = vpop.f32.mrb[3].mxu0  ;;  %v352_v55 = vmax.f32 %v344_v47, 0.0 }
 0x1ee   : > { %v350_v53 = vadd.f32 %v349_v52, %v294_v46  ;;  %v353_v58 = vmax.f32 %v346_v49, 0.0 }
 0x1ef   : > { %v354_v56 = vmax.f32 %v348_v51, 0.0 }
 0x1f0   : > { %v355_v59 = vmax.f32 %v350_v53, 0.0 }
 0x1f1   : > { %v609_v61 = vpack.i.bf16 %v354_v56, %v352_v55 }
 0x1f2   : > { %v614_v62 = vpack.i.bf16 %v355_v59, %v353_v58 }
 0x1f3   : > { %610 = vrot.lane.b32.xlu1 %v609_v61, %s640_s30 }
 0x1f4   : > { %615 = vrot.lane.b32.xlu0 %v614_v62, %s640_s30 }
 0x265   : > { %v611_v29 = vpop.permute.xlu1 %610 }
 0x266   : > { %v613_v30 = vunpack.i.h.bf16 %v611_v29  ;;  %v612_v31 = vunpack.i.l.bf16 %v611_v29  ;;  %v616_v32 = vpop.permute.xlu0 %615 }
 0x267   : > { %v618_v33 = vunpack.i.h.bf16 %v616_v32  ;;  %v617_v34 = vunpack.i.l.bf16 %v616_v32 }
 0x268   : > { %v365_v49 = vmax.f32 %v354_v56, %v613_v30  ;;  %v364_v50 = vmax.f32 %v352_v55, %v612_v31 }
 0x269   : > { %v382_v35 = vmax.f32 %v355_v59, %v618_v33  ;;  %v373_v36 = vsel %vm59_vm1, %v612_v31, %v617_v34  ;;  %v374_v37 = vsel %vm59_vm1, %v613_v30, %v618_v33  ;;  %v380_v38 = vmax.f32 %v353_v58, %v617_v34 }
 0x26a   : > { %v381_v39 = vmax.f32 %v354_v56, %v374_v37  ;;  %v379_v40 = vmax.f32 %v352_v55, %v373_v36  ;;  %vm450_vm1 = vcmask 990208  }
 0x26c   : > { %v624_v41 = vpack.i.bf16 %v382_v35, %v381_v39  ;;  %v619_v42 = vpack.i.bf16 %v380_v38, %v379_v40 }
 0x26e   : > { %625 = vrot.lane.b32.xlu0 %v624_v41, %s643_s7  ;;  %620 = vrot.lane.b32.xlu1 %v619_v42, %s643_s7 }
 0x2e0   : > { %v626_v43 = vpop.permute.xlu0 %625  ;;  %v621_v44 = vpop.permute.xlu1 %620 }
 0x2e1   : > { %v628_v45 = vunpack.i.h.bf16 %v626_v43  ;;  %v627_v46 = vunpack.i.l.bf16 %v626_v43  ;;  %v623_v47 = vunpack.i.h.bf16 %v621_v44  ;;  %v622_v48 = vunpack.i.l.bf16 %v621_v44 }
 0x2e3   : > { %v397_v51 = vsel %vm89_vm8, %v627_v46, %v628_v45  ;;  %v396_v52 = vsel %vm89_vm8, %v622_v48, %v623_v47 }
 0x2e4   : > { %v401_v53 = vmax.f32 %v365_v49, %v397_v51  ;;  %v400_v54 = vmax.f32 %v364_v50, %v396_v52 }
 0x2e6   : > { %v402_v57 = vpack.c.bf16 %v401_v53, %v400_v54 }
 0x2e8   : > { %575 = vmatmul.mubr.msk.bf16.vlgmr.msra.gmra.mrb[0].mxu1 %vm450_vm1, %v402_v57 }
 0x3ba   :  { %42 = sbr.rel (!%p40_p0) target bundleno = 8 (0x8), region = 45 }
 0x3bb   : > { %v493_v58 = vpop.f32.mrb[0].mxu1 }
 0x3bc   : > { %v546_v59 = vpack.c.bf16 %v493_v58, %v493_v58  ;;  %v576_v60 = vpop.f32.mrb[1].mxu1 }
 0x3bd   : > { %v496_v56 = vpop.f32.mrb[2].mxu1 }
 0x3be   : > { %511 = vst.msk [vmem:[%s509_s22] sm:$0xf] %vm510_vm7, %v546_v59  ;;  %v547_v55 = vpack.c.bf16 %v496_v56, %v496_v56  ;;  %v577_v61 = vpop.f32.mrb[3].mxu1 }
 0x3c0   : > { %512 = vst.msk [vmem:[%s509_s22 + $0x4] sm:$0xf] %vm510_vm7, %v547_v55 }

// kernel: net_forward.5
= control target key start
LH: loop header
LB: loop body
LE: loop exit
PB: predicated region body
PF: predicated region fallthrough
CT: control target
= control target key end

     0   :  { %v741_v0 = vmov 0   ;;  %vm249_vm0 = vcmask 130048   ;;  %v742_v32 = vmov 0.0   ;;  %vm743_vm1 = vmmov 0   ;;  %s952_s1 = inlined_call_operand.vmem [shape: bf16[400,128], index: 1, kind: input, shape index: {}]   ;;  %s953_s0 = inlined_call_operand.vmem [shape: bf16[8,400], index: 0, kind: input, shape index: {}]   ;;  %s954_s3 = inlined_call_operand.vmem [shape: bf16[128,128], index: 3, kind: input, shape index: {}]   ;;  %s955_s5 = inlined_call_operand.vmem [shape: bf16[128,128], index: 5, kind: input, shape index: {}]   ;;  %s956_s2 = inlined_call_operand.vmem [shape: f32[1,128], index: 2, kind: input, shape index: {}]   ;;  %s957_s4 = inlined_call_operand.vmem [shape: f32[1,128], index: 4, kind: input, shape index: {}]   ;;  %s958_s6 = inlined_call_operand.vmem [shape: f32[1,128], index: 6, kind: input, shape index: {}]   ;;  %s959_s7 = inlined_call_operand.vmem [shape: f32[8,128], index: 7, kind: output, shape index: {}]  }
   0x1   :  { %293 = vmatprep.subr.bf16.mxu1 %v741_v0  ;;  %v696_v1 = vld [vmem:[%s952_s1 + $0x40] sm:$0xff]   ;;  %v699_v4 = vld [vmem:[%s952_s1 + $0x48] sm:$0xff]   ;;  %v702_v7 = vld [vmem:[%s952_s1 + $0x50] sm:$0xff]  }
   0x2   :  { %v697_v2 = vld [vmem:[%s952_s1 + $0x80] sm:$0xff]   ;;  %613 = vmatprep.subr.bf16.mxu0 %v696_v1  ;;  %v700_v5 = vld [vmem:[%s952_s1 + $0x88] sm:$0xff]   ;;  %v703_v8 = vld [vmem:[%s952_s1 + $0x90] sm:$0xff]  }
   0x3   :  { %v698_v3 = vld [vmem:[%s952_s1] sm:$0xff]   ;;  %294 = vmatpush1.bf16.msra.mxu1 %v697_v2  ;;  %v701_v6 = vld [vmem:[%s952_s1 + $0x8] sm:$0xff]   ;;  %v704_v9 = vld [vmem:[%s952_s1 + $0x10] sm:$0xff]  }
   0x4   :  { %614 = vmatpush3.bf16.msra.mxu0 %v698_v3  ;;  %295 = vmatprep.subr.bf16.mxu1 %v741_v0  ;;  %v705_v10 = vld [vmem:[%s952_s1 + $0x58] sm:$0xff]   ;;  %v708_v13 = vld [vmem:[%s952_s1 + $0x60] sm:$0xff]   ;;  %v711_v16 = vld [vmem:[%s952_s1 + $0x68] sm:$0xff]  }
   0x5   :  { %615 = vmatprep.subr.bf16.mxu0 %v699_v4  ;;  %v706_v11 = vld [vmem:[%s952_s1 + $0x98] sm:$0xff]   ;;  %v709_v14 = vld [vmem:[%s952_s1 + $0xa0] sm:$0xff]   ;;  %v712_v17 = vld [vmem:[%s952_s1 + $0xa8] sm:$0xff]  }
   0x6   :  { %v707_v12 = vld [vmem:[%s952_s1 + $0x18] sm:$0xff]   ;;  %v710_v15 = vld [vmem:[%s952_s1 + $0x20] sm:$0xff]   ;;  %v713_v18 = vld [vmem:[%s952_s1 + $0x28] sm:$0xff]  }
   0x7   :  { %296 = vmatpush1.bf16.msra.mxu1 %v700_v5  ;;  %v714_v19 = vld [vmem:[%s952_s1 + $0x70] sm:$0xff]   ;;  %v27_v22 = vld [vmem:[%s953_s0] sm:$0xff]  ;;  %v717_v23 = vld [vmem:[%s952_s1 + $0x78] sm:$0xff]  }
   0x8   :  { %616 = vmatpush3.bf16.msra.mxu0 %v701_v6  ;;  %297 = vmatprep.subr.bf16.mxu1 %v741_v0  ;;  %v715_v20 = vld [vmem:[%s952_s1 + $0xb0] sm:$0xff]   ;;  %v566_v24 = vcombine.high %v27_v22, %v27_v22  ;;  %v28_v25 = vld [vmem:[%s953_s0 + $0x8] sm:$0xff]  ;;  %v718_v27 = vld [vmem:[%s952_s1 + $0xb8] sm:$0xff]   ;;  %v565_v30 = vcombine.low %v27_v22, %v27_v22 }
   0x9   :  { %617 = vmatprep.subr.bf16.mxu0 %v702_v7  ;;  %v716_v21 = vld [vmem:[%s952_s1 + $0x30] sm:$0xff]   ;;  %v568_v26 = vcombine.high %v28_v25, %v28_v25  ;;  %v719_v28 = vld [vmem:[%s952_s1 + $0x38] sm:$0xff]   ;;  %v722_v29 = vld [vmem:[%s952_s1 + $0xc0] sm:$0xff]   ;;  %v567_v33 = vcombine.low %v28_v25, %v28_v25 }
   0xa   :  { %285 = vmatprep.mubr.bf16.mxu0 %v566_v24  ;;  %v725_v31 = vld [vmem:[%s954_s3] sm:$0xff]   ;;  %v726_v34 = vld [vmem:[%s954_s3 + $0x8] sm:$0xff]   ;;  %v727_v35 = vld [vmem:[%s954_s3 + $0x10] sm:$0xff]  }
   0xb   :  { %298 = vmatpush1.bf16.msra.mxu1 %v703_v8  ;;  %594 = vmatprep.mubr.msk.bf16.mxu1 %vm249_vm0, %v568_v26  ;;  %v728_v36 = vld [vmem:[%s954_s3 + $0x18] sm:$0xff]   ;;  %v729_v37 = vld [vmem:[%s954_s3 + $0x20] sm:$0xff]   ;;  %v730_v38 = vld [vmem:[%s954_s3 + $0x28] sm:$0xff]  }
   0xc   :  { %618 = vmatpush3.bf16.msra.mxu0 %v704_v9  ;;  %299 = vmatprep.subr.bf16.mxu1 %v741_v0  ;;  %v731_v39 = vld [vmem:[%s954_s3 + $0x30] sm:$0xff]   ;;  %v732_v40 = vld [vmem:[%s954_s3 + $0x38] sm:$0xff]   ;;  %v733_v41 = vld [vmem:[%s955_s5] sm:$0xff]  }
   0xd   :  { %619 = vmatprep.subr.bf16.mxu0 %v705_v10  ;;  %v734_v42 = vld [vmem:[%s955_s5 + $0x8] sm:$0xff]   ;;  %v735_v43 = vld [vmem:[%s955_s5 + $0x10] sm:$0xff]   ;;  %v736_v44 = vld [vmem:[%s955_s5 + $0x18] sm:$0xff]  }
   0xe   :  { %v737_v45 = vld [vmem:[%s955_s5 + $0x20] sm:$0xff]   ;;  %v738_v46 = vld [vmem:[%s955_s5 + $0x28] sm:$0xff]   ;;  %v739_v61 = vld [vmem:[%s955_s5 + $0x30] sm:$0xff]  }
   0xf   :  { %300 = vmatpush1.bf16.msra.mxu1 %v706_v11  ;;  %v564_v49 = vld [vmem:[%s956_s2] ss:$0 sm:$0xff]  ;;  %v740_v62 = vld [vmem:[%s955_s5 + $0x38] sm:$0xff]  }
  0x10   :  { %620 = vmatpush3.bf16.msra.mxu0 %v707_v12  ;;  %301 = vmatprep.subr.bf16.mxu1 %v741_v0  ;;  %v595_v63 = vld [vmem:[%s957_s4] ss:$0 sm:$0xff] }
  0x11   :  { %621 = vmatprep.subr.bf16.mxu0 %v708_v13  ;;  %v604_v7 = vld [vmem:[%s958_s6] ss:$0 sm:$0xff] }
  0x13   :  { %302 = vmatpush1.bf16.msra.mxu1 %v709_v14 }
  0x14   :  { %622 = vmatpush3.bf16.msra.mxu0 %v710_v15  ;;  %303 = vmatprep.subr.bf16.mxu1 %v741_v0 }
  0x15   :  { %623 = vmatprep.subr.bf16.mxu0 %v711_v16 }
  0x17   :  { %304 = vmatpush1.bf16.msra.mxu1 %v712_v17 }
  0x18   :  { %624 = vmatpush3.bf16.msra.mxu0 %v713_v18  ;;  %305 = vmatprep.subr.bf16.mxu1 %v741_v0 }
  0x19   :  { %625 = vmatprep.subr.bf16.mxu0 %v714_v19 }
  0x1b   :  { %306 = vmatpush1.bf16.msra.mxu1 %v715_v20 }
  0x1c   :  { %626 = vmatpush3.bf16.msra.mxu0 %v716_v21  ;;  %307 = vmatprep.subr.bf16.mxu1 %v741_v0 }
  0x1d   :  { %627 = vmatprep.subr.bf16.mxu0 %v717_v23 }
  0x1f   :  { %308 = vmatpush1.bf16.msra.mxu1 %v718_v27 }
  0x20   :  { %628 = vmatpush3.bf16.msra.mxu0 %v719_v28  ;;  %309 = vmatprep.subr.bf16.mxu1 %v741_v0 }
  0x21   :  { %653 = vmatprep.subr.bf16.mxu0 %v742_v32 }
  0x23   :  { %286 = vmatmul.mubr.bf16.vlgmr.msra.gmra.mrb[0].mxu0 %v565_v30  ;;  %310 = vmatpush1.bf16.msra.mxu1 %v722_v29 }
  0x24   :  { %654 = vmatpush3.bf16.msra.mxu0 %v725_v31  ;;  %673 = vmatprep.subr.bf16.mxu1 %v742_v32 }
  0x25   :  { %655 = vmatprep.subr.bf16.mxu0 %v742_v32  ;;  %669 = vmatprep.mubr.msk.bf16.mxu0 %vm743_vm1, %v742_v32 }
  0x26   :  { %326 = vmatmul.mubr.bf16.vlgmr.msra.gmra.mrb[0].mxu1 %v567_v33 }
  0x27   :  { %689 = vmatprep.mubr.msk.bf16.mxu1 %vm743_vm1, %v742_v32  ;;  %674 = vmatpush3.bf16.msra.mxu1 %v733_v41 }
  0x28   :  { %656 = vmatpush3.bf16.msra.mxu0 %v726_v34  ;;  %675 = vmatprep.subr.bf16.mxu1 %v742_v32 }
  0x29   :  { %657 = vmatprep.subr.bf16.mxu0 %v742_v32 }
  0x2b   :  { %676 = vmatpush3.bf16.msra.mxu1 %v734_v42 }
  0x2c   :  { %658 = vmatpush3.bf16.msra.mxu0 %v727_v35  ;;  %677 = vmatprep.subr.bf16.mxu1 %v742_v32 }
  0x2d   :  { %659 = vmatprep.subr.bf16.mxu0 %v742_v32 }
  0x2f   :  { %678 = vmatpush3.bf16.msra.mxu1 %v735_v43 }
  0x30   :  { %660 = vmatpush3.bf16.msra.mxu0 %v728_v36  ;;  %679 = vmatprep.subr.bf16.mxu1 %v742_v32 }
  0x31   :  { %661 = vmatprep.subr.bf16.mxu0 %v742_v32 }
  0x33   :  { %680 = vmatpush3.bf16.msra.mxu1 %v736_v44 }
  0x34   :  { %662 = vmatpush3.bf16.msra.mxu0 %v729_v37  ;;  %681 = vmatprep.subr.bf16.mxu1 %v742_v32 }
  0x35   :  { %663 = vmatprep.subr.bf16.mxu0 %v742_v32 }
  0x37   :  { %682 = vmatpush3.bf16.msra.mxu1 %v737_v45 }
  0x38   :  { %664 = vmatpush3.bf16.msra.mxu0 %v730_v38  ;;  %683 = vmatprep.subr.bf16.mxu1 %v742_v32 }
  0x39   :  { %665 = vmatprep.subr.bf16.mxu0 %v742_v32 }
  0x3b   :  { %684 = vmatpush3.bf16.msra.mxu1 %v738_v46 }
  0x3c   :  { %666 = vmatpush3.bf16.msra.mxu0 %v731_v39  ;;  %685 = vmatprep.subr.bf16.mxu1 %v742_v32 }
  0x3d   :  { %667 = vmatprep.subr.bf16.mxu0 %v742_v32 }
  0x3f   :  { %686 = vmatpush3.bf16.msra.mxu1 %v739_v61 }
  0x40   :  { %668 = vmatpush3.bf16.msra.mxu0 %v732_v40  ;;  %687 = vmatprep.subr.bf16.mxu1 %v742_v32 }
  0x43   :  { %688 = vmatpush3.bf16.msra.mxu1 %v740_v62 }
  0xf6   :  { %v629_v47 = vpop.f32.mrb[0].mxu0 }
  0xf7   :  { %v630_v48 = vpop.f32.mrb[1].mxu0 }
  0xf8   :  { %v631_v50 = vadd.f32 %v630_v48, %v629_v47  ;;  %v632_v51 = vpop.f32.mrb[2].mxu0 }
  0xf9   :  { %v633_v52 = vpop.f32.mrb[3].mxu0  ;;  %v327_v53 = vpop.f32.mrb[0].mxu1 }
  0xfa   :  { %v288_v54 = vadd.f32 %v631_v50, %v564_v49  ;;  %v329_v55 = vpop.f32.mrb[1].mxu1 }
  0xfb   :  { %v330_v56 = vpop.f32.mrb[2].mxu1 }
  0xfc   :  { %v328_v57 = vadd.f32 %v327_v53, %v288_v54  ;;  %v331_v58 = vpop.f32.mrb[3].mxu1 }
  0xfe   :  { %v333_v59 = vmax.f32 %v328_v57, 0.0 }
 0x100   :  { %v334_v60 = vpack.c.bf16 %v333_v59, %v333_v59 }
 0x102   :  { %670 = vmatmul.mubr.bf16.vlgmr.msra.gmra.mrb[4].mxu0 %v334_v60 }
 0x1d5   :  { %v440_v0 = vpop.f32.mrb[4].mxu0 }
 0x1d6   :  { %v441_v1 = vadd.f32 %v595_v63, %v440_v0  ;;  %v671_v2 = vpop.f32.mrb[5].mxu0 }
 0x1d7   :  { %v443_v3 = vpop.f32.mrb[6].mxu0 }
 0x1d8   :  { %v446_v4 = vmax.f32 %v441_v1, 0.0  ;;  %v672_v5 = vpop.f32.mrb[7].mxu0 }
 0x1da   :  { %v447_v6 = vpack.c.bf16 %v446_v4, %v446_v4 }
 0x1dc   :  { %690 = vmatmul.mubr.bf16.vlgmr.msra.gmra.mrb[4].mxu1 %v447_v6 }
 0x2af   :  { %v553_v8 = vpop.f32.mrb[4].mxu1 }
 0x2b0   :  { %v554_v9 = vadd.f32 %v604_v7, %v553_v8  ;;  %v691_v10 = vpop.f32.mrb[5].mxu1 }
 0x2b1   :  { %v556_v11 = vpop.f32.mrb[6].mxu1 }
 0x2b2   :  { %559 = vst [vmem:[%s959_s7] sm:$0xff] %v554_v9  ;;  %v692_v12 = vpop.f32.mrb[7].mxu1 }

// kernel: net_forward.3
= control target key start
LH: loop header
LB: loop body
LE: loop exit
PB: predicated region body
PF: predicated region fallthrough
CT: control target
= control target key end

     0   :  { %s3239_s11 = smov 0   ;;  %s4935_s0 = inlined_call_operand.vmem [shape: bf16[8,3,1028], index: 0, kind: input, shape index: {}]   ;;  %s4936_s1 = inlined_call_operand.vmem [shape: bf16[6,80], index: 1, kind: input, shape index: {}]   ;;  %s4937_s2 = inlined_call_operand.vmem [shape: f32[6,1], index: 2, kind: input, shape index: {}]   ;;  %s4938_s3 = inlined_call_operand.vmem [shape: bf16[859,196], index: 3, kind: input, shape index: {}]   ;;  %s4939_s4 = inlined_call_operand.vmem [shape: bf16[8,6,200], index: 4, kind: output, shape index: {}]  }
   0x1   :  { %v2692_v0 = vld [vmem:[%s4936_s1] sm:$0x7]  ;;  %v2707_v3 = vld [vmem:[%s4938_s3 + $0x8] sm:$0xff]  ;;  %v2712_v4 = vld [vmem:[%s4938_s3 + $0x10] sm:$0xff] }
   0x2   :  { %5163 = vst [vmem:[#allocation2_spill] sm:$0xff] %v2692_v0  ;;  %v2697_v1 = vld [vmem:[%s4937_s2] sm:$0x3f]  ;;  %5166 = vst [vmem:[#allocation5_spill] sm:$0xff] %v2707_v3  ;;  %v2717_v5 = vld [vmem:[%s4938_s3 + $0x18] sm:$0xff] }
   0x3   :  { %5164 = vst [vmem:[#allocation3_spill] sm:$0xff] %v2697_v1  ;;  %v2702_v2 = vld [vmem:[%s4938_s3] sm:$0xff]  ;;  %5167 = vst [vmem:[#allocation6_spill] sm:$0xff] %v2712_v4  ;;  %v2727_v7 = vld [vmem:[%s4938_s3 + $0x28] sm:$0xff] }
   0x4   :  { %5165 = vst [vmem:[#allocation4_spill] sm:$0xff] %v2702_v2  ;;  %5168 = vst [vmem:[#allocation7_spill] sm:$0xff] %v2717_v5  ;;  %v2722_v6 = vld [vmem:[%s4938_s3 + $0x20] sm:$0xff]  ;;  %v2732_v8 = vld [vmem:[%s4938_s3 + $0x30] sm:$0xff] }
   0x5   :  { %5169 = vst [vmem:[#allocation8_spill] sm:$0xff] %v2722_v6  ;;  %5170 = vst [vmem:[#allocation9_spill] sm:$0xff] %v2727_v7  ;;  %v2737_v9 = vld [vmem:[%s4938_s3 + $0x38] sm:$0xff]  ;;  %v2742_v10 = vld [vmem:[%s4938_s3 + $0x40] sm:$0xff] }
   0x6   :  { %5171 = vst [vmem:[#allocation10_spill] sm:$0xff] %v2732_v8  ;;  %5172 = vst [vmem:[#allocation11_spill] sm:$0xff] %v2737_v9  ;;  %v2747_v11 = vld [vmem:[%s4938_s3 + $0x48] sm:$0xff]  ;;  %v2752_v12 = vld [vmem:[%s4938_s3 + $0x50] sm:$0xff] }
   0x7   :  { %5173 = vst [vmem:[#allocation12_spill] sm:$0xff] %v2742_v10  ;;  %5174 = vst [vmem:[#allocation13_spill] sm:$0xff] %v2747_v11  ;;  %v2757_v13 = vld [vmem:[%s4938_s3 + $0x58] sm:$0xff]  ;;  %v2762_v14 = vld [vmem:[%s4938_s3 + $0x60] sm:$0xff] }
   0x8   :  { %5175 = vst [vmem:[#allocation14_spill] sm:$0xff] %v2752_v12  ;;  %5176 = vst [vmem:[#allocation15_spill] sm:$0xff] %v2757_v13  ;;  %v2767_v15 = vld [vmem:[%s4938_s3 + $0x68] sm:$0xff]  ;;  %v2772_v16 = vld [vmem:[%s4938_s3 + $0x70] sm:$0xff] }
   0x9   :  { %5177 = vst [vmem:[#allocation16_spill] sm:$0xff] %v2762_v14  ;;  %5178 = vst [vmem:[#allocation17_spill] sm:$0xff] %v2767_v15  ;;  %v2777_v17 = vld [vmem:[%s4938_s3 + $0x78] sm:$0xff]  ;;  %v2782_v18 = vld [vmem:[%s4938_s3 + $0x80] sm:$0xff] }
   0xa   :  { %5179 = vst [vmem:[#allocation18_spill] sm:$0xff] %v2772_v16  ;;  %5180 = vst [vmem:[#allocation19_spill] sm:$0xff] %v2777_v17  ;;  %v2787_v19 = vld [vmem:[%s4938_s3 + $0x88] sm:$0xff]  ;;  %v2792_v20 = vld [vmem:[%s4938_s3 + $0x90] sm:$0xff] }
   0xb   :  { %5181 = vst [vmem:[#allocation20_spill] sm:$0xff] %v2782_v18  ;;  %5182 = vst [vmem:[#allocation21_spill] sm:$0xff] %v2787_v19  ;;  %v2797_v21 = vld [vmem:[%s4938_s3 + $0x98] sm:$0xff]  ;;  %v2802_v22 = vld [vmem:[%s4938_s3 + $0xa0] sm:$0xff] }
   0xc   :  { %5183 = vst [vmem:[#allocation22_spill] sm:$0xff] %v2792_v20  ;;  %5184 = vst [vmem:[#allocation23_spill] sm:$0xff] %v2797_v21  ;;  %v2807_v23 = vld [vmem:[%s4938_s3 + $0xa8] sm:$0xff]  ;;  %v2812_v24 = vld [vmem:[%s4938_s3 + $0xb0] sm:$0xff] }
   0xd   :  { %5185 = vst [vmem:[#allocation24_spill] sm:$0xff] %v2802_v22  ;;  %5186 = vst [vmem:[#allocation25_spill] sm:$0xff] %v2807_v23  ;;  %v2817_v25 = vld [vmem:[%s4938_s3 + $0xb8] sm:$0xff]  ;;  %v2822_v26 = vld [vmem:[%s4938_s3 + $0xc0] sm:$0xff] }
   0xe   :  { %5187 = vst [vmem:[#allocation26_spill] sm:$0xff] %v2812_v24  ;;  %5188 = vst [vmem:[#allocation27_spill] sm:$0xff] %v2817_v25  ;;  %v2827_v27 = vld [vmem:[%s4938_s3 + $0xc8] sm:$0xff]  ;;  %v2832_v28 = vld [vmem:[%s4938_s3 + $0xd0] sm:$0xff] }
   0xf   :  { %5189 = vst [vmem:[#allocation28_spill] sm:$0xff] %v2822_v26  ;;  %5190 = vst [vmem:[#allocation29_spill] sm:$0xff] %v2827_v27  ;;  %v2837_v29 = vld [vmem:[%s4938_s3 + $0xd8] sm:$0xff]  ;;  %v2842_v30 = vld [vmem:[%s4938_s3 + $0xe0] sm:$0xff] }
  0x10   :  { %5191 = vst [vmem:[#allocation30_spill] sm:$0xff] %v2832_v28  ;;  %5192 = vst [vmem:[#allocation31_spill] sm:$0xff] %v2837_v29  ;;  %v2847_v31 = vld [vmem:[%s4938_s3 + $0xe8] sm:$0xff]  ;;  %v2852_v32 = vld [vmem:[%s4938_s3 + $0xf0] sm:$0xff] }
  0x11   :  { %5193 = vst [vmem:[#allocation32_spill] sm:$0xff] %v2842_v30  ;;  %5194 = vst [vmem:[#allocation33_spill] sm:$0xff] %v2847_v31  ;;  %v2857_v33 = vld [vmem:[%s4938_s3 + $0xf8] sm:$0xff]  ;;  %v2862_v34 = vld [vmem:[%s4938_s3 + $0x100] sm:$0xff] }
  0x12   :  { %5195 = vst [vmem:[#allocation34_spill] sm:$0xff] %v2852_v32  ;;  %5196 = vst [vmem:[#allocation35_spill] sm:$0xff] %v2857_v33  ;;  %v2867_v35 = vld [vmem:[%s4938_s3 + $0x108] sm:$0xff]  ;;  %v2872_v36 = vld [vmem:[%s4938_s3 + $0x110] sm:$0xff] }
  0x13   :  { %5197 = vst [vmem:[#allocation36_spill] sm:$0xff] %v2862_v34  ;;  %5198 = vst [vmem:[#allocation37_spill] sm:$0xff] %v2867_v35  ;;  %v2877_v37 = vld [vmem:[%s4938_s3 + $0x118] sm:$0xff]  ;;  %v2882_v38 = vld [vmem:[%s4938_s3 + $0x120] sm:$0xff] }
  0x14   :  { %5199 = vst [vmem:[#allocation38_spill] sm:$0xff] %v2872_v36  ;;  %5200 = vst [vmem:[#allocation39_spill] sm:$0xff] %v2877_v37  ;;  %v2887_v39 = vld [vmem:[%s4938_s3 + $0x128] sm:$0xff]  ;;  %v2892_v40 = vld [vmem:[%s4938_s3 + $0x130] sm:$0xff] }
  0x15   :  { %5201 = vst [vmem:[#allocation40_spill] sm:$0xff] %v2882_v38  ;;  %5202 = vst [vmem:[#allocation41_spill] sm:$0xff] %v2887_v39  ;;  %v2897_v41 = vld [vmem:[%s4938_s3 + $0x138] sm:$0xff]  ;;  %v2902_v42 = vld [vmem:[%s4938_s3 + $0x140] sm:$0xff] }
  0x16   :  { %5203 = vst [vmem:[#allocation42_spill] sm:$0xff] %v2892_v40  ;;  %5204 = vst [vmem:[#allocation43_spill] sm:$0xff] %v2897_v41  ;;  %v2907_v43 = vld [vmem:[%s4938_s3 + $0x148] sm:$0xff]  ;;  %v2912_v44 = vld [vmem:[%s4938_s3 + $0x150] sm:$0xff] }
  0x17   :  { %5205 = vst [vmem:[#allocation44_spill] sm:$0xff] %v2902_v42  ;;  %5206 = vst [vmem:[#allocation45_spill] sm:$0xff] %v2907_v43  ;;  %v2917_v45 = vld [vmem:[%s4938_s3 + $0x158] sm:$0xff]  ;;  %v2922_v46 = vld [vmem:[%s4938_s3 + $0x160] sm:$0xff] }
  0x18   :  { %5207 = vst [vmem:[#allocation46_spill] sm:$0xff] %v2912_v44  ;;  %5208 = vst [vmem:[#allocation47_spill] sm:$0xff] %v2917_v45  ;;  %v2927_v47 = vld [vmem:[%s4938_s3 + $0x168] sm:$0xff]  ;;  %v2932_v48 = vld [vmem:[%s4938_s3 + $0x170] sm:$0xff] }
  0x19   :  { %5209 = vst [vmem:[#allocation48_spill] sm:$0xff] %v2922_v46  ;;  %5210 = vst [vmem:[#allocation49_spill] sm:$0xff] %v2927_v47  ;;  %v2937_v49 = vld [vmem:[%s4938_s3 + $0x178] sm:$0xff]  ;;  %v2942_v50 = vld [vmem:[%s4938_s3 + $0x180] sm:$0xff] }
  0x1a   :  { %5211 = vst [vmem:[#allocation50_spill] sm:$0xff] %v2932_v48  ;;  %5212 = vst [vmem:[#allocation51_spill] sm:$0xff] %v2937_v49  ;;  %v2947_v51 = vld [vmem:[%s4938_s3 + $0x188] sm:$0xff]  ;;  %v2952_v52 = vld [vmem:[%s4938_s3 + $0x190] sm:$0xff] }
  0x1b   :  { %5213 = vst [vmem:[#allocation52_spill] sm:$0xff] %v2942_v50  ;;  %5214 = vst [vmem:[#allocation53_spill] sm:$0xff] %v2947_v51  ;;  %v2957_v53 = vld [vmem:[%s4938_s3 + $0x198] sm:$0xff]  ;;  %v2962_v54 = vld [vmem:[%s4938_s3 + $0x1a0] sm:$0xff] }
  0x1c   :  { %5215 = vst [vmem:[#allocation54_spill] sm:$0xff] %v2952_v52  ;;  %5216 = vst [vmem:[#allocation55_spill] sm:$0xff] %v2957_v53  ;;  %v2967_v55 = vld [vmem:[%s4938_s3 + $0x1a8] sm:$0xff]  ;;  %v2972_v56 = vld [vmem:[%s4938_s3 + $0x1b0] sm:$0xff] }
  0x1d   :  { %5217 = vst [vmem:[#allocation56_spill] sm:$0xff] %v2962_v54  ;;  %5218 = vst [vmem:[#allocation57_spill] sm:$0xff] %v2967_v55  ;;  %v2977_v57 = vld [vmem:[%s4938_s3 + $0x1b8] sm:$0xff]  ;;  %v2982_v58 = vld [vmem:[%s4938_s3 + $0x1c0] sm:$0xff] }
  0x1e   :  { %5219 = vst [vmem:[#allocation58_spill] sm:$0xff] %v2972_v56  ;;  %5220 = vst [vmem:[#allocation59_spill] sm:$0xff] %v2977_v57  ;;  %v2987_v59 = vld [vmem:[%s4938_s3 + $0x1c8] sm:$0xff]  ;;  %v2992_v60 = vld [vmem:[%s4938_s3 + $0x1d0] sm:$0xff] }
  0x1f   :  { %5221 = vst [vmem:[#allocation60_spill] sm:$0xff] %v2982_v58  ;;  %5222 = vst [vmem:[#allocation61_spill] sm:$0xff] %v2987_v59  ;;  %v2997_v61 = vld [vmem:[%s4938_s3 + $0x1d8] sm:$0xff]  ;;  %v3002_v62 = vld [vmem:[%s4938_s3 + $0x1e0] sm:$0xff] }
  0x20   :  { %5223 = vst [vmem:[#allocation62_spill] sm:$0xff] %v2992_v60  ;;  %5224 = vst [vmem:[#allocation63_spill] sm:$0xff] %v2997_v61  ;;  %v3007_v63 = vld [vmem:[%s4938_s3 + $0x1e8] sm:$0xff]  ;;  %v3012_v58 = vld [vmem:[%s4938_s3 + $0x1f0] sm:$0xff] }
  0x21   :  { %5225 = vst [vmem:[#allocation64_spill] sm:$0xff] %v3002_v62  ;;  %5226 = vst [vmem:[#allocation65_spill] sm:$0xff] %v3007_v63  ;;  %v3017_v60 = vld [vmem:[%s4938_s3 + $0x1f8] sm:$0xff]  ;;  %v3022_v61 = vld [vmem:[%s4938_s3 + $0x200] sm:$0xff] }
  0x22   :  { %5227 = vst [vmem:[#allocation66_spill] sm:$0xff] %v3012_v58  ;;  %5228 = vst [vmem:[#allocation67_spill] sm:$0xff] %v3017_v60  ;;  %v3027_v62 = vld [vmem:[%s4938_s3 + $0x208] sm:$0xff]  ;;  %v3032_v63 = vld [vmem:[%s4938_s3 + $0x210] sm:$0xff] }
  0x23   :  { %5229 = vst [vmem:[#allocation68_spill] sm:$0xff] %v3022_v61  ;;  %5230 = vst [vmem:[#allocation69_spill] sm:$0xff] %v3027_v62  ;;  %v3037_v58 = vld [vmem:[%s4938_s3 + $0x218] sm:$0xff]  ;;  %v3042_v60 = vld [vmem:[%s4938_s3 + $0x220] sm:$0xff] }
  0x24   :  { %5231 = vst [vmem:[#allocation70_spill] sm:$0xff] %v3032_v63  ;;  %5232 = vst [vmem:[#allocation71_spill] sm:$0xff] %v3037_v58  ;;  %v3047_v59 = vld [vmem:[%s4938_s3 + $0x228] sm:$0xff]  ;;  %v3052_v56 = vld [vmem:[%s4938_s3 + $0x230] sm:$0xff] }
  0x25   :  { %5233 = vst [vmem:[#allocation72_spill] sm:$0xff] %v3042_v60  ;;  %5234 = vst [vmem:[#allocation73_spill] sm:$0xff] %v3047_v59  ;;  %v3057_v57 = vld [vmem:[%s4938_s3 + $0x238] sm:$0xff]  ;;  %v3062_v54 = vld [vmem:[%s4938_s3 + $0x240] sm:$0xff] }
  0x26   :  { %5235 = vst [vmem:[#allocation74_spill] sm:$0xff] %v3052_v56  ;;  %5236 = vst [vmem:[#allocation75_spill] sm:$0xff] %v3057_v57  ;;  %v3067_v55 = vld [vmem:[%s4938_s3 + $0x248] sm:$0xff]  ;;  %v3072_v52 = vld [vmem:[%s4938_s3 + $0x250] sm:$0xff] }
  0x27   :  { %5237 = vst [vmem:[#allocation76_spill] sm:$0xff] %v3062_v54  ;;  %5238 = vst [vmem:[#allocation77_spill] sm:$0xff] %v3067_v55  ;;  %v3077_v53 = vld [vmem:[%s4938_s3 + $0x258] sm:$0xff]  ;;  %v3082_v50 = vld [vmem:[%s4938_s3 + $0x260] sm:$0xff] }
  0x28   :  { %5239 = vst [vmem:[#allocation78_spill] sm:$0xff] %v3072_v52  ;;  %5240 = vst [vmem:[#allocation79_spill] sm:$0xff] %v3077_v53  ;;  %v3087_v51 = vld [vmem:[%s4938_s3 + $0x268] sm:$0xff]  ;;  %v3092_v48 = vld [vmem:[%s4938_s3 + $0x270] sm:$0xff] }
  0x29   :  { %5241 = vst [vmem:[#allocation80_spill] sm:$0xff] %v3082_v50  ;;  %5242 = vst [vmem:[#allocation81_spill] sm:$0xff] %v3087_v51  ;;  %v3097_v49 = vld [vmem:[%s4938_s3 + $0x278] sm:$0xff]  ;;  %v3102_v46 = vld [vmem:[%s4938_s3 + $0x280] sm:$0xff] }
  0x2a   :  { %5243 = vst [vmem:[#allocation82_spill] sm:$0xff] %v3092_v48  ;;  %5244 = vst [vmem:[#allocation83_spill] sm:$0xff] %v3097_v49  ;;  %v3107_v47 = vld [vmem:[%s4938_s3 + $0x288] sm:$0xff]  ;;  %v3112_v44 = vld [vmem:[%s4938_s3 + $0x290] sm:$0xff] }
  0x2b   :  { %5245 = vst [vmem:[#allocation84_spill] sm:$0xff] %v3102_v46  ;;  %5246 = vst [vmem:[#allocation85_spill] sm:$0xff] %v3107_v47  ;;  %v3117_v45 = vld [vmem:[%s4938_s3 + $0x298] sm:$0xff]  ;;  %v3122_v42 = vld [vmem:[%s4938_s3 + $0x2a0] sm:$0xff] }
  0x2c   :  { %5247 = vst [vmem:[#allocation86_spill] sm:$0xff] %v3112_v44  ;;  %5248 = vst [vmem:[#allocation87_spill] sm:$0xff] %v3117_v45  ;;  %v3127_v43 = vld [vmem:[%s4938_s3 + $0x2a8] sm:$0xff]  ;;  %v3132_v40 = vld [vmem:[%s4938_s3 + $0x2b0] sm:$0xff] }
  0x2d   :  { %5249 = vst [vmem:[#allocation88_spill] sm:$0xff] %v3122_v42  ;;  %5250 = vst [vmem:[#allocation89_spill] sm:$0xff] %v3127_v43  ;;  %v3137_v41 = vld [vmem:[%s4938_s3 + $0x2b8] sm:$0xff]  ;;  %v3142_v38 = vld [vmem:[%s4938_s3 + $0x2c0] sm:$0xff] }
  0x2e   :  { %5251 = vst [vmem:[#allocation90_spill] sm:$0xff] %v3132_v40  ;;  %5252 = vst [vmem:[#allocation91_spill] sm:$0xff] %v3137_v41  ;;  %v3147_v39 = vld [vmem:[%s4938_s3 + $0x2c8] sm:$0xff]  ;;  %v3152_v36 = vld [vmem:[%s4938_s3 + $0x2d0] sm:$0xff] }
  0x2f   :  { %5253 = vst [vmem:[#allocation92_spill] sm:$0xff] %v3142_v38  ;;  %5254 = vst [vmem:[#allocation93_spill] sm:$0xff] %v3147_v39  ;;  %v3157_v37 = vld [vmem:[%s4938_s3 + $0x2d8] sm:$0xff]  ;;  %v3162_v40 = vld [vmem:[%s4938_s3 + $0x2e0] sm:$0xff] }
  0x30   :  { %5255 = vst [vmem:[#allocation94_spill] sm:$0xff] %v3152_v36  ;;  %5256 = vst [vmem:[#allocation95_spill] sm:$0xff] %v3157_v37  ;;  %v3167_v38 = vld [vmem:[%s4938_s3 + $0x2e8] sm:$0xff]  ;;  %v3172_v39 = vld [vmem:[%s4938_s3 + $0x2f0] sm:$0xff] }
  0x31   :  { %5257 = vst [vmem:[#allocation96_spill] sm:$0xff] %v3162_v40  ;;  %5258 = vst [vmem:[#allocation97_spill] sm:$0xff] %v3167_v38  ;;  %v3177_v36 = vld [vmem:[%s4938_s3 + $0x2f8] sm:$0xff]  ;;  %v3182_v37 = vld [vmem:[%s4938_s3 + $0x300] sm:$0xff] }
  0x32   :  { %5259 = vst [vmem:[#allocation98_spill] sm:$0xff] %v3172_v39  ;;  %5260 = vst [vmem:[#allocation99_spill] sm:$0xff] %v3177_v36  ;;  %v3187_v40 = vld [vmem:[%s4938_s3 + $0x308] sm:$0xff]  ;;  %v3192_v38 = vld [vmem:[%s4938_s3 + $0x310] sm:$0xff] }
  0x33   :  { %5261 = vst [vmem:[#allocation100_spill] sm:$0xff] %v3182_v37  ;;  %5262 = vst [vmem:[#allocation101_spill] sm:$0xff] %v3187_v40  ;;  %v3197_v39 = vld [vmem:[%s4938_s3 + $0x318] sm:$0xff]  ;;  %v3202_v36 = vld [vmem:[%s4938_s3 + $0x320] sm:$0xff] }
  0x34   :  { %5263 = vst [vmem:[#allocation102_spill] sm:$0xff] %v3192_v38  ;;  %5264 = vst [vmem:[#allocation103_spill] sm:$0xff] %v3197_v39  ;;  %v3207_v37 = vld [vmem:[%s4938_s3 + $0x328] sm:$0xff]  ;;  %v3212_v40 = vld [vmem:[%s4938_s3 + $0x330] sm:$0xff] }
  0x35   :  { %5265 = vst [vmem:[#allocation104_spill] sm:$0xff] %v3202_v36  ;;  %5266 = vst [vmem:[#allocation105_spill] sm:$0xff] %v3207_v37  ;;  %v3217_v38 = vld [vmem:[%s4938_s3 + $0x338] sm:$0xff]  ;;  %v3222_v39 = vld [vmem:[%s4938_s3 + $0x340] sm:$0xff] }
  0x36   :  { %5267 = vst [vmem:[#allocation106_spill] sm:$0xff] %v3212_v40  ;;  %5268 = vst [vmem:[#allocation107_spill] sm:$0xff] %v3217_v38  ;;  %v3227_v36 = vld [vmem:[%s4938_s3 + $0x348] sm:$0xff]  ;;  %v3232_v37 = vld [vmem:[%s4938_s3 + $0x350] sm:$0xff] }
  0x37   :  { %5269 = vst [vmem:[#allocation108_spill] sm:$0xff] %v3222_v39  ;;  %5270 = vst [vmem:[#allocation109_spill] sm:$0xff] %v3227_v36  ;;  %v3237_v40 = vld [vmem:[%s4938_s3 + $0x358] sm:$0x33] }
  0x38   :  { %5271 = vst [vmem:[#allocation110_spill] sm:$0xff] %v3232_v37  ;;  %5272 = vst [vmem:[#allocation111_spill] sm:$0xff] %v3237_v40 }
  0x39 LB: > { %v146_v39 = vlaneseq  ;;  %v2642_v36 = vmov 1983009808   ;;  %s2522_s12 = smul.u32 18, %s2640_s11  ;;  %s2643_s3 = smov 126   ;;  %vm5079_vm0 = vcmask 1039360   ;;  %vm5054_vm1 = vcmask 1041408   ;;  %s2640_s11 = sphi %s3239_s11, %s133_s11  }
  0x3a   : > { %v144_v38 = vunpack.c.l.s4 %v2642_v36  ;;  %s2644_s16 = smov 127   ;;  %s2645_s17 = smov 125   ;;  %vm902_vm2 = vsmask.f32 1280  ;;  %vm5082_vm4 = vcmask 1022976   ;;  %vm5053_vm5 = vcmask 1044480  }
  0x3b   : > { %v147_v41 = vshrl.u32 %v146_v39, 7  ;;  %s3248_s15 = scalar_lea.vmem %s4935_s0, %s2522_s12  ;;  %s2646_s18 = smov 97   ;;  %vm3650_vm3 = vmand %vm5054_vm1, %vm902_vm2  ;;  %vm941_vm6 = vsmask.f32 4352  ;;  %vm5081_vm7 = vcmask 1042432   ;;  %vm5055_vm8 = vcmask 793600  }
  0x3c   : > { %v145_v42 = vunpack.c.0.s8 %v144_v38  ;;  %v3251_v37 = vld [vmem:[%s3248_s15] sm:$0xff]  ;;  %s2647_s19 = smov 96   ;;  %s2648_s20 = smov 95   ;;  %vm5090_vm9 = vcmask 785408   ;;  %vm979_vm10 = vcmask 1047552   ;;  %vm5080_vm12 = vcmask 1031168   ;;  %vm3671_vm13 = vmand %vm5053_vm5, %vm941_vm6 }
  0x3d   : > { %v142_v43 = vcombine.high %v3251_v37, %v3251_v37  ;;  %s2649_s21 = smov 94   ;;  %s2650_s22 = smov 93   ;;  %vm980_vm11 = vsmask.f32 7424  ;;  %vm5078_vm14 = vcmask 1045504   ;;  %vm5062_vm2 = vcmask 769024  }
  0x3e   : > { %v3253_v40 = vsub.s32 %v145_v42, %v147_v41  ;;  %s2651_s23 = smov 124   ;;  %s2652_s24 = smov 92   ;;  %vm3703_vm15 = vmand %vm979_vm10, %vm980_vm11  ;;  %vm5088_vm6 = vcmask 777216   ;;  %vm1019_vm10 = vsmask.f32 2304  ;;  %vm5085_vm11 = vcmask 760832  }
  0x3f   : > { %s2653_s1 = smov 64   ;;  %s2654_s25 = smov 63   ;;  %vm5086_vm5 = vcmask 1040384   ;;  %vm3841_vm1 = vmand %vm5081_vm7, %vm1019_vm10  ;;  %vm1058_vm10 = vsmask.f32 5376 }
  0x40   : > { %v3259_v44 = vrot.slane %v3251_v37, %v3253_v40  ;;  %v3262_v36 = vrot.slane %v142_v43, %v3253_v40  ;;  %s2655_s2 = smov 62   ;;  %s2656_s26 = smov 61  }
  0x41   : > { %s2657_s27 = smov 60   ;;  %s2658_s28 = smov 32  }
  0x42   : > { %v278_v38 = vrot.slane %v3259_v44, 5  ;;  %v3267_v39 = vcombine.high %v3259_v44, %v3259_v44  ;;  %v3270_v45 = vshrl.u32 %v3259_v44, 16  ;;  %v3273_v41 = vshll.u32 %v3259_v44, 16  ;;  %s2659_s29 = smov 31   ;;  %s2523_s30 = sshll.u32 %s2640_s11, 3 }
  0x43   : > { %v3277_v42 = vcombine.high %v3262_v36, %v3262_v36  ;;  %v3280_v46 = vshrl.u32 %v3262_v36, 16  ;;  %v3283_v43 = vshll.u32 %v3262_v36, 16  ;;  %v280_v48 = vrot.slane %v3262_v36, 5  ;;  %s2387_s7 = scalar_lea.vmem %s4939_s4, %s2523_s30  ;;  %s133_s11 = sadd.s32 1, %s2640_s11  }
  0x44   : > { %286 = vrot.lane.b32.xlu1 %v278_v38, %s2643_s3  ;;  %v279_v47 = vrot.slane %v3267_v39, 5  ;;  %v186_v49 = vrot.slane %v3270_v45, 6  ;;  %v189_v50 = vrot.slane %v3273_v41, 7  ;;  %v3291_v51 = vshrl.u32 %v3267_v39, 16  ;;  %p130_p0 = scmp.ge.s32.totalorder %s133_s11, 8  }
  0x45   : > { %v281_v52 = vrot.slane %v3277_v42, 5  ;;  %v202_v53 = vrot.slane %v3280_v46, 6  ;;  %v205_v54 = vrot.slane %v3283_v43, 7  ;;  %v3298_v38 = vshll.u32 %v3267_v39, 16 }
  0x46   : > { %288 = vrot.lane.b32.xlu0 %v279_v47, %s2643_s3  ;;  %v316_v55 = vrot.slane %v3280_v46, 3  ;;  %v190_v56 = vor.u32 %v189_v50, %v186_v49  ;;  %v317_v57 = vrot.slane %v3283_v43, 4  ;;  %v3304_v60 = vshrl.u32 %v3277_v42, 16 }
  0x47   : > { %v3307_v47 = vshll.u32 %v3277_v42, 16  ;;  %v206_v59 = vor.u32 %v205_v54, %v202_v53  ;;  %v194_v63 = vrot.slane %v3291_v51, 6  ;;  %v197_v58 = vrot.slane %v3298_v38, 7 }
  0x48   : > { %290 = vrot.lane.b32.xlu1 %v280_v48, %s2643_s3  ;;  %v318_v48 = vor.u32 %v317_v57, %v316_v55  ;;  %v210_v49 = vrot.slane %v3304_v60, 6  ;;  %v313_v35 = vrot.slane %v3291_v51, 3  ;;  %v310_v54 = vrot.slane %v3270_v45, 3 }
  0x49   : > { %v213_v50 = vrot.slane %v3307_v47, 7  ;;  %v198_v34 = vor.u32 %v197_v58, %v194_v63  ;;  %v311_v55 = vrot.slane %v3273_v41, 4  ;;  %v319_v57 = vrot.slane %v3304_v60, 3  ;;  %v3325_v58 = vld [vmem:[%s3248_s15 + $0x8] sm:$0xff] }
  0x4a   : > { %292 = vrot.lane.b32.xlu0 %v281_v52, %s2643_s3  ;;  %v314_v52 = vrot.slane %v3298_v38, 4  ;;  %v592_v61 = vrot.slane %v3270_v45, 2  ;;  %v598_v62 = vrot.slane %v3280_v46, 2  ;;  %v599_v32 = vrot.slane %v3283_v43, 3 }
  0x4b   : > { %v214_v53 = vor.u32 %v213_v50, %v210_v49  ;;  %v312_v63 = vor.u32 %v311_v55, %v310_v54  ;;  %v3339_v50 = vcombine.low %v3259_v44, %v3259_v44  ;;  %v412_v33 = vrot.slane %v3307_v47, 1 }
  0x4c   : > { %247 = vrot.lane.b32.xlu1 %v190_v56, %s2644_s16  ;;  %v315_v56 = vor.u32 %v314_v52, %v313_v35  ;;  %v5015_v35 = vrot.slane %v3273_v41, 1  ;;  %v410_v52 = vrot.slane %v3298_v38, 1  ;;  %v690_v28 = vrot.slane %v3280_v46, 7 }
  0x4d   : > { %v3376_v26 = vor.u32 %v599_v32, %v598_v62  ;;  %v762_v32 = vrot.slane %v3291_v51, 4  ;;  %v763_v62 = vrot.slane %v3298_v38, 5  ;;  %v420_v24 = vor.u32 %v412_v33, %v3304_v60 }
  0x4e   : > { %251 = vrot.lane.b32.xlu0 %v206_v59, %s2644_s16  ;;  %v320_v59 = vrot.slane %v3307_v47, 4  ;;  %v3346_v54 = vor.u32 %v5015_v35, %v3270_v45  ;;  %v593_v35 = vrot.slane %v3273_v41, 3  ;;  %v3381_v27 = vor.u32 %v690_v28, %v3283_v43 }
  0x4f   : > { %v849_v22 = vrot.slane %v3291_v51, 1  ;;  %v850_v20 = vrot.slane %v3298_v38, 2 }
  0x50   : > { %338 = vrot.lane.b32.xlu1 %v318_v48, %s2645_s17  ;;  %v3330_v48 = vrot.slane %v3325_v58, %v3253_v40  ;;  %v321_v49 = vor.u32 %v320_v59, %v319_v57  ;;  %v512_v57 = vrot.slane %v3273_v41, 6  ;;  %v595_v59 = vrot.slane %v3291_v51, 2 }
  0x51   : > { %v3370_v31 = vor.u32 %v593_v35, %v592_v61  ;;  %v418_v61 = vor.u32 %v410_v52, %v3291_v51 }
  0x52   : > { %249 = vrot.lane.b32.xlu0 %v198_v34, %s2644_s16  ;;  %v365_v34 = vcombine.low %v3251_v37, %v3251_v37  ;;  %v3353_v55 = vshll.u32 %v3330_v48, 16 }
  0x54   : > { %253 = vrot.lane.b32.xlu1 %v214_v53, %s2644_s16  ;;  %v411_v53 = vrot.slane %v3283_v43, 1  ;;  %v3350_v37 = vrot.slane %v365_v34, %v3253_v40  ;;  %v5028_v29 = vrot.slane %v3353_v55, 1 }
  0x56   : > { %336 = vrot.lane.b32.xlu0 %v315_v56, %s2645_s17  ;;  %v511_v56 = vrot.slane %v3270_v45, 5  ;;  %v2589_v28 = vpack.i.bf16 %v5028_v29, %v412_v33  ;;  %v419_v29 = vor.u32 %v411_v53, %v3280_v46  ;;  %v846_v33 = vrot.slane %v3270_v45, 1 }
  0x58   : > { %334 = vrot.lane.b32.xlu1 %v312_v63, %s2645_s17  ;;  %v596_v63 = vrot.slane %v3298_v38, 3  ;;  %v3363_v34 = vor.u32 %v512_v57, %v511_v56  ;;  %v688_v56 = vrot.slane %v3291_v51, 7  ;;  %v686_v57 = vrot.slane %v3270_v45, 7 }
  0x5a   : > { %340 = vrot.lane.b32.xlu0 %v321_v49, %s2645_s17  ;;  %v2584_v49 = vpack.i.bf16 %v411_v53, %v410_v52  ;;  %v3368_v30 = vor.u32 %v596_v63, %v595_v59  ;;  %v3386_v35 = vor.u32 %v688_v56, %v3298_v38  ;;  %v3389_v59 = vor.u32 %v686_v57, %v3273_v41 }
  0x5b   : > { %v759_v63 = vrot.slane %v3270_v45, 4  ;;  %v760_v52 = vrot.slane %v3273_v41, 5  ;;  %v3400_v56 = vor.u32 %v763_v62, %v762_v32  ;;  %v766_v57 = vrot.slane %v3283_v43, 5 }
  0x5c   : > { %1189 = vrot.lane.b32.xlu1 %v3339_v50, %s2646_s18  ;;  %v159_v32 = vcombine.high %v3325_v58, %v3325_v58  ;;  %v852_v62 = vrot.slane %v3280_v46, 1  ;;  %v3420_v53 = vor.u32 %v850_v20, %v849_v22  ;;  %v480_v45 = vrot.slane %v3267_v39, 7 }
  0x5d   : > { %v3405_v25 = vor.u32 %v760_v52, %v759_v63  ;;  %v847_v63 = vrot.slane %v3273_v41, 2  ;;  %v481_v52 = vrot.slane %v3262_v36, 7  ;;  %v520_v22 = vrot.slane %v3304_v60, 5 }
  0x5e   : > { %1187 = vrot.lane.b32.xlu0 %v3350_v37, %s2646_s18 }
  0x5f   : > { %v3430_v18 = vor.u32 %v847_v63, %v846_v33  ;;  %v3448_v33 = vcombine.high %v3330_v48, %v3330_v48  ;;  %v221_v63 = vrot.slane %v3353_v55, 7 }
  0x60   : > { %2585 = vrot.lane.b32.xlu1 %v2584_v49, %s2647_s19  ;;  %v765_v49 = vrot.slane %v3280_v46, 4 }
  0x61   : > { %5274 = vst [vmem:[#allocation113_spill] sm:$0xff] %v3448_v33 }
  0x62   : > { %1191 = vrot.lane.b32.xlu0 %v3259_v44, %s2646_s18  ;;  %v3409_v23 = vor.u32 %v766_v57, %v765_v49  ;;  %v3423_v49 = vrot.slane %v159_v32, %v3253_v40  ;;  %v514_v57 = vrot.slane %v3291_v51, 5  ;;  %v482_v51 = vrot.slane %v3277_v42, 7 }
  0x63   : > { %v518_v32 = vrot.slane %v3283_v43, 6 }
  0x64   : > { %443 = vrot.lane.b32.xlu1 %v418_v61, %s2647_s19  ;;  %v853_v61 = vrot.slane %v3283_v43, 2  ;;  %5273 = vst [vmem:[#allocation112_spill] sm:$0xff] %v3423_v49 }
  0x66   : > { %2590 = vrot.lane.b32.xlu0 %v2589_v28, %s2647_s19  ;;  %v515_v28 = vrot.slane %v3298_v38, 6  ;;  %v3428_v21 = vor.u32 %v853_v61, %v852_v62  ;;  %v517_v38 = vrot.slane %v3280_v46, 5  ;;  %v3443_v62 = vshrl.u32 %v3330_v48, 16 }
  0x67   : > { %v566_v46 = vcombine.low %v3262_v36, %v3262_v36 }
  0x68   : > { %447 = vrot.lane.b32.xlu1 %v420_v24, %s2647_s19  ;;  %v516_v20 = vor.u32 %v515_v28, %v514_v57  ;;  %v521_v24 = vrot.slane %v3307_v47, 6  ;;  %v519_v61 = vor.u32 %v518_v32, %v517_v38  ;;  %v218_v43 = vrot.slane %v3443_v62, 6 }
  0x69   : > { %v3460_v57 = vshll.u32 %v3448_v33, 16  ;;  %v375_v38 = vcombine.low %v3325_v58, %v3325_v58 }
  0x6a   : > { %445 = vrot.lane.b32.xlu0 %v419_v29, %s2647_s19  ;;  %v522_v29 = vor.u32 %v521_v24, %v520_v22  ;;  %v222_v28 = vor.u32 %v221_v63, %v218_v43  ;;  %v282_v22 = vrot.slane %v3330_v48, 5  ;;  %v322_v24 = vrot.slane %v3443_v62, 3 }
  0x6b   : > { %v326_v63 = vrot.slane %v3460_v57, 4 }
  0x6c   : > { %491 = vrot.lane.b32.xlu1 %v481_v52, %s2648_s20  ;;  %v3457_v52 = vshrl.u32 %v3448_v33, 16 }
  0x6e   : > { %489 = vrot.lane.b32.xlu0 %v480_v45, %s2648_s20  ;;  %v226_v45 = vrot.slane %v3457_v52, 6  ;;  %v325_v43 = vrot.slane %v3457_v52, 3 }
  0x70   : > { %537 = vrot.lane.b32.xlu1 %v516_v20, %s2649_s21  ;;  %v229_v20 = vrot.slane %v3460_v57, 7 }
  0x72   : > { %493 = vrot.lane.b32.xlu0 %v482_v51, %s2648_s20  ;;  %v323_v51 = vrot.slane %v3353_v55, 4  ;;  %v230_v32 = vor.u32 %v229_v20, %v226_v45  ;;  %v5275_v45 = vrot.slane %v3273_v41, 1  ;;  %v526_v41 = vrot.slane %v3457_v52, 5 }
  0x74   : > { %541 = vrot.lane.b32.xlu1 %v522_v29, %s2649_s21  ;;  %v324_v29 = vor.u32 %v323_v51, %v322_v24  ;;  %v5276_v24 = vrot.slane %v3353_v55, 1 }
  0x76   : > { %539 = vrot.lane.b32.xlu0 %v519_v61, %s2649_s21  ;;  %v3477_v61 = vrot.slane %v375_v38, %v3253_v40  ;;  %v327_v40 = vor.u32 %v326_v63, %v325_v43  ;;  %v421_v51 = vor.u32 %v5276_v24, %v3443_v62  ;;  %v484_v38 = vrot.slane %v3448_v33, 7 }
  0x77   : > { %v524_v43 = vrot.slane %v3353_v55, 6 }
  0x78   : > { %572 = vrot.lane.b32.xlu1 %v566_v46, %s2650_s22  ;;  %v283_v46 = vrot.slane %v3448_v33, 5  ;;  %v3486_v58 = vcombine.low %v3477_v61, %v3477_v61 }
  0x7a   : > { %570 = vrot.lane.b32.xlu0 %v3259_v44, %s2650_s22 }
  0x7c   : > { %255 = vrot.lane.b32.xlu1 %v222_v28, %s2644_s16  ;;  %v414_v28 = vrot.slane %v3460_v57, 1 }
  0x7e   : > { %574 = vrot.lane.b32.xlu0 %v3262_v36, %s2650_s22  ;;  %v2594_v20 = vpack.i.bf16 %v5275_v45, %v414_v28  ;;  %v373_v45 = vcombine.low %v3350_v37, %v3350_v37 }
  0x80   : > { %294 = vrot.lane.b32.xlu1 %v282_v22, %s2643_s3  ;;  %v422_v22 = vor.u32 %v414_v28, %v3457_v52 }
  0x82   : > { %257 = vrot.lane.b32.xlu0 %v230_v32, %s2644_s16  ;;  %v527_v32 = vrot.slane %v3460_v57, 6 }
  0x84   : > { %342 = vrot.lane.b32.xlu1 %v324_v29, %s2645_s17  ;;  %v483_v29 = vrot.slane %v3330_v48, 7  ;;  %v528_v63 = vor.u32 %v527_v32, %v526_v41  ;;  %v816_v32 = vrot.slane %v3262_v36, 3 }
  0x86   : > { %296 = vrot.lane.b32.xlu0 %v283_v46, %s2643_s3  ;;  %v523_v46 = vrot.slane %v3443_v62, 5 }
  0x88   : > { %1193 = vrot.lane.b32.xlu1 %v3486_v58, %s2646_s18  ;;  %v525_v28 = vor.u32 %v524_v43, %v523_v46  ;;  %v3591_v46 = vshll.u32 %v3423_v49, 16  ;;  %v3600_v43 = vcombine.high %v3423_v49, %v3423_v49 }
  0x8a   : > { %344 = vrot.lane.b32.xlu0 %v327_v40, %s2645_s17  ;;  %v3516_v40 = vcombine.low %v3330_v48, %v3330_v48  ;;  %5279 = vst [vmem:[#allocation116_spill] sm:$0xff] %v3591_v46  ;;  %5280 = vst [vmem:[#allocation117_spill] sm:$0xff] %v3600_v43 }
  0x8c   : > { %2595 = vrot.lane.b32.xlu1 %v2594_v20, %s2647_s19  ;;  %5277 = vst [vmem:[#allocation114_spill] sm:$0xff] %v3516_v40  ;;  %v479_v20 = vrot.slane %v3259_v44, 7 }
  0x8e   : > { %1195 = vrot.lane.b32.xlu0 %v3477_v61, %s2646_s18 }
  0x90   : > { %451 = vrot.lane.b32.xlu1 %v422_v22, %s2647_s19  ;;  %v648_v22 = vrot.slane %v3267_v39, 1 }
  0x92   : > { %449 = vrot.lane.b32.xlu0 %v421_v51, %s2647_s19  ;;  %v733_v51 = vcombine.high %v3350_v37, %v3350_v37 }
  0x94   : > { %497 = vrot.lane.b32.xlu1 %v484_v38, %s2648_s20 }
  0x96   : > { %495 = vrot.lane.b32.xlu0 %v483_v29, %s2648_s20  ;;  %v3588_v29 = vshrl.u32 %v3423_v49, 16 }
  0x98   : > { %545 = vrot.lane.b32.xlu1 %v528_v63, %s2649_s21  ;;  %5278 = vst [vmem:[#allocation115_spill] sm:$0xff] %v3588_v29  ;;  %v234_v63 = vrot.slane %v3588_v29, 6  ;;  %v328_v14 = vrot.slane %v3588_v29, 3 }
  0x9a   : > { %543 = vrot.lane.b32.xlu0 %v525_v28, %s2649_s21  ;;  %v237_v28 = vrot.slane %v3591_v46, 7 }
  0x9c   : > { %578 = vrot.lane.b32.xlu1 %v3330_v48, %s2650_s22 }
  0x9e   : > { %576 = vrot.lane.b32.xlu0 %v3516_v40, %s2650_s22 }
  0xa0   : > { %389 = vrot.lane.b32.xlu1 %v3339_v50, %s2651_s23 }
  0xa2   : > { %387 = vrot.lane.b32.xlu0 %v3350_v37, %s2651_s23 }
  0xa4   : > { %441 = vrot.lane.b32.xlu1 %v3346_v54, %s2647_s19  ;;  %v649_v54 = vrot.slane %v3262_v36, 1 }
  0xa6   : > { %385 = vrot.lane.b32.xlu0 %v373_v45, %s2651_s23  ;;  %v814_v45 = vrot.slane %v3259_v44, 3 }
  0xa8   : > { %535 = vrot.lane.b32.xlu1 %v3363_v34, %s2649_s21 }
  0xaa   : > { %487 = vrot.lane.b32.xlu0 %v479_v20, %s2648_s20  ;;  %v3612_v20 = vshrl.u32 %v3600_v43, 16 }
  0xac   : > { %618 = vrot.lane.b32.xlu1 %v3368_v30, %s2652_s24  ;;  %5281 = vst [vmem:[#allocation118_spill] sm:$0xff] %v3612_v20 }
  0xae   : > { %568 = vrot.lane.b32.xlu0 %v3339_v50, %s2650_s22 }
  0xb0   : > { %616 = vrot.lane.b32.xlu1 %v3370_v31, %s2652_s24 }
  0xb2   : > { %620 = vrot.lane.b32.xlu0 %v3376_v26, %s2652_s24  ;;  %v647_v26 = vrot.slane %v3259_v44, 1 }
  0xb4   : > { %659 = vrot.lane.b32.xlu1 %v649_v54, %s2653_s1  ;;  %v3615_v54 = vshll.u32 %v3600_v43, 16 }
  0xb6   : > { %v3546_v34 = vpop.permute.xlu1 %286  ;;  %657 = vrot.lane.b32.xlu0 %v648_v22, %s2653_s1  ;;  %5282 = vst [vmem:[#allocation119_spill] sm:$0xff] %v3615_v54 }
  0xb8   : > { %v3549_v30 = vpop.permute.xlu0 %288  ;;  %706 = vrot.lane.b32.xlu1 %v3381_v27, %s2654_s25 }
  0xba   : > { %v3553_v31 = vpop.permute.xlu1 %290  ;;  %704 = vrot.lane.b32.xlu0 %v3386_v35, %s2654_s25 }
  0xbb   : > { %v304_v10 = vsel %vm5080_vm12, %v3549_v30, %v3553_v31 }
  0xbc   : > { %v3558_v50 = vpop.permute.xlu0 %292  ;;  %702 = vrot.lane.b32.xlu1 %v3389_v59, %s2654_s25 }
  0xbd   : > { %v305_v3 = vsel %vm5080_vm12, %v3553_v31, %v3558_v50 }
  0xbe   : > { %v3562_v24 = vpop.permute.xlu1 %247  ;;  %655 = vrot.lane.b32.xlu0 %v647_v26, %s2653_s1  ;;  %v238_v26 = vor.u32 %v237_v28, %v234_v63  ;;  %v285_v63 = vrot.slane %v3600_v43, 5  ;;  %v331_v28 = vrot.slane %v3612_v20, 3 }
  0xc0   : > { %v3567_v27 = vpop.permute.xlu0 %251  ;;  %739 = vrot.lane.b32.xlu1 %v3259_v44, %s2655_s2 }
  0xc2   : > { %v3571_v35 = vpop.permute.xlu1 %338  ;;  %737 = vrot.lane.b32.xlu0 %v733_v51, %s2655_s2 }
  0xc4   : > { %v3574_v38 = vpop.permute.xlu0 %249  ;;  %785 = vrot.lane.b32.xlu1 %v3400_v56, %s2656_s26 }
  0xc6   : > { %735 = vrot.lane.b32.xlu0 %v3350_v37, %s2655_s2  ;;  %v3580_v59 = vpop.permute.xlu1 %253  ;;  %v815_v37 = vrot.slane %v3267_v39, 3 }
  0xc7   : > { %v266_v8 = vsel %vm5079_vm0, %v3567_v27, %v3580_v59 }
  0xc8   : > { %v3582_v41 = vpop.permute.xlu0 %336  ;;  %783 = vrot.lane.b32.xlu1 %v3405_v25, %s2656_s26  ;;  %v906_v2 = vsel %vm3650_vm3, %v3262_v36, %v266_v8 }
  0xc9   : > { %v922_v36 = vsel %vm5081_vm7, %v906_v2, %v305_v3  ;;  %v485_v3 = vrot.slane %v3423_v49, 7 }
  0xca   : > { %787 = vrot.lane.b32.xlu0 %v3409_v23, %s2656_s26  ;;  %v3595_v56 = vpop.permute.xlu1 %334 }
  0xcc   : > { %v3602_v25 = vpop.permute.xlu0 %340  ;;  %826 = vrot.lane.b32.xlu1 %v816_v32, %s2657_s27  ;;  %v242_v32 = vrot.slane %v3612_v20, 6 }
  0xce   : > { %824 = vrot.lane.b32.xlu0 %v815_v37, %s2657_s27  ;;  %v3608_v23 = vpop.permute.xlu1 %1189  ;;  %v245_v37 = vrot.slane %v3615_v54, 7 }
  0xd0   : > { %v3617_v22 = vpop.permute.xlu0 %1187  ;;  %872 = vrot.lane.b32.xlu1 %v3420_v53, %s2658_s28  ;;  %v246_v17 = vor.u32 %v245_v37, %v242_v32  ;;  %v329_v32 = vrot.slane %v3591_v46, 4 }
  0xd1   : > { %v1202_v11 = vsel %vm5055_vm8, %v3617_v22, %v3608_v23 }
  0xd2   : > { %822 = vrot.lane.b32.xlu0 %v814_v45, %s2657_s27  ;;  %v3622_v51 = vpop.permute.xlu1 %2585  ;;  %v332_v45 = vrot.slane %v3615_v54, 4  ;;  %v330_v13 = vor.u32 %v329_v32, %v328_v14 }
  0xd4   : > { %v3626_v19 = vpop.permute.xlu0 %1191  ;;  %259 = vrot.lane.b32.xlu1 %v238_v26, %s2644_s16  ;;  %v333_v37 = vor.u32 %v332_v45, %v331_v28  ;;  %v3662_v28 = vunpack.i.l.bf16 %v3622_v51 }
  0xd5   : > { %v1203_v8 = vsel %vm5055_vm8, %v3608_v23, %v3626_v19  ;;  %vm5077_vm8 = vcmask 1043456  }
  0xd6   : > { %874 = vrot.lane.b32.xlu0 %v3428_v21, %s2658_s28  ;;  %v3631_v16 = vpop.permute.xlu1 %443  ;;  %v284_v21 = vrot.slane %v3423_v49, 5 }
  0xd8   : > { %v3633_v53 = vpop.permute.xlu0 %2590  ;;  %870 = vrot.lane.b32.xlu1 %v3430_v18, %s2658_s28 }
  0xda   : > { %261 = vrot.lane.b32.xlu0 %v246_v17, %s2644_s16  ;;  %v3641_v26 = vpop.permute.xlu1 %447  ;;  %v265_v17 = vsel %vm5079_vm0, %v3574_v38, %v3567_v27 }
  0xdc   : > { %v3646_v18 = vpop.permute.xlu0 %445  ;;  %300 = vrot.lane.b32.xlu1 %v285_v63, %s2643_s3  ;;  %v2588_v63 = vunpack.i.h.bf16 %v3622_v51  ;;  %v352_v51 = vsel %vm5082_vm4, %v3582_v41, %v3571_v35 }
  0xde   : > { %298 = vrot.lane.b32.xlu0 %v284_v21, %s2643_s3  ;;  %v3658_v12 = vpop.permute.xlu1 %491  ;;  %v905_v21 = vsel %vm3650_vm3, %v3267_v39, %v265_v17  ;;  %v416_v17 = vrot.slane %v3615_v54, 1  ;;  %v3699_v6 = vsel %vm5090_vm9, %v3662_v28, %v2588_v63 }
  0xe0   : > { %v3664_v45 = vpop.permute.xlu0 %489  ;;  %348 = vrot.lane.b32.xlu1 %v333_v37, %s2645_s17  ;;  %v415_v37 = vrot.slane %v3591_v46, 1 }
  0xe2   : > { %346 = vrot.lane.b32.xlu0 %v330_v13, %s2645_s17  ;;  %v3679_v32 = vpop.permute.xlu1 %537  ;;  %v918_v13 = vsel %vm5081_vm7, %v905_v21, %v304_v10  ;;  %v2599_v5 = vpack.i.bf16 %v416_v17, %v415_v37 }
  0xe3   : > { %v3709_v27 = vsel %vm3671_vm13, %v918_v13, %v352_v51  ;;  %v353_v13 = vsel %vm5082_vm4, %v3571_v35, %v3602_v25 }
  0xe4   : > { %v3693_v9 = vpop.permute.xlu0 %493  ;;  %1199 = vrot.lane.b32.xlu1 %v3330_v48, %s2646_s18  ;;  %v1257_v4 = vsel %vm5078_vm14, %v3709_v27, %v1202_v11  ;;  %v423_v11 = vor.u32 %v415_v37, %v3588_v29  ;;  %v5289_v37 = vunpack.i.l.bf16 %v3633_v53  ;;  %v3751_v31 = vsel %vm3671_vm13, %v922_v36, %v353_v13 }
  0xe5   : > { %v1279_v51 = vsel %vm3703_vm15, %v1257_v4, %v3699_v6  ;;  %v264_v4 = vsel %vm5079_vm0, %v3562_v24, %v3574_v38  ;;  %5291 = vst [vmem:[#allocation121_spill] sm:$0xff] %v3751_v31  ;;  %v1260_v2 = vsel %vm5078_vm14, %v3751_v31, %v1203_v8  ;;  %v351_v38 = vsel %vm5082_vm4, %v3595_v56, %v3582_v41 }
  0xe6   : > { %1197 = vrot.lane.b32.xlu0 %v3516_v40, %s2646_s18  ;;  %v3714_v21 = vpop.permute.xlu1 %541  ;;  %v424_v13 = vor.u32 %v416_v17, %v3612_v20  ;;  %v532_v36 = vrot.slane %v3612_v20, 5  ;;  %v533_v41 = vrot.slane %v3615_v54, 6  ;;  %v486_v17 = vrot.slane %v3600_v43, 7 }
  0xe7   : > { %v466_v43 = vsel %vm5090_vm9, %v3631_v16, %v3646_v18 }
  0xe8   : > { %v3727_v10 = vpop.permute.xlu0 %539  ;;  %1330 = vrot.lane.b32.xlu1 %v1279_v51, %s2659_s29  ;;  %v3747_v51 = vsel %vm5090_vm9, %v2588_v63, %v5289_v37  ;;  %v3786_v37 = vld.sshfl [vmem:[%s3248_s15 + $0x10] sm:$0x3 pattern:$0x76325410] }
  0xe9   : > { %5290 = vst [vmem:[#allocation120_spill] sm:$0xff] %v3747_v51  ;;  %v1280_v24 = vsel %vm3703_vm15, %v1260_v2, %v3747_v51  ;;  %v529_v2 = vrot.slane %v3588_v29, 5  ;;  %v567_v51 = vcombine.low %v3423_v49, %v3423_v49  ;;  %v1220_v31 = vshrl.u32 %v3786_v37, 16 }
  0xea   : > { %2600 = vrot.lane.b32.xlu0 %v2599_v5, %s2647_s19  ;;  %v3742_v35 = vpop.permute.xlu1 %572  ;;  %v904_v5 = vsel %vm3650_vm3, %v3259_v44, %v264_v4 }
  0xec   : > { %v3753_v23 = vpop.permute.xlu0 %570  ;;  %453 = vrot.lane.b32.xlu1 %v423_v11, %s2647_s19  ;;  %v303_v11 = vsel %vm5080_vm12, %v3546_v34, %v3549_v30 }
  0xed   : > { %v914_v8 = vsel %vm5081_vm7, %v904_v5, %v303_v11 }
  0xee   : > { %v3768_v63 = vpop.permute.xlu1 %255  ;;  %1332 = vrot.lane.b32.xlu0 %v1280_v24, %s2659_s29  ;;  %v3783_v56 = vsel %vm3671_vm13, %v914_v8, %v351_v38  ;;  %v534_v38 = vor.u32 %v533_v41, %v532_v36 }
  0xef   : > { %v1254_v34 = vsel %vm5078_vm14, %v3783_v56, %v3617_v22  ;;  %v1217_v22 = vshll.u32 %v3786_v37, 16 }
  0xf0   : > { %v3776_v4 = vpop.permute.xlu0 %574  ;;  %499 = vrot.lane.b32.xlu1 %v485_v3, %s2648_s20  ;;  %v530_v3 = vrot.slane %v3591_v46, 6  ;;  %v1278_v5 = vsel %vm3703_vm15, %v1254_v34, %v3662_v28  ;;  %v694_v46 = vrot.slane %v3443_v62, 7 }
  0xf1   : > { %v1219_v34 = vrot.slane %v1217_v22, 1 }
  0xf2   : > { %v3791_v30 = vpop.permute.xlu1 %294  ;;  %455 = vrot.lane.b32.xlu0 %v424_v13, %s2647_s19  ;;  %v531_v13 = vor.u32 %v530_v3, %v529_v2  ;;  %v1236_v2 = vrot.slane %v1217_v22, 6  ;;  %v467_v22 = vsel %vm5090_vm9, %v3646_v18, %v3641_v26 }
  0xf3   : > { %v1222_v41 = vor.u32 %v1220_v31, %v1219_v34 }
  0xf4   : > { %v3800_v24 = vpop.permute.xlu0 %257  ;;  %1328 = vrot.lane.b32.xlu1 %v1278_v5, %s2659_s29  ;;  %v506_v5 = vsel %vm5088_vm6, %v3658_v12, %v3693_v9 }
  0xf6   : > { %v3804_v11 = vpop.permute.xlu1 %342  ;;  %501 = vrot.lane.b32.xlu0 %v486_v17, %s2648_s20  ;;  %v1235_v17 = vrot.slane %v1220_v31, 5 }
  0xf8   : > { %v3807_v8 = vpop.permute.xlu0 %296  ;;  %549 = vrot.lane.b32.xlu1 %v534_v38, %s2649_s21  ;;  %v554_v38 = vsel %vm5062_vm2, %v3727_v10, %v3714_v21  ;;  %v1237_v31 = vor.u32 %v1236_v2, %v1235_v17  ;;  %v553_v17 = vsel %vm5062_vm2, %v3679_v32, %v3727_v10  ;;  %v1288_v10 = vsel %vm5086_vm5, %v3631_v16, %v3664_v45  ;;  %vm3878_vm2 = vmand %vm5078_vm14, %vm1058_vm10 }
  0xf9   : > { %vm5076_vm10 = vcmask 1014784  }
  0xfa   : > { %v3813_v0 = vpop.permute.xlu1 %1193  ;;  %547 = vrot.lane.b32.xlu0 %v531_v13, %s2649_s21  ;;  %v505_v13 = vsel %vm5088_vm6, %v3664_v45, %v3658_v12  ;;  %v1231_v12 = vrot.slane %v3786_v37, 7 }
  0xfc   : > { %v3816_v36 = vpop.permute.xlu0 %344  ;;  %580 = vrot.lane.b32.xlu1 %v567_v51, %s2650_s22 }
  0xfe   : > { %v3819_v3 = vpop.permute.xlu1 %2595  ;;  %1223 = vrot.lane.b32.xlu0 %v1219_v34, %s2647_s19  ;;  %v587_v34 = vsel %vm5085_vm11, %v3742_v35, %v3776_v4 }
 0x100   : > { %v3828_v51 = vpop.permute.xlu0 %1195  ;;  %1225 = vrot.lane.b32.xlu1 %v1222_v41, %s2647_s19  ;;  %v1000_v41 = vsel %vm5086_vm5, %v467_v22, %v506_v5  ;;  %v586_v5 = vsel %vm5085_vm11, %v3753_v23, %v3742_v35  ;;  %v996_v22 = vsel %vm5086_vm5, %v466_v43, %v505_v13  ;;  %v5063_v13 = vmov 0  }
 0x101   : > { %v1023_v54 = vsel %vm3841_vm1, %v1000_v41, %v554_v38  ;;  %v1022_v38 = vsel %vm3841_vm1, %v996_v22, %v553_v17  ;;  %1430 = vmatprep.mubr.bf16.mxu0 %v5063_v13  ;;  %2604 = vset.pattern.permute.xlu0 %v5063_v13 }
 0x102   : > { %v3849_v2 = vpop.permute.xlu1 %451  ;;  %582 = vrot.lane.b32.xlu0 %v3423_v49, %s2650_s22  ;;  %v3870_v18 = vsel %vm5077_vm8, %v1023_v54, %v587_v34  ;;  %v3883_v43 = vsel %vm5077_vm8, %v1022_v38, %v586_v5  ;;  %v1294_v54 = vsel %vm3841_vm1, %v1288_v10, %v3679_v32  ;;  %v1243_v10 = vcombine.low %v3786_v37, %v3786_v37 }
 0x103   : > { %5294 = vst [vmem:[#allocation122_spill] sm:$0xff] %v3870_v18  ;;  %v1298_v17 = vsel %vm5077_vm8, %v1294_v54, %v3753_v23  ;;  %v604_v54 = vrot.slane %v3443_v62, 2  ;;  %vm5083_vm8 = vcmask 523264  }
 0x104   : > { %v3866_v49 = vpop.permute.xlu0 %449  ;;  %1238 = vrot.lane.b32.xlu1 %v1237_v31, %s2649_s21  ;;  %v1306_v31 = vsel %vm3878_vm2, %v3870_v18, 0  ;;  %v1304_v22 = vsel %vm3878_vm2, %v1298_v17, 0  ;;  %v602_v18 = vrot.slane %v3307_v47, 3 }
 0x106   : > { %v3874_v41 = vpop.permute.xlu1 %497  ;;  %1232 = vrot.lane.b32.xlu0 %v1231_v12, %s2648_s20  ;;  %v1305_v12 = vsel %vm3878_vm2, %v3883_v43, 0 }
 0x108   : > { %v3893_v34 = vpop.permute.xlu0 %495  ;;  %1348 = vrot.lane.b32.xlu1 %v1306_v31, %s2659_s29  ;;  %v605_v31 = vrot.slane %v3353_v55, 3 }
 0x10a   : > { %v3901_v5 = vpop.permute.xlu1 %545  ;;  %1346 = vrot.lane.b32.xlu0 %v1305_v12, %s2659_s29  ;;  %v601_v12 = vrot.slane %v3304_v60, 2  ;;  %v606_v17 = vor.u32 %v605_v31, %v604_v54  ;;  %v692_v31 = vrot.slane %v3304_v60, 7 }
 0x10c   : > { %v3908_v38 = vpop.permute.xlu0 %543  ;;  %1344 = vrot.lane.b32.xlu1 %v1304_v22, %s2659_s29  ;;  %v603_v22 = vor.u32 %v602_v18, %v601_v12  ;;  %v650_v18 = vrot.slane %v3277_v42, 1 }
 0x10e   : > { %v3913_v13 = vpop.permute.xlu1 %578  ;;  %1244 = vrot.lane.b32.xlu0 %v1243_v10, %s2650_s22  ;;  %v651_v10 = vrot.slane %v3330_v48, 1 }
 0x110   : > { %v3918_v37 = vpop.permute.xlu0 %576  ;;  %393 = vrot.lane.b32.xlu1 %v3486_v58, %s2651_s23  ;;  %v2598_v58 = vunpack.i.h.bf16 %v3819_v3 }
 0x112   : > { %v3922_v20 = vpop.permute.xlu1 %389  ;;  %391 = vrot.lane.b32.xlu0 %v3259_v44, %s2651_s23 }
 0x113   : > { %5297 = vst [vmem:[#allocation123_spill] sm:$0xff] %v3922_v20 }
 0x114   : > { %v388_v33 = vpop.permute.xlu0 %387  ;;  %624 = vrot.lane.b32.xlu1 %v606_v17, %s2652_s24 }
 0x115   : > { %v403_v29 = vsel %vm5076_vm10, %v388_v33, %v3922_v20  ;;  %v695_v20 = vor.u32 %v694_v46, %v3353_v55  ;;  %v772_v46 = vrot.slane %v3353_v55, 5 }
 0x116   : > { %v3932_v54 = vpop.permute.xlu1 %441  ;;  %622 = vrot.lane.b32.xlu0 %v603_v22, %s2652_s24  ;;  %v957_v44 = vsel %vm5078_vm14, %v3709_v27, %v403_v29  ;;  %v458_v29 = vsel %vm5090_vm9, %v2598_v58, %v3662_v28  ;;  %v768_v28 = vrot.slane %v3304_v60, 4 }
 0x117   : > { %v983_v12 = vsel %vm3703_vm15, %v957_v44, %v3699_v6  ;;  %v693_v6 = vor.u32 %v692_v31, %v3307_v47  ;;  %v859_v31 = vrot.slane %v3353_v55, 2 }
 0x118   : > { %v386_v17 = vpop.permute.xlu0 %385  ;;  %663 = vrot.lane.b32.xlu1 %v651_v10, %s2653_s1  ;;  %1398 = vmatprep.subr.bf16.mxu0 %v983_v12 }
 0x119   : > { %v402_v40 = vsel %vm5076_vm10, %v386_v17, %v388_v33  ;;  %v771_v33 = vrot.slane %v3443_v62, 4  ;;  %vm5084_vm10 = vcmask 752640  }
 0x11a   : > { %v3945_v22 = vpop.permute.xlu1 %535  ;;  %661 = vrot.lane.b32.xlu0 %v650_v18, %s2653_s1  ;;  %v953_v27 = vsel %vm5078_vm14, %v3783_v56, %v402_v40  ;;  %v769_v40 = vrot.slane %v3307_v47, 5  ;;  %vm1067_vm14 = vcmask 1046528  }
 0x11b   : > { %v982_v10 = vsel %vm3703_vm15, %v953_v27, %v458_v29  ;;  %v773_v58 = vor.u32 %v772_v46, %v771_v33  ;;  %v855_v29 = vrot.slane %v3304_v60, 1  ;;  %v856_v27 = vrot.slane %v3307_v47, 2 }
 0x11c   : > { %v488_v44 = vpop.permute.xlu0 %487  ;;  %710 = vrot.lane.b32.xlu1 %v695_v20, %s2654_s25  ;;  %1399 = vmatpush1.bf16.msra.mxu0 %v982_v10  ;;  %v858_v20 = vrot.slane %v3443_v62, 1  ;;  %v770_v17 = vor.u32 %v769_v40, %v768_v28  ;;  %v306_v10 = vsel %vm5080_vm12, %v3558_v50, %v3791_v30  ;;  %v268_v60 = vsel %vm5079_vm0, %v3768_v63, %v3800_v24 }
 0x11d   : > { %v817_v47 = vrot.slane %v3277_v42, 3  ;;  %v857_v28 = vor.u32 %v856_v27, %v855_v29  ;;  %v354_v40 = vsel %vm5082_vm4, %v3602_v25, %v3804_v11  ;;  %v2597_v25 = vunpack.i.l.bf16 %v3819_v3 }
 0x11e   : > { %v3958_v18 = vpop.permute.xlu1 %618  ;;  %708 = vrot.lane.b32.xlu0 %v693_v6, %s2654_s25  ;;  %v267_v6 = vsel %vm5079_vm0, %v3580_v59, %v3768_v63  ;;  %v860_v55 = vor.u32 %v859_v31, %v858_v20  ;;  %v2593_v59 = vunpack.i.h.bf16 %v3633_v53  ;;  %v908_v20 = vsel %vm3650_vm3, %v3330_v48, %v268_v60 }
 0x11f   : > { %v907_v50 = vsel %vm3650_vm3, %v3277_v42, %v267_v6  ;;  %v504_v42 = vsel %vm5088_vm6, %v488_v44, %v3664_v45  ;;  %vm5298_vm0 = vcmask 793600  }
 0x120   : > { %v569_v56 = vpop.permute.xlu0 %568  ;;  %743 = vrot.lane.b32.xlu1 %v3477_v61, %s2655_s2  ;;  %v926_v63 = vsel %vm5081_vm7, %v907_v50, %v306_v10  ;;  %v1204_v31 = vsel %vm5298_vm0, %v3626_v19, %v3813_v0 }
 0x121   : > { %v4030_v44 = vsel %vm3671_vm13, %v926_v63, %v354_v40  ;;  %v585_v10 = vsel %vm5085_vm11, %v569_v56, %v3753_v23  ;;  %v4062_v23 = vsel %vm5090_vm9, %v2593_v59, %v2597_v25 }
 0x122   : > { %v617_v12 = vpop.permute.xlu1 %616  ;;  %741 = vrot.lane.b32.xlu0 %v3267_v39, %s2655_s2  ;;  %v818_v39 = vrot.slane %v3330_v48, 3 }
 0x124   : > { %v3977_v62 = vpop.permute.xlu0 %620  ;;  %791 = vrot.lane.b32.xlu1 %v773_v58, %s2656_s26  ;;  %v307_v58 = vsel %vm5080_vm12, %v3791_v30, %v3807_v8  ;;  %vm5299_vm12 = vmmov %vm5298_vm0  ;;  %v465_v30 = vsel %vm5090_vm9, %v3932_v54, %v3631_v16  ;;  %vm5300_vm0 = vcmask 1045504  }
 0x125   : > { %v634_v33 = vsel %vm5084_vm10, %v3958_v18, %v3977_v62  ;;  %v1205_v45 = vsel %vm5299_vm12, %v3813_v0, %v3828_v51  ;;  %v930_v27 = vsel %vm5081_vm7, %v908_v20, %v307_v58  ;;  %v992_v0 = vsel %vm5086_vm5, %v465_v30, %v504_v42 }
 0x126   : > { %v3992_v46 = vpop.permute.xlu1 %659  ;;  %789 = vrot.lane.b32.xlu0 %v770_v17, %s2656_s26  ;;  %v355_v17 = vsel %vm5082_vm4, %v3804_v11, %v3816_v36  ;;  %v1061_v11 = vsel %vm3878_vm2, %v3883_v43, %v634_v33  ;;  %v508_v43 = vsel %vm5088_vm6, %v3893_v34, %v3874_v41  ;;  %vm5301_vm12 = vcmask 769024   ;;  %vm5303_vm4 = vmmov %vm5300_vm0 }
 0x127   : > { %v4041_v54 = vsel %vm3671_vm13, %v930_v27, %v355_v17  ;;  %v556_v60 = vsel %vm5301_vm12, %v3908_v38, %v3901_v5  ;;  %vm5302_vm7 = vmmov %vm5301_vm12  ;;  %v469_v33 = vsel %vm5090_vm9, %v3866_v49, %v3849_v2  ;;  %v633_v42 = vsel %vm5084_vm10, %v617_v12, %v3958_v18 }
 0x128   : > { %v658_v29 = vpop.permute.xlu0 %657  ;;  %830 = vrot.lane.b32.xlu1 %v818_v39, %s2657_s27  ;;  %v1263_v39 = vsel %vm5300_vm0, %v4030_v44, %v1204_v31  ;;  %v1266_v56 = vsel %vm5303_vm4, %v4041_v54, %v1205_v45  ;;  %v1008_v63 = vsel %vm5086_vm5, %v469_v33, %v508_v43  ;;  %vm5304_vm4 = vmmov %vm5302_vm7  ;;  %v2661_v30 = vmov 0.0  }
 0x129   : > { %v4023_v19 = vsel %vm5083_vm8, %v658_v29, %v3992_v46  ;;  %v555_v40 = vsel %vm5304_vm4, %v3714_v21, %v3908_v38  ;;  %v588_v21 = vsel %vm5085_vm11, %v3776_v4, %v3918_v37  ;;  %v1282_v38 = vsel %vm3703_vm15, %v1266_v56, %v4062_v23  ;;  %2530 = vmatprep.subr.bf16.mxu1 %v2661_v30  ;;  %v5310_v56 = vld [vmem:[#allocation115_spill] sm:$0xff] }
 0x12a   : > { %v4034_v6 = vpop.permute.xlu1 %706  ;;  %828 = vrot.lane.b32.xlu0 %v817_v47, %s2657_s27  ;;  %v1074_v16 = vsel %vm1067_vm14, %v1061_v11, %v4023_v19  ;;  %v552_v47 = vsel %vm5302_vm7, %v3945_v22, %v3679_v32  ;;  %v507_v32 = vsel %vm5088_vm6, %v3693_v9, %v3893_v34  ;;  %v589_v22 = vsel %vm5085_vm11, %v3918_v37, %v3913_v13 }
 0x12b   : > { %1400 = vmatprep.subr.bf16.mxu0 %v1074_v16  ;;  %vm5305_vm7 = vcmask 1043456   ;;  %v468_v9 = vsel %vm5090_vm9, %v3641_v26, %v3866_v49  ;;  %v1025_v34 = vsel %vm3841_vm1, %v1008_v63, %v556_v60  ;;  %v607_v27 = vrot.slane %v3457_v52, 2  ;;  %v5312_v63 = vld [vmem:[#allocation113_spill] sm:$0xff] }
 0x12c   : > { %v4056_v50 = vpop.permute.xlu0 %704  ;;  %878 = vrot.lane.b32.xlu1 %v860_v55, %s2658_s28  ;;  %v1021_v55 = vsel %vm3841_vm1, %v992_v0, %v552_v47  ;;  %v1004_v18 = vsel %vm5086_vm5, %v468_v9, %v507_v32  ;;  %vm5307_vm0 = vmmov %vm5305_vm7  ;;  %v608_v0 = vrot.slane %v3460_v57, 3  ;;  %v610_v33 = vrot.slane %v5310_v56, 2  ;;  %v5311_v32 = vld [vmem:[#allocation116_spill] sm:$0xff] }
 0x12d   : > { %v1031_v58 = vsel %vm5305_vm7, %v1021_v55, %v585_v10  ;;  %v4106_v26 = vsel %vm5307_vm0, %v1025_v34, %v589_v22  ;;  %v1024_v4 = vsel %vm3841_vm1, %v1004_v18, %v555_v40  ;;  %vm5308_vm12 = vmmov %vm5307_vm0  ;;  %v611_v22 = vrot.slane %v5311_v32, 3 }
 0x12e   : > { %v4084_v20 = vpop.permute.xlu1 %702  ;;  %876 = vrot.lane.b32.xlu0 %v857_v28, %s2658_s28  ;;  %v5306_v28 = vunpack.i.l.bf16 %v3633_v53  ;;  %v1060_v17 = vsel %vm3878_vm2, %v1031_v58, %v633_v42  ;;  %v4124_v45 = vsel %vm5308_vm12, %v1024_v4, %v588_v21  ;;  %v609_v60 = vor.u32 %v608_v0, %v607_v27 }
 0x12f   : > { %v1307_v16 = vsel %vm3878_vm2, %v4124_v45, 0  ;;  %v652_v40 = vrot.slane %v5312_v63, 1  ;;  %v696_v58 = vrot.slane %v3457_v52, 7  ;;  %v612_v9 = vor.u32 %v611_v22, %v610_v33 }
 0x130   : > { %v656_v12 = vpop.permute.xlu0 %655  ;;  %1336 = vrot.lane.b32.xlu1 %v1282_v38, %s2659_s29  ;;  %v4103_v49 = vsel %vm5090_vm9, %v5306_v28, %v2593_v59  ;;  %vm5089_vm4 = vcmask 515072   ;;  %vm1097_vm7 = vsmask.f32 256  ;;  %v5313_v38 = vld [vmem:[#allocation118_spill] sm:$0xff]  ;;  %vm5087_vm0 = vcmask 506880  }
 0x131   : > { %v4111_v37 = vsel %vm5083_vm8, %v656_v12, %v658_v29  ;;  %v1281_v31 = vsel %vm3703_vm15, %v1263_v39, %v4103_v49  ;;  %v1308_v29 = vsel %vm3878_vm2, %v4106_v26, 0  ;;  %v5309_v39 = vld [vmem:[#allocation114_spill] sm:$0xff]  ;;  %v697_v21 = vor.u32 %v696_v58, %v3460_v57  ;;  %v5314_v12 = vld [vmem:[#allocation119_spill] sm:$0xff]  ;;  %vm4160_vm12 = vmand %vm5086_vm5, %vm1097_vm7 }
 0x132   : > { %v4118_v53 = vpop.permute.xlu1 %739  ;;  %1334 = vrot.lane.b32.xlu0 %v1281_v31, %s2659_s29  ;;  %v1070_v59 = vsel %vm1067_vm14, %v1060_v17, %v4111_v37  ;;  %v613_v18 = vrot.slane %v5313_v38, 2  ;;  %v614_v28 = vrot.slane %v5314_v12, 3  ;;  %v5315_v31 = vld [vmem:[#allocation112_spill] sm:$0xff]  ;;  %v720_v27 = vsel %vm5089_vm4, %v4056_v50, %v4034_v6 }
 0x133   : > { %1401 = vmatpush1.bf16.msra.mxu0 %v1070_v59  ;;  %v653_v17 = vrot.slane %v5315_v31, 1  ;;  %v698_v59 = vrot.slane %v5310_v56, 7  ;;  %vm799_vm8 = vcmask 498688   ;;  %vm1136_vm10 = vsmask.f32 3328 }
 0x134   : > { %v738_v11 = vpop.permute.xlu0 %737  ;;  %1352 = vrot.lane.b32.xlu1 %v1308_v29, %s2659_s29  ;;  %vm5092_vm11 = vcmask 490496   ;;  %vm1175_vm7 = vsmask.f32 6400  ;;  %v719_v33 = vsel %vm5089_vm4, %v4084_v20, %v4056_v50  ;;  %vm5091_vm5 = vcmask 261120  }
 0x135   : > { %v753_v0 = vsel %vm5087_vm0, %v738_v11, %v4118_v53  ;;  %v699_v58 = vor.u32 %v698_v59, %v5311_v32  ;;  %vm5321_vm4 = vcmask 1041408  }
 0x136   : > { %v786_v43 = vpop.permute.xlu1 %785  ;;  %1350 = vrot.lane.b32.xlu0 %v1307_v16, %s2659_s29  ;;  %vm5322_vm9 = vmmov %vm5321_vm4 }
 0x138   : > { %v736_v10 = vpop.permute.xlu0 %735  ;;  %397 = vrot.lane.b32.xlu1 %v5309_v39, %s2651_s23 }
 0x139   : > { %v752_v16 = vsel %vm5087_vm0, %v736_v10, %v738_v11  ;;  %v1099_v11 = vsel %vm4160_vm12, %v4111_v37, %v719_v33  ;;  %vm5318_vm0 = vcmask 1043456  }
 0x13a   : > { %v784_v47 = vpop.permute.xlu1 %783  ;;  %395 = vrot.lane.b32.xlu0 %v3477_v61, %s2651_s23  ;;  %vm4183_vm6 = vmand %vm5318_vm0, %vm1136_vm10  ;;  %vm1360_vm0 = vcmask 252928  }
 0x13b   : > { %v800_v37 = vsel %vm799_vm8, %v784_v47, %v786_v43  ;;  %vm4197_vm10 = vmand %vm1067_vm14, %vm1175_vm7  ;;  %vm5328_vm7 = vcmask 1039360  }
 0x13c   : > { %v4143_v55 = vpop.permute.xlu0 %787  ;;  %626 = vrot.lane.b32.xlu1 %v609_v60, %s2652_s24  ;;  %v615_v60 = vor.u32 %v614_v28, %v613_v18 }
 0x13d   : > { %v801_v22 = vsel %vm799_vm8, %v786_v43, %v4143_v55 }
 0x13e   : > { %v4148_v42 = vpop.permute.xlu1 %826  ;;  %399 = vrot.lane.b32.xlu0 %v3330_v48, %s2651_s23 }
 0x140   : > { %v825_v34 = vpop.permute.xlu0 %824  ;;  %665 = vrot.lane.b32.xlu1 %v652_v40, %s2653_s1  ;;  %v1100_v40 = vsel %vm4160_vm12, %v4023_v19, %v720_v27 }
 0x141   : > { %v840_v50 = vsel %vm5092_vm11, %v825_v34, %v4148_v42  ;;  %v1113_v19 = vsel %vm5321_vm4, %v1100_v40, %v753_v0 }
 0x142   : > { %v873_v4 = vpop.permute.xlu1 %872  ;;  %628 = vrot.lane.b32.xlu0 %v612_v9, %s2652_s24  ;;  %v1109_v9 = vsel %vm5322_vm9, %v1099_v11, %v752_v16  ;;  %v1139_v18 = vsel %vm4183_vm6, %v1113_v19, %v801_v22  ;;  %vm5325_vm9 = vcmask 1044480   ;;  %v734_v16 = vcombine.high %v3477_v61, %v3477_v61 }
 0x143   : > { %v1152_v43 = vsel %vm5325_vm9, %v1139_v18, %v840_v50  ;;  %v1138_v47 = vsel %vm4183_vm6, %v1109_v9, %v800_v37  ;;  %vm5326_vm4 = vmmov %vm5325_vm9  ;;  %v777_v11 = vrot.slane %v5310_v56, 4  ;;  %v778_v50 = vrot.slane %v5311_v32, 5 }
 0x144   : > { %v823_v39 = vpop.permute.xlu0 %822  ;;  %712 = vrot.lane.b32.xlu1 %v697_v21, %s2654_s25  ;;  %v774_v19 = vrot.slane %v3457_v52, 4  ;;  %vm5329_vm9 = vcmask 1031168  }
 0x145   : > { %v839_v28 = vsel %vm5092_vm11, %v823_v39, %v825_v34  ;;  %v779_v37 = vor.u32 %v778_v50, %v777_v11  ;;  %v861_v11 = vrot.slane %v3457_v52, 1  ;;  %v862_v50 = vrot.slane %v3460_v57, 2 }
 0x146   : > { %v4189_v20 = vpop.permute.xlu1 %259  ;;  %667 = vrot.lane.b32.xlu0 %v653_v17, %s2653_s1  ;;  %v700_v17 = vrot.slane %v5313_v38, 7  ;;  %vm5334_vm11 = vcmask 785408  }
 0x148   : > { %v4204_v27 = vpop.permute.xlu0 %874  ;;  %630 = vrot.lane.b32.xlu1 %v615_v60, %s2652_s24  ;;  %v1148_v60 = vsel %vm5326_vm4, %v1138_v47, %v839_v28  ;;  %v701_v40 = vor.u32 %v700_v17, %v5314_v12  ;;  %v781_v47 = vrot.slane %v5314_v12, 5  ;;  %vm5330_vm4 = vmmov %vm5328_vm7 }
 0x149   : > { %v888_v59 = vsel %vm5091_vm5, %v873_v4, %v4204_v27 }
 0x14a   : > { %v871_v0 = vpop.permute.xlu1 %870  ;;  %714 = vrot.lane.b32.xlu0 %v699_v58, %s2654_s25  ;;  %v1178_v34 = vsel %vm4197_vm10, %v1152_v43, %v888_v59  ;;  %v819_v59 = vrot.slane %v5312_v63, 3  ;;  %v780_v43 = vrot.slane %v5313_v38, 4 }
 0x14b   : > { %v887_v39 = vsel %vm5091_vm5, %v871_v0, %v873_v4  ;;  %1402 = vmatprep.subr.bf16.mxu0 %v1178_v34  ;;  %v5327_v4 = vld [vmem:[#allocation117_spill] sm:$0xff]  ;;  %vm5332_vm5 = vcmask 793600  }
 0x14c   : > { %v4220_v33 = vpop.permute.xlu0 %261  ;;  %747 = vrot.lane.b32.xlu1 %v3330_v48, %s2655_s2  ;;  %v1177_v22 = vsel %vm4197_vm10, %v1148_v60, %v887_v39  ;;  %v654_v58 = vrot.slane %v5327_v4, 1  ;;  %v775_v48 = vrot.slane %v3460_v57, 5  ;;  %v864_v39 = vrot.slane %v5310_v56, 1 }
 0x14d   : > { %1403 = vmatpush1.bf16.msra.mxu0 %v1177_v22  ;;  %v865_v60 = vrot.slane %v5311_v32, 2  ;;  %v868_v56 = vrot.slane %v5314_v12, 2  ;;  %v270_v52 = vsel %vm5328_vm7, %v4189_v20, %v4220_v33  ;;  %vm5331_vm7 = vcmask 1022976  }
 0x14e   : > { %v4229_v61 = vpop.permute.xlu1 %300  ;;  %745 = vrot.lane.b32.xlu0 %v734_v16, %s2655_s2  ;;  %v776_v28 = vor.u32 %v775_v48, %v774_v19  ;;  %v782_v16 = vor.u32 %v781_v47, %v780_v43  ;;  %v867_v48 = vrot.slane %v5313_v38, 1  ;;  %v269_v47 = vsel %vm5330_vm4, %v3800_v24, %v4189_v20 }
 0x14f   : > { %v866_v19 = vor.u32 %v865_v60, %v864_v39  ;;  %v821_v60 = vrot.slane %v5327_v4, 3  ;;  %vm5333_vm4 = vcmask 1042432  }
 0x150   : > { %v299_v9 = vpop.permute.xlu0 %298  ;;  %716 = vrot.lane.b32.xlu1 %v701_v40, %s2654_s25  ;;  %v820_v40 = vrot.slane %v5315_v31, 3  ;;  %v869_v38 = vor.u32 %v868_v56, %v867_v48 }
 0x151   : > { %v309_v12 = vsel %vm5329_vm9, %v299_v9, %v4229_v61 }
 0x152   : > { %v4236_v18 = vpop.permute.xlu1 %348  ;;  %669 = vrot.lane.b32.xlu0 %v654_v58, %s2653_s1 }
 0x154   : > { %v347_v17 = vpop.permute.xlu0 %346  ;;  %795 = vrot.lane.b32.xlu1 %v779_v37, %s2656_s26  ;;  %v863_v37 = vor.u32 %v862_v50, %v861_v11  ;;  %v308_v11 = vsel %vm5329_vm9, %v3807_v8, %v299_v9  ;;  %vm5335_vm9 = vmmov %vm5333_vm4 }
 0x155   : > { %v356_v20 = vsel %vm5331_vm7, %v3816_v36, %v347_v17 }
 0x156   : > { %v4243_v0 = vpop.permute.xlu1 %1199  ;;  %793 = vrot.lane.b32.xlu0 %v776_v28, %s2656_s26 }
 0x158   : > { %v1198_v34 = vpop.permute.xlu0 %1197  ;;  %832 = vrot.lane.b32.xlu1 %v819_v59, %s2657_s27 }
 0x159   : > { %v1207_v50 = vsel %vm5332_vm5, %v1198_v34, %v4243_v0  ;;  %v1206_v9 = vsel %vm5332_vm5, %v3828_v51, %v1198_v34  ;;  %vm5338_vm5 = vcmask 777216  }
 0x15a   : > { %749 = vrot.lane.b32.xlu0 %v5312_v63, %s2655_s2  ;;  %v1331_v22 = vpop.permute.xlu1 %1330 }
 0x15c   : > { %v4254_v58 = vpop.permute.xlu0 %2600  ;;  %797 = vrot.lane.b32.xlu1 %v782_v16, %s2656_s26  ;;  %v357_v16 = vsel %vm5331_vm7, %v347_v17, %v4236_v18 }
 0x15d   : > { %v2603_v57 = vunpack.i.h.bf16 %v4254_v58  ;;  %v2602_v28 = vunpack.i.l.bf16 %v4254_v58 }
 0x15e   : > { %834 = vrot.lane.b32.xlu0 %v820_v40, %s2657_s27  ;;  %v4260_v32 = vpop.permute.xlu1 %453  ;;  %v910_v40 = vsel %vm3650_vm3, %v5315_v31, %v270_v52  ;;  %v909_v31 = vsel %vm3650_vm3, %v5312_v63, %v269_v47 }
 0x15f   : > { %v938_v24 = vsel %vm5333_vm4, %v910_v40, %v309_v12  ;;  %v934_v48 = vsel %vm5335_vm9, %v909_v31, %v308_v11  ;;  %vm5336_vm4 = vcmask 1045504   ;;  %v4311_v56 = vsel %vm5334_vm11, %v2597_v25, %v2602_v28  ;;  %vm5339_vm9 = vmmov %vm5334_vm11 }
 0x160   : > { %v4267_v59 = vpop.permute.xlu0 %1332  ;;  %882 = vrot.lane.b32.xlu1 %v866_v19, %s2658_s28  ;;  %v4293_v19 = vsel %vm5334_vm11, %v2602_v28, %v2603_v57  ;;  %v4300_v8 = vsel %vm3671_vm13, %v938_v24, %v357_v16  ;;  %v4315_v63 = vsel %vm3671_vm13, %v934_v48, %v356_v20  ;;  %vm5337_vm7 = vmmov %vm5336_vm4  ;;  %vm5341_vm11 = vcmask 769024  }
 0x161   : > { %v1362_v43 = vsel %vm1360_vm0, %v1331_v22, %v4267_v59  ;;  %v1272_v36 = vsel %vm5336_vm4, %v4300_v8, %v1207_v50  ;;  %vm5340_vm4 = vcmask 1040384  }
 0x162   : > { %880 = vrot.lane.b32.xlu0 %v863_v37, %s2658_s28  ;;  %v500_v39 = vpop.permute.xlu1 %499  ;;  %1404 = vmatprep.subr.bf16.mxu0 %v1362_v43  ;;  %v1284_v51 = vsel %vm3703_vm15, %v1272_v36, %v4293_v19  ;;  %v1269_v37 = vsel %vm5337_vm7, %v4315_v63, %v1206_v9  ;;  %vm5342_vm7 = vcmask 1042432  }
 0x163   : > { %v1283_v3 = vsel %vm3703_vm15, %v1269_v37, %v4311_v56  ;;  %v509_v25 = vsel %vm5338_vm5, %v3874_v41, %v500_v39  ;;  %vm5343_vm5 = vcmask 760832  }
 0x164   : > { %v456_v58 = vpop.permute.xlu0 %455  ;;  %884 = vrot.lane.b32.xlu1 %v869_v38, %s2658_s28  ;;  %v470_v38 = vsel %vm5339_vm9, %v3849_v2, %v4260_v32  ;;  %vm5345_vm9 = vcmask 1045504  }
 0x165   : > { %v1012_v43 = vsel %vm5340_vm4, %v470_v38, %v509_v25  ;;  %vm5346_vm4 = vcmask 777216  }
 0x166   : > { %836 = vrot.lane.b32.xlu0 %v821_v60, %s2657_s27  ;;  %v1329_v17 = vpop.permute.xlu1 %1328 }
 0x167   : > { %v1361_v34 = vsel %vm1360_vm0, %v1329_v17, %v1331_v22  ;;  %v1247_v22 = vsel %vm3650_vm3, %v5327_v4, %v4220_v33  ;;  %vm5344_vm3 = vcmask 1043456  }
 0x168   : > { %v502_v52 = vpop.permute.xlu0 %501  ;;  %1340 = vrot.lane.b32.xlu1 %v1284_v51, %s2659_s29  ;;  %1405 = vmatpush1.bf16.msra.mxu0 %v1361_v34  ;;  %v1250_v60 = vsel %vm5342_vm7, %v1247_v22, %v4229_v61  ;;  %vm5348_vm7 = vcmask 769024   ;;  %v5354_v51 = vld [vmem:[#allocation3_spill] sm:$0xff] }
 0x169   : > { %v1252_v2 = vsel %vm3671_vm13, %v1250_v60, %v4236_v18  ;;  %v510_v40 = vsel %vm5346_vm4, %v500_v39, %v502_v52  ;;  %vm2662_vm4 = vmmov 0  }
 0x16a   : > { %1338 = vrot.lane.b32.xlu0 %v1283_v3, %s2659_s29  ;;  %v550_v28 = vpop.permute.xlu1 %549  ;;  %2540 = vmatprep.mubr.msk.bf16.mxu1 %vm2662_vm4, %v2661_v30  ;;  %vm5359_vm4 = vcmask 1043456  }
 0x16c   : > { %v548_v12 = vpop.permute.xlu0 %547 }
 0x16d   : > { %v557_v47 = vsel %vm5341_vm11, %v3901_v5, %v548_v12  ;;  %v1276_v5 = vsel %vm5345_vm9, %v1252_v2, %v4243_v0  ;;  %vm5347_vm11 = vcmask 785408   ;;  %vm5352_vm9 = vcmask 1043456  }
 0x16e   : > { %v1026_v41 = vsel %vm3841_vm1, %v1012_v43, %v557_v47  ;;  %v581_v16 = vpop.permute.xlu1 %580  ;;  %vm5349_vm13 = vmmov %vm5347_vm11 }
 0x16f   : > { %v590_v15 = vsel %vm5343_vm5, %v3913_v13, %v581_v16  ;;  %v558_v13 = vsel %vm5348_vm7, %v548_v12, %v550_v28  ;;  %v471_v50 = vsel %vm5349_vm13, %v4260_v32, %v456_v58  ;;  %vm5350_vm5 = vcmask 1040384   ;;  %vm5355_vm7 = vmmov %vm5349_vm13 }
 0x170   : > { %v4350_v33 = vsel %vm5344_vm3, %v1026_v41, %v590_v15  ;;  %v1224_v4 = vpop.permute.xlu0 %1223  ;;  %v1016_v0 = vsel %vm5350_vm5, %v471_v50, %v510_v40  ;;  %vm5351_vm3 = vcmask 760832   ;;  %vm5356_vm13 = vmmov %vm5350_vm5  ;;  %vm5357_vm5 = vcmask 769024   ;;  %v5362_v15 = vld [vmem:[#allocation123_spill] sm:$0xff] }
 0x171   : > { %v1227_v11 = vsel %vm5347_vm11, %v2603_v57, %v1224_v4  ;;  %v1309_v61 = vsel %vm3878_vm2, %v4350_v33, 0  ;;  %v1027_v39 = vsel %vm3841_vm1, %v1016_v0, %v558_v13  ;;  %vm5353_vm11 = vcmask 777216   ;;  %v5365_v4 = vld [vmem:[#allocation121_spill] sm:$0xff]  ;;  %v5368_v13 = vld [vmem:[#allocation120_spill] sm:$0xff] }
 0x172   : > { %1354 = vrot.lane.b32.xlu1 %v1309_v61, %s2659_s29  ;;  %v1226_v14 = vpop.permute.xlu1 %1225  ;;  %v1285_v18 = vsel %vm3703_vm15, %v1276_v5, %v1227_v11 }
 0x173   : > { %1342 = vrot.lane.b32.xlu0 %v1285_v18, %s2659_s29  ;;  %v1228_v34 = vsel %vm5355_vm7, %v456_v58, %v1226_v14  ;;  %vm5366_vm7 = vcmask 1045504  }
 0x174   : > { %v583_v57 = vpop.permute.xlu0 %582 }
 0x175   : > { %v591_v24 = vsel %vm5351_vm3, %v581_v16, %v583_v57  ;;  %vm1394_vm3 = vcmask 654336   ;;  %v5360_v16 = vld [vmem:[#allocation2_spill] sm:$0xff] }
 0x176   : > { %v4371_v20 = vsel %vm5352_vm9, %v1027_v39, %v591_v24  ;;  %v1239_v31 = vpop.permute.xlu1 %1238  ;;  %vm5358_vm9 = vcmask 760832   ;;  %v5371_v39 = vld [vmem:[#allocation122_spill] sm:$0xff] }
 0x177   : > { %v1310_v9 = vsel %vm3878_vm2, %v4371_v20, 0  ;;  %v1240_v38 = vsel %vm5357_vm5, %v550_v28, %v1239_v31  ;;  %v5361_v28 = vmov 0   ;;  %vm5369_vm5 = vcmask 752640  }
 0x178   : > { %v1233_v48 = vpop.permute.xlu0 %1232  ;;  %1356 = vrot.lane.b32.xlu0 %v1310_v9, %s2659_s29 }
 0x179   : > { %v1234_v36 = vsel %vm5353_vm11, %v502_v52, %v1233_v48  ;;  %vm5363_vm11 = vcmask 1014784  }
 0x17a   : > { %v4378_v32 = vpop.permute.xlu1 %1348  ;;  %v1292_v3 = vsel %vm5356_vm13, %v1228_v34, %v1234_v36  ;;  %vm5367_vm13 = vmmov %vm5366_vm7 }
 0x17b   : > { %v1295_v43 = vsel %vm3841_vm1, %v1292_v3, %v1240_v38  ;;  %vm5364_vm1 = vmmov %vm5363_vm11 }
 0x17c   : > { %v1347_v17 = vpop.permute.xlu0 %1346  ;;  %1391 = vperm.xlu0 %2604, %v5354_v51  }
 0x17d   : > { %v1369_v37 = vsel %vm1360_vm0, %v1347_v17, %v4378_v32 }
 0x17e   : > { %v1345_v25 = vpop.permute.xlu1 %1344  ;;  %1406 = vmatprep.subr.bf16.mxu0 %v1369_v37 }
 0x17f   : > { %v1368_v22 = vsel %vm1360_vm0, %v1345_v25, %v1347_v17 }
 0x180   : > { %v1245_v12 = vpop.permute.xlu0 %1244  ;;  %1407 = vmatpush1.bf16.msra.mxu0 %v1368_v22 }
 0x181   : > { %v1246_v52 = vsel %vm5358_vm9, %v583_v57, %v1245_v12  ;;  %vm5370_vm9 = vmmov %vm5369_vm5 }
 0x182   : > { %v1302_v58 = vsel %vm5359_vm4, %v1295_v43, %v1246_v52  ;;  %v4392_v47 = vpop.permute.xlu1 %393  ;;  %vm5372_vm4 = vcmask 523264  }
 0x183   : > { %v1311_v41 = vsel %vm3878_vm2, %v1302_v58, 0  ;;  %2406 = vmatmul.mubr.msk.bf16.vlgmr.msra.gmra.mrb[0].mxu0 %vm1394_vm3, %v5360_v16 }
 0x184   : > { %v392_v60 = vpop.permute.xlu0 %391  ;;  %1358 = vrot.lane.b32.xlu1 %v1311_v41, %s2659_s29  ;;  %1471 = vmatprep.mubr.bf16.mxu0 %v5361_v28 }
 0x185   : > { %v404_v2 = vsel %vm5363_vm11, %v5362_v15, %v392_v60  ;;  %v405_v1 = vsel %vm5364_vm1, %v392_v60, %v4392_v47  ;;  %vm5373_vm11 = vmmov %vm5372_vm4  ;;  %vm5374_vm1 = vcmask 515072  }
 0x186   : > { %v961_v5 = vsel %vm5366_vm7, %v5365_v4, %v404_v2  ;;  %v4406_v40 = vpop.permute.xlu1 %624  ;;  %v965_v11 = vsel %vm5367_vm13, %v4030_v44, %v405_v1  ;;  %vm5375_vm7 = vcmask 506880   ;;  %vm5376_vm13 = vcmask 1041408  }
 0x187   : > { %v985_v61 = vsel %vm3703_vm15, %v965_v11, %v4103_v49  ;;  %v984_v14 = vsel %vm3703_vm15, %v961_v5, %v5368_v13 }
 0x188   : > { %v623_v18 = vpop.permute.xlu0 %622  ;;  %1439 = vmatprep.subr.bf16.mxu0 %v985_v61 }
 0x189   : > { %1440 = vmatpush1.bf16.msra.mxu0 %v984_v14  ;;  %v635_v50 = vsel %vm5369_vm5, %v3977_v62, %v623_v18  ;;  %v636_v0 = vsel %vm5370_vm9, %v623_v18, %v4406_v40  ;;  %vm5377_vm5 = vmmov %vm5374_vm1 }
 0x18a   : > { %v4420_v57 = vpop.permute.xlu1 %663  ;;  %v1062_v49 = vsel %vm3878_vm2, %v5371_v39, %v635_v50  ;;  %v1063_v62 = vsel %vm3878_vm2, %v4124_v45, %v636_v0  ;;  %vm5378_vm9 = vmmov %vm5375_vm7 }
 0x18c   : > { %v662_v44 = vpop.permute.xlu0 %661 }
 0x18d   : > { %v674_v24 = vsel %vm5372_vm4, %v3992_v46, %v662_v44  ;;  %v675_v31 = vsel %vm5373_vm11, %v662_v44, %v4420_v57  ;;  %vm5379_vm4 = vcmask 490496  }
 0x18e   : > { %v4432_v9 = vpop.permute.xlu1 %710  ;;  %v1082_v48 = vsel %vm1067_vm14, %v1063_v62, %v675_v31  ;;  %v1078_v36 = vsel %vm1067_vm14, %v1062_v49, %v674_v24  ;;  %vm5380_vm11 = vmmov %vm5379_vm4 }
 0x18f   : > { %1441 = vmatprep.subr.bf16.mxu0 %v1082_v48 }
 0x190   : > { %v709_v17 = vpop.permute.xlu0 %708  ;;  %1442 = vmatpush1.bf16.msra.mxu0 %v1078_v36 }
 0x191   : > { %v722_v46 = vsel %vm5374_vm1, %v709_v17, %v4432_v9  ;;  %v721_v52 = vsel %vm5377_vm5, %v4034_v6, %v709_v17  ;;  %vm5381_vm1 = vmmov %vm5376_vm13  ;;  %vm5384_vm5 = vcmask 261120  }
 0x192   : > { %v4436_v51 = vpop.permute.xlu1 %743  ;;  %v1102_v37 = vsel %vm4160_vm12, %v675_v31, %v722_v46  ;;  %v1101_v2 = vsel %vm4160_vm12, %v674_v24, %v721_v52 }
 0x194   : > { %v742_v34 = vpop.permute.xlu0 %741 }
 0x195   : > { %v755_v45 = vsel %vm5375_vm7, %v742_v34, %v4436_v51  ;;  %v754_v43 = vsel %vm5378_vm9, %v4118_v53, %v742_v34  ;;  %vm5382_vm7 = vcmask 1044480   ;;  %vm5385_vm9 = vmmov %vm5384_vm5 }
 0x196   : > { %v4444_v3 = vpop.permute.xlu1 %791  ;;  %v1121_v22 = vsel %vm5376_vm13, %v1102_v37, %v755_v45  ;;  %v1117_v53 = vsel %vm5381_vm1, %v1101_v2, %v754_v43  ;;  %vm5383_vm13 = vmmov %vm5382_vm7  ;;  %vm5388_vm1 = vcmask 1045504  }
 0x198   : > { %v790_v25 = vpop.permute.xlu0 %789 }
 0x199   : > { %v803_v38 = vsel %vm799_vm8, %v790_v25, %v4444_v3  ;;  %v802_v60 = vsel %vm799_vm8, %v4143_v55, %v790_v25 }
 0x19a   : > { %v4449_v12 = vpop.permute.xlu1 %830  ;;  %v1141_v58 = vsel %vm4183_vm6, %v1121_v22, %v803_v38  ;;  %v1140_v5 = vsel %vm4183_vm6, %v1117_v53, %v802_v60 }
 0x19c   : > { %v829_v41 = vpop.permute.xlu0 %828 }
 0x19d   : > { %v842_v15 = vsel %vm5379_vm4, %v829_v41, %v4449_v12  ;;  %v841_v1 = vsel %vm5380_vm11, %v4148_v42, %v829_v41  ;;  %vm5386_vm4 = vcmask 1014784  }
 0x19e   : > { %v4465_v6 = vpop.permute.xlu1 %878  ;;  %v1160_v4 = vsel %vm5382_vm7, %v1141_v58, %v842_v15  ;;  %v1156_v55 = vsel %vm5383_vm13, %v1140_v5, %v841_v1  ;;  %vm5387_vm11 = vmmov %vm5386_vm4 }
 0x19f   : > { %vm5389_vm7 = vmmov %vm5388_vm1 }
 0x1a0   : > { %v877_v11 = vpop.permute.xlu0 %876  ;;  %vm5390_vm13 = vmmov %vm5386_vm4 }
 0x1a1   : > { %v889_v61 = vsel %vm5384_vm5, %v4204_v27, %v877_v11  ;;  %v890_v13 = vsel %vm5385_vm9, %v877_v11, %v4465_v6  ;;  %vm5391_vm5 = vmmov %vm5388_vm1  ;;  %vm5392_vm9 = vcmask 752640  }
 0x1a2   : > { %v4476_v14 = vpop.permute.xlu1 %1336  ;;  %v1180_v42 = vsel %vm4197_vm10, %v1160_v4, %v890_v13  ;;  %v1179_v18 = vsel %vm4197_vm10, %v1156_v55, %v889_v61 }
 0x1a3   : > { %1443 = vmatprep.subr.bf16.mxu0 %v1180_v42 }
 0x1a4   : > { %v1335_v50 = vpop.permute.xlu0 %1334  ;;  %1444 = vmatpush1.bf16.msra.mxu0 %v1179_v18 }
 0x1a5   : > { %v1364_v0 = vsel %vm1360_vm0, %v1335_v50, %v4476_v14  ;;  %v1363_v27 = vsel %vm1360_vm0, %v4267_v59, %v1335_v50 }
 0x1a6   : > { %v4484_v44 = vpop.permute.xlu1 %1352  ;;  %1445 = vmatprep.subr.bf16.mxu0 %v1364_v0 }
 0x1a8   : > { %v1351_v39 = vpop.permute.xlu0 %1350  ;;  %1446 = vmatpush1.bf16.msra.mxu0 %v1363_v27 }
 0x1a9   : > { %v1371_v49 = vsel %vm1360_vm0, %v1351_v39, %v4484_v44  ;;  %v1370_v31 = vsel %vm1360_vm0, %v4378_v32, %v1351_v39 }
 0x1aa   : > { %v398_v24 = vpop.permute.xlu1 %397  ;;  %1447 = vmatprep.subr.bf16.mxu0 %v1371_v49 }
 0x1ac   : > { %v396_v62 = vpop.permute.xlu0 %395  ;;  %1448 = vmatpush1.bf16.msra.mxu0 %v1370_v31 }
 0x1ad   : > { %v406_v48 = vsel %vm5386_vm4, %v4392_v47, %v396_v62  ;;  %v407_v36 = vsel %vm5387_vm11, %v396_v62, %v398_v24  ;;  %vm5393_vm4 = vmmov %vm5392_vm9  ;;  %vm5394_vm11 = vcmask 523264  }
 0x1ae   : > { %v969_v59 = vsel %vm5388_vm1, %v4041_v54, %v406_v48  ;;  %v627_v17 = vpop.permute.xlu1 %626  ;;  %v973_v46 = vsel %vm5389_vm7, %v4315_v63, %v407_v36  ;;  %vm5395_vm1 = vmmov %vm5394_vm11 }
 0x1af   : > { %2407 = vmatmul.mubr.msk.bf16.vlgmr.msra.gmra.mrb[4].mxu0 %vm1394_vm3, %v5360_v16  ;;  %v987_v32 = vsel %vm3703_vm15, %v973_v46, %v4311_v56  ;;  %v986_v47 = vsel %vm3703_vm15, %v969_v59, %v4062_v23  ;;  %v637_v22 = vsel %vm5393_vm4, %v4406_v40, %v627_v17  ;;  %vm5397_vm7 = vmmov %vm5395_vm1 }
 0x1b0   : > { %v400_v34 = vpop.permute.xlu0 %399  ;;  %1480 = vmatprep.subr.bf16.mxu0 %v987_v32  ;;  %1512 = vmatprep.mubr.bf16.mxu0 %v5361_v28 }
 0x1b1   : > { %v408_v54 = vsel %vm5390_vm13, %v398_v24, %v400_v34  ;;  %1481 = vmatpush1.bf16.msra.mxu0 %v986_v47  ;;  %vm5398_vm13 = vcmask 515072  }
 0x1b2   : > { %v666_v37 = vpop.permute.xlu1 %665  ;;  %v977_v63 = vsel %vm5391_vm5, %v4300_v8, %v408_v54  ;;  %vm5399_vm5 = vmmov %vm5398_vm13 }
 0x1b3   : > { %v988_v45 = vsel %vm3703_vm15, %v977_v63, %v4293_v19  ;;  %v676_v38 = vsel %vm5394_vm11, %v4420_v57, %v666_v37  ;;  %v1064_v19 = vsel %vm3878_vm2, %v4106_v26, %v637_v22  ;;  %vm5396_vm15 = vmmov %vm5393_vm4 }
 0x1b4   : > { %v629_v56 = vpop.permute.xlu0 %628  ;;  %2531 = vmatpush3.bf16.msra.mxu1 %v988_v45  ;;  %v1086_v40 = vsel %vm1067_vm14, %v1064_v19, %v676_v38  ;;  %vm5404_vm11 = vmmov %vm5399_vm5 }
 0x1b5   : > { %2532 = vmatprep.subr.bf16.mxu1 %v2661_v30  ;;  %v638_v23 = vsel %vm5392_vm9, %v627_v17, %v629_v56  ;;  %vm5400_vm9 = vcmask 506880  }
 0x1b6   : > { %v713_v25 = vpop.permute.xlu1 %712  ;;  %v1065_v7 = vsel %vm3878_vm2, %v4350_v33, %v638_v23 }
 0x1b7   : > { %v723_v13 = vsel %vm5399_vm5, %v4432_v9, %v713_v25  ;;  %vm5409_vm5 = vcmask 261120  }
 0x1b8   : > { %v668_v52 = vpop.permute.xlu0 %667  ;;  %v1103_v0 = vsel %vm4160_vm12, %v676_v38, %v723_v13 }
 0x1b9   : > { %v677_v8 = vsel %vm5395_vm1, %v666_v37, %v668_v52  ;;  %vm5405_vm1 = vcmask 490496  }
 0x1ba   : > { %v631_v43 = vpop.permute.xlu1 %630  ;;  %v1090_v58 = vsel %vm1067_vm14, %v1065_v7, %v677_v8 }
 0x1bb   : > { %1482 = vmatprep.subr.bf16.mxu0 %v1090_v58  ;;  %v639_v15 = vsel %vm5396_vm15, %v629_v56, %v631_v43  ;;  %vm5406_vm15 = vmmov %vm5405_vm1 }
 0x1bc   : > { %v715_v41 = vpop.permute.xlu0 %714  ;;  %1483 = vmatpush1.bf16.msra.mxu0 %v1086_v40  ;;  %v1066_v26 = vsel %vm3878_vm2, %v4371_v20, %v639_v15  ;;  %vm5401_vm2 = vmmov %vm5400_vm9 }
 0x1bd   : > { %v724_v55 = vsel %vm5398_vm13, %v713_v25, %v715_v41  ;;  %vm5408_vm13 = vcmask 1044480  }
 0x1be   : > { %v748_v57 = vpop.permute.xlu1 %747  ;;  %v1104_v42 = vsel %vm4160_vm12, %v677_v8, %v724_v55 }
 0x1c0   : > { %v746_v60 = vpop.permute.xlu0 %745 }
 0x1c1   : > { %v756_v35 = vsel %vm5400_vm9, %v4436_v51, %v746_v60  ;;  %v757_v20 = vsel %vm5401_vm2, %v746_v60, %v748_v57  ;;  %vm5410_vm9 = vmmov %vm5409_vm5 }
 0x1c2   : > { %v717_v2 = vpop.permute.xlu1 %716 }
 0x1c3   : > { %v725_v49 = vsel %vm5404_vm11, %v715_v41, %v717_v2 }
 0x1c4   : > { %v670_v1 = vpop.permute.xlu0 %669 }
 0x1c5   : > { %v678_v33 = vsel %vm5397_vm7, %v668_v52, %v670_v1  ;;  %vm5407_vm7 = vmmov %vm5401_vm2 }
 0x1c6   : > { %v796_v53 = vpop.permute.xlu1 %795  ;;  %v1094_v4 = vsel %vm1067_vm14, %v1066_v26, %v678_v33  ;;  %vm5402_vm14 = vcmask 1041408   ;;  %v1105_v36 = vsel %vm4160_vm12, %v678_v33, %v725_v49  ;;  %vm5411_vm2 = vmmov %vm5408_vm13 }
 0x1c7   : > { %2533 = vmatpush3.bf16.msra.mxu1 %v1094_v4  ;;  %v1125_v39 = vsel %vm5402_vm14, %v1103_v0, %v756_v35  ;;  %vm5403_vm4 = vmmov %vm5402_vm14 }
 0x1c8   : > { %v794_v5 = vpop.permute.xlu0 %793  ;;  %2534 = vmatprep.subr.bf16.mxu1 %v2661_v30  ;;  %v1129_v9 = vsel %vm5403_vm4, %v1104_v42, %v757_v20  ;;  %vm5412_vm14 = vmmov %vm5403_vm4 }
 0x1c9   : > { %v804_v50 = vsel %vm799_vm8, %v4444_v3, %v794_v5  ;;  %v805_v24 = vsel %vm799_vm8, %v794_v5, %v796_v53  ;;  %vm5413_vm12 = vmmov %vm5409_vm5 }
 0x1ca   : > { %v833_v11 = vpop.permute.xlu1 %832  ;;  %v1142_v51 = vsel %vm4183_vm6, %v1125_v39, %v804_v50  ;;  %v1143_v59 = vsel %vm4183_vm6, %v1129_v9, %v805_v24  ;;  %vm5414_vm4 = vmmov %vm5405_vm1  ;;  %v5417_v50 = vld [vmem:[#allocation4_spill] sm:$0xff]  ;;  %v5418_v39 = vld [vmem:[#allocation7_spill] sm:$0xff] }
 0x1cb   : > { %v843_v31 = vsel %vm5405_vm1, %v4449_v12, %v833_v11  ;;  %vm5415_vm11 = vmmov %vm5411_vm2  ;;  %v5419_v9 = vld [vmem:[#allocation6_spill] sm:$0xff] }
 0x1cc   : > { %v750_v61 = vpop.permute.xlu0 %749  ;;  %v1164_v46 = vsel %vm5408_vm13, %v1142_v51, %v843_v31  ;;  %v2413_v49 = vcombine.high %v5419_v9, %v5418_v39  ;;  %v2412_v24 = vcombine.low %v5419_v9, %v5418_v39 }
 0x1cd   : > { %v758_v48 = vsel %vm5407_vm7, %v748_v57, %v750_v61 }
 0x1ce   : > { %v798_v18 = vpop.permute.xlu1 %797  ;;  %v1133_v34 = vsel %vm5412_vm14, %v1105_v36, %v758_v48  ;;  %vm5538_vm14 = vmmov %vm5415_vm11 }
 0x1cf   : > { %v806_v54 = vsel %vm799_vm8, %v796_v53, %v798_v18  ;;  %v5416_v18 = vld [vmem:[#allocation5_spill] sm:$0xff]  ;;  %vm5448_vm8 = vcmask 1039360  }
 0x1d0   : > { %v835_v27 = vpop.permute.xlu0 %834  ;;  %v2411_v0 = vcombine.high %v5417_v50, %v5416_v18 }
 0x1d1   : > { %v844_v3 = vsel %vm5406_vm15, %v833_v11, %v835_v27  ;;  %vm5495_vm15 = vcmask 785408  }
 0x1d2   : > { %v883_v62 = vpop.permute.xlu1 %882  ;;  %v1168_v12 = vsel %vm5411_vm2, %v1143_v59, %v844_v3  ;;  %v5420_v59 = vld [vmem:[#allocation9_spill] sm:$0xff]  ;;  %vm5496_vm7 = vmmov %vm5495_vm15 }
 0x1d3   : > { %vm5527_vm13 = vmmov %vm5496_vm7 }
 0x1d4   : > { %v881_v17 = vpop.permute.xlu0 %880 }
 0x1d5   : > { %v891_v32 = vsel %vm5409_vm5, %v4465_v6, %v881_v17  ;;  %v892_v47 = vsel %vm5410_vm9, %v881_v17, %v883_v62  ;;  %v1144_v6 = vsel %vm4183_vm6, %v1133_v34, %v806_v54  ;;  %v5421_v17 = vld [vmem:[#allocation8_spill] sm:$0xff]  ;;  %vm5449_vm6 = vmmov %vm5448_vm8 }
 0x1d6   : > { %v885_v37 = vpop.permute.xlu1 %884  ;;  %v1182_v29 = vsel %vm4197_vm10, %v1168_v12, %v892_v47  ;;  %v1181_v63 = vsel %vm4197_vm10, %v1164_v46, %v891_v32  ;;  %v2415_v46 = vcombine.high %v5421_v17, %v5420_v59  ;;  %v2414_v32 = vcombine.low %v5421_v17, %v5420_v59  ;;  %v5422_v47 = vld [vmem:[#allocation11_spill] sm:$0xff]  ;;  %v5423_v12 = vld [vmem:[#allocation10_spill] sm:$0xff]  ;;  %vm5528_vm5 = vmmov %vm5496_vm7 }
 0x1d7   : > { %1484 = vmatprep.subr.bf16.mxu0 %v1182_v29  ;;  %v893_v45 = vsel %vm5413_vm12, %v883_v62, %v885_v37  ;;  %v2417_v34 = vcombine.high %v5423_v12, %v5422_v47  ;;  %v2416_v37 = vcombine.low %v5423_v12, %v5422_v47  ;;  %v5476_v12 = vld [vmem:[#allocation90_spill] sm:$0xff]  ;;  %vm5530_vm9 = vmmov %vm5528_vm5  ;;  %vm5543_vm12 = vcmask 1045504  }
 0x1d8   : > { %v837_v56 = vpop.permute.xlu0 %836  ;;  %1485 = vmatpush1.bf16.msra.mxu0 %v1181_v63  ;;  %vm5531_vm2 = vmmov %vm5528_vm5 }
 0x1d9   : > { %v845_v23 = vsel %vm5414_vm4, %v835_v27, %v837_v56  ;;  %v2410_v27 = vcombine.low %v5417_v50, %v5416_v18  ;;  %v5424_v56 = vld [vmem:[#allocation13_spill] sm:$0xff]  ;;  %vm2197_vm4 = vcmask 744448  }
 0x1da   : > { %v1172_v25 = vsel %vm5415_vm11, %v1144_v6, %v845_v23  ;;  %v1341_v38 = vpop.permute.xlu1 %1340  ;;  %v5425_v6 = vld [vmem:[#allocation12_spill] sm:$0xff]  ;;  %vm2375_vm11 = vcmask 556032  }
 0x1db   : > { %v1183_v22 = vsel %vm4197_vm10, %v1172_v25, %v893_v45  ;;  %v2419_v23 = vcombine.high %v5425_v6, %v5424_v56  ;;  %v2418_v25 = vcombine.low %v5425_v6, %v5424_v56  ;;  %vm5450_vm10 = vmmov %vm5449_vm6  ;;  %v5470_v6 = vld [vmem:[#allocation84_spill] sm:$0xff] }
 0x1dc   : > { %v1339_v52 = vpop.permute.xlu0 %1338  ;;  %2535 = vmatpush3.bf16.msra.mxu1 %v1183_v22 }
 0x1dd   : > { %v1365_v8 = vsel %vm1360_vm0, %v4476_v14, %v1339_v52  ;;  %v1366_v7 = vsel %vm1360_vm0, %v1339_v52, %v1341_v38  ;;  %2536 = vmatprep.subr.bf16.mxu1 %v2661_v30 }
 0x1de   : > { %1486 = vmatprep.subr.bf16.mxu0 %v1366_v7 }
 0x1df   : > { %1487 = vmatpush1.bf16.msra.mxu0 %v1365_v8 }
 0x1e4   : > { %v1355_v21 = vpop.permute.xlu1 %1354 }
 0x1e5   : > { %v1343_v10 = vpop.permute.xlu0 %1342  ;;  %v1372_v40 = vsel %vm1360_vm0, %v4484_v44, %v1355_v21 }
 0x1e6   : > { %v1367_v19 = vsel %vm1360_vm0, %v1341_v38, %v1343_v10  ;;  %v5426_v10 = vld [vmem:[#allocation15_spill] sm:$0xff] }
 0x1e7   : > { %2537 = vmatpush3.bf16.msra.mxu1 %v1367_v19  ;;  %v5427_v19 = vld [vmem:[#allocation14_spill] sm:$0xff] }
 0x1e8   : > { %2538 = vmatprep.subr.bf16.mxu1 %v2661_v30 }
 0x1ea   : > { %v1357_v43 = vpop.permute.xlu0 %1356 }
 0x1eb   : > { %v1373_v58 = vsel %vm1360_vm0, %v1355_v21, %v1357_v43  ;;  %v2421_v21 = vcombine.high %v5427_v19, %v5426_v10 }
 0x1ec   : > { %1488 = vmatprep.subr.bf16.mxu0 %v1373_v58  ;;  %v5428_v58 = vld [vmem:[#allocation17_spill] sm:$0xff] }
 0x1ed   : > { %1489 = vmatpush1.bf16.msra.mxu0 %v1372_v40  ;;  %v5429_v40 = vld [vmem:[#allocation16_spill] sm:$0xff] }
 0x1f0   : > { %2408 = vmatmul.mubr.msk.bf16.vlgmr.msra.gmra.mrb[8].mxu0 %vm1394_vm3, %v5360_v16 }
 0x1f6   : > { %v1359_v14 = vpop.permute.xlu1 %1358 }
 0x1f7   : > { %v1374_v41 = vsel %vm1360_vm0, %v1357_v43, %v1359_v14  ;;  %v2420_v43 = vcombine.low %v5427_v19, %v5426_v10  ;;  %v2423_v14 = vcombine.high %v5429_v40, %v5428_v58  ;;  %v5474_v10 = vld [vmem:[#allocation88_spill] sm:$0xff]  ;;  %vm5488_vm0 = vmmov %vm5449_vm6 }
 0x1f8   : > { %2539 = vmatpush3.bf16.msra.mxu1 %v1374_v41  ;;  %v2422_v41 = vcombine.low %v5429_v40, %v5428_v58  ;;  %vm5493_vm1 = vmmov %vm5488_vm0 }
 0x1f9   : > { %2209 = vmatprep.subr.bf16.mxu1 %v2411_v0 }
 0x1fb   : > { %2541 = vmatmul.mubr.msk.bf16.vlgmr.msra.gmra.mrb[0].mxu1 %vm1394_vm3, %v5360_v16  ;;  %v1392_v2 = vpop.permute.xlu0 %1391  ;;  %vm5489_vm3 = vmmov %vm5488_vm0 }
 0x1fc   : > { %2210 = vmatpush1.bf16.msra.mxu1 %v2410_v27  ;;  %v5436_v27 = vld [vmem:[#allocation25_spill] sm:$0xff] }
 0x1fd   : > { %2211 = vmatprep.subr.bf16.mxu1 %v2413_v49  ;;  %v5437_v49 = vld [vmem:[#allocation24_spill] sm:$0xff] }
 0x200   : > { %2212 = vmatpush1.bf16.msra.mxu1 %v2412_v24  ;;  %v2431_v24 = vcombine.high %v5437_v49, %v5436_v27 }
 0x201   : > { %2213 = vmatprep.subr.bf16.mxu1 %v2415_v46 }
 0x204   : > { %2214 = vmatpush1.bf16.msra.mxu1 %v2414_v32  ;;  %v5440_v32 = vld [vmem:[#allocation29_spill] sm:$0xff] }
 0x205   : > { %2215 = vmatprep.subr.bf16.mxu1 %v2417_v34  ;;  %v5441_v34 = vld [vmem:[#allocation28_spill] sm:$0xff] }
 0x208   : > { %2216 = vmatpush1.bf16.msra.mxu1 %v2416_v37  ;;  %v2435_v37 = vcombine.high %v5441_v34, %v5440_v32 }
 0x209   : > { %2217 = vmatprep.subr.bf16.mxu1 %v2419_v23  ;;  %v5443_v23 = vld [vmem:[#allocation30_spill] sm:$0xff] }
 0x20c   : > { %2218 = vmatpush1.bf16.msra.mxu1 %v2418_v25 }
 0x20d   : > { %2219 = vmatprep.subr.bf16.mxu1 %v2421_v21 }
 0x210   : > { %2220 = vmatpush1.bf16.msra.mxu1 %v2420_v43 }
 0x211   : > { %2221 = vmatprep.subr.bf16.mxu1 %v2423_v14 }
 0x214   : > { %2222 = vmatpush1.bf16.msra.mxu1 %v2422_v41 }
 0x256   : > { %v1432_v30 = vpop.f32.mrb[0].mxu0 }
 0x257   : > { %v1434_v57 = vpop.f32.mrb[1].mxu0  ;;  %v4596_v44 = vadd.f32 %v1432_v30, %v1392_v2  ;;  %v5430_v30 = vld [vmem:[#allocation19_spill] sm:$0xff] }
 0x258   : > { %v1436_v60 = vpop.f32.mrb[2].mxu0  ;;  %v4594_v1 = vadd.f32 %v1434_v57, %v1392_v2  ;;  %v5431_v57 = vld [vmem:[#allocation18_spill] sm:$0xff] }
 0x259   : > { %v1437_v15 = vpop.f32.mrb[3].mxu0  ;;  %v1561_v61 = vmax.f32 %v4596_v44, 0.0  ;;  %v2425_v60 = vcombine.high %v5431_v57, %v5430_v30 }
 0x25a   : > { %v1562_v53 = vmax.f32 %v4594_v1, 0.0  ;;  %v2424_v15 = vcombine.low %v5431_v57, %v5430_v30 }
 0x25b   : > { %2223 = vmatprep.subr.bf16.mxu1 %v2425_v60 }
 0x25c   : > { %2224 = vmatpush1.bf16.msra.mxu1 %v2424_v15  ;;  %v5446_v15 = vld [vmem:[#allocation35_spill] sm:$0xff] }
 0x282   : > { %v1473_v33 = vpop.f32.mrb[4].mxu0 }
 0x283   : > { %v4598_v26 = vadd.f32 %v1473_v33, %v1392_v2  ;;  %v1475_v4 = vpop.f32.mrb[5].mxu0  ;;  %v5433_v33 = vld [vmem:[#allocation20_spill] sm:$0xff] }
 0x284   : > { %v4601_v5 = vadd.f32 %v1475_v4, %v1392_v2  ;;  %v1477_v11 = vpop.f32.mrb[6].mxu0 }
 0x285   : > { %v1563_v55 = vmax.f32 %v4598_v26, 0.0  ;;  %v1478_v13 = vpop.f32.mrb[7].mxu0  ;;  %v5457_v26 = vld [vmem:[#allocation73_spill] sm:$0xff] }
 0x286   : > { %v5093_v42 = vmax.f32 %v4601_v5, 0.0  ;;  %v5434_v13 = vld [vmem:[#allocation23_spill] sm:$0xff] }
 0x287   : > { %v2605_v35 = vpack.i.bf16 %v1563_v55, %v1562_v53 }
 0x288   : > { %v2610_v20 = vpack.i.bf16 %v1561_v61, %v5093_v42  ;;  %v5456_v42 = vld [vmem:[#allocation70_spill] sm:$0xff] }
 0x289   : > { %2606 = vrot.lane.b32.xlu1 %v2605_v35, %s2644_s16  ;;  %v5435_v35 = vld [vmem:[#allocation22_spill] sm:$0xff] }
 0x28a   : > { %v2428_v0 = vcombine.low %v5435_v35, %v5434_v13 }
 0x28d   : > { %2611 = vrot.lane.b32.xlu1 %v2610_v20, %s2644_s16  ;;  %v2429_v20 = vcombine.high %v5435_v35, %v5434_v13  ;;  %v5480_v13 = vld [vmem:[#allocation94_spill] sm:$0xff] }
 0x2c3   : > { %v1514_v51 = vpop.f32.mrb[8].mxu0 }
 0x2c4   : > { %v4624_v31 = vadd.f32 %v1514_v51, %v1392_v2  ;;  %v1516_v3 = vpop.f32.mrb[9].mxu0  ;;  %v2430_v51 = vcombine.low %v5437_v49, %v5436_v27 }
 0x2c5   : > { %v1518_v62 = vpop.f32.mrb[10].mxu0  ;;  %v4636_v54 = vadd.f32 %v1516_v3, %v1392_v2  ;;  %v5438_v3 = vld [vmem:[#allocation27_spill] sm:$0xff] }
 0x2c6   : > { %v5095_v48 = vmax.f32 %v4624_v31, 0.0  ;;  %v1519_v36 = vpop.f32.mrb[11].mxu0  ;;  %v5439_v62 = vld [vmem:[#allocation26_spill] sm:$0xff] }
 0x2c7   : > { %v5096_v38 = vmax.f32 %v4636_v54, 0.0  ;;  %v2433_v36 = vcombine.high %v5439_v62, %v5438_v3  ;;  %v2432_v46 = vcombine.low %v5439_v62, %v5438_v3  ;;  %v5468_v3 = vld [vmem:[#allocation82_spill] sm:$0xff] }
 0x2c8   : > { %1583 = vrot.lane.b32.xlu1 %v5095_v48, %s2644_s16  ;;  %v5464_v48 = vld [vmem:[#allocation78_spill] sm:$0xff] }
 0x2ce   : > { %v1555_v29 = vpop.f32.mrb[0].mxu1 }
 0x2cf   : > { %v4640_v63 = vadd.f32 %v1555_v29, %v1392_v2  ;;  %v2542_v45 = vpop.f32.mrb[1].mxu1  ;;  %v5432_v2 = vld [vmem:[#allocation21_spill] sm:$0xff]  ;;  %v2434_v29 = vcombine.low %v5441_v34, %v5440_v32 }
 0x2d0   : > { %v1558_v22 = vpop.f32.mrb[2].mxu1  ;;  %v2427_v4 = vcombine.high %v5433_v33, %v5432_v2  ;;  %v2426_v11 = vcombine.low %v5433_v33, %v5432_v2  ;;  %v5442_v45 = vld [vmem:[#allocation31_spill] sm:$0xff] }
 0x2d1   : > { %v5097_v52 = vmax.f32 %v4640_v63, 0.0  ;;  %v2543_v8 = vpop.f32.mrb[3].mxu1  ;;  %v2437_v25 = vcombine.high %v5443_v23, %v5442_v45  ;;  %v2436_v22 = vcombine.low %v5443_v23, %v5442_v45 }
 0x2d2   : > { %2225 = vmatprep.subr.bf16.mxu1 %v2427_v4  ;;  %v5444_v8 = vld [vmem:[#allocation33_spill] sm:$0xff]  ;;  %v5447_v4 = vld [vmem:[#allocation34_spill] sm:$0xff] }
 0x2d3   : > { %v2615_v7 = vpack.i.bf16 %v5097_v52, %v5096_v38  ;;  %2226 = vmatpush1.bf16.msra.mxu1 %v2426_v11  ;;  %v2441_v11 = vcombine.high %v5447_v4, %v5446_v15  ;;  %v5466_v52 = vld [vmem:[#allocation80_spill] sm:$0xff] }
 0x2d4   : > { %2227 = vmatprep.subr.bf16.mxu1 %v2429_v20  ;;  %v2440_v20 = vcombine.low %v5447_v4, %v5446_v15 }
 0x2d5   : > { %2616 = vrot.lane.b32.xlu0 %v2615_v7, %s2644_s16  ;;  %v5445_v7 = vld [vmem:[#allocation32_spill] sm:$0xff] }
 0x2d6   : > { %v2439_v21 = vcombine.high %v5445_v7, %v5444_v8  ;;  %v2438_v43 = vcombine.low %v5445_v7, %v5444_v8  ;;  %v5472_v8 = vld [vmem:[#allocation86_spill] sm:$0xff] }
 0x2d7   : > { %2228 = vmatpush1.bf16.msra.mxu1 %v2428_v0 }
 0x2d8   : > { %2229 = vmatprep.subr.bf16.mxu1 %v2431_v24 }
 0x2db   : > { %2230 = vmatpush1.bf16.msra.mxu1 %v2430_v51 }
 0x2dc   : > { %2231 = vmatprep.subr.bf16.mxu1 %v2433_v36 }
 0x2df   : > { %2232 = vmatpush1.bf16.msra.mxu1 %v2432_v46 }
 0x2e0   : > { %2233 = vmatprep.subr.bf16.mxu1 %v2435_v37 }
 0x2e3   : > { %2234 = vmatpush1.bf16.msra.mxu1 %v2434_v29  ;;  %v5451_v29 = vld [vmem:[#allocation69_spill] sm:$0xff] }
 0x2e4   : > { %2235 = vmatprep.subr.bf16.mxu1 %v2437_v25  ;;  %v5452_v25 = vld [vmem:[#allocation68_spill] sm:$0xff] }
 0x2e7   : > { %2236 = vmatpush1.bf16.msra.mxu1 %v2436_v22  ;;  %v2475_v22 = vcombine.high %v5452_v25, %v5451_v29 }
 0x2e8   : > { %2237 = vmatprep.subr.bf16.mxu1 %v2439_v21  ;;  %v2474_v21 = vcombine.low %v5452_v25, %v5451_v29 }
 0x2e9   : > { %2291 = vmatprep.subr.bf16.mxu0 %v2475_v22 }
 0x2ea   : > { %2292 = vmatpush1.bf16.msra.mxu0 %v2474_v21  ;;  %v5461_v21 = vld [vmem:[#allocation77_spill] sm:$0xff] }
 0x2eb   : > { %2238 = vmatpush1.bf16.msra.mxu1 %v2438_v43 }
 0x2ec   : > { %2239 = vmatprep.subr.bf16.mxu1 %v2441_v11  ;;  %v5453_v11 = vld [vmem:[#allocation37_spill] sm:$0xff] }
 0x2ef   : > { %2240 = vmatpush1.bf16.msra.mxu1 %v2440_v20 }
 0x2fb   : > { %v2607_v14 = vpop.permute.xlu1 %2606 }
 0x2fc   : > { %v2609_v41 = vunpack.i.h.bf16 %v2607_v14  ;;  %v2608_v60 = vunpack.i.l.bf16 %v2607_v14 }
 0x2fe   : > { %v1591_v24 = vsel %vm5448_vm8, %v2608_v60, %v2609_v41  ;;  %vm2388_vm8 = vcmask 587780  }
 0x2ff   : > { %v4697_v0 = vpop.permute.xlu1 %2611  ;;  %v4712_v43 = vmax.f32 %v1562_v53, %v1591_v24  ;;  %v5458_v53 = vld [vmem:[#allocation72_spill] sm:$0xff]  ;;  %v5459_v24 = vld [vmem:[#allocation75_spill] sm:$0xff] }
 0x300   : > { %v2614_v51 = vunpack.i.h.bf16 %v4697_v0  ;;  %v5094_v36 = vunpack.i.l.bf16 %v4697_v0 }
 0x302   : > { %v1590_v46 = vsel %vm5449_vm6, %v2614_v51, %v2608_v60  ;;  %v1592_v37 = vsel %vm5450_vm10, %v2609_v41, %v5094_v36  ;;  %v5454_v41 = vld [vmem:[#allocation36_spill] sm:$0xff]  ;;  %v5455_v51 = vld [vmem:[#allocation71_spill] sm:$0xff]  ;;  %vm5544_vm6 = vcmask 1042432  }
 0x303   : > { %v4716_v14 = vmax.f32 %v1561_v61, %v1590_v46  ;;  %v4720_v60 = vmax.f32 %v1563_v55, %v1592_v37  ;;  %v2443_v20 = vcombine.high %v5454_v41, %v5453_v11  ;;  %v2477_v36 = vcombine.high %v5456_v42, %v5455_v51  ;;  %v5460_v46 = vld [vmem:[#allocation74_spill] sm:$0xff]  ;;  %vm2389_vm10 = vmor %vm2388_vm8, %vm5544_vm6 }
 0x304   : > { %v2476_v44 = vcombine.low %v5456_v42, %v5455_v51  ;;  %v2479_v55 = vcombine.high %v5458_v53, %v5457_v26  ;;  %v2478_v61 = vcombine.low %v5458_v53, %v5457_v26  ;;  %v2481_v37 = vcombine.high %v5460_v46, %v5459_v24 }
 0x305   : > { %1617 = vrot.lane.b32.xlu1 %v4716_v14, %s2647_s19  ;;  %v2620_v1 = vpack.i.bf16 %v4720_v60, %v4712_v43  ;;  %2250 = vmatprep.subr.bf16.mxu1 %v2443_v20  ;;  %v2480_v22 = vcombine.low %v5460_v46, %v5459_v24 }
 0x306   : > { %2293 = vmatprep.subr.bf16.mxu0 %v2477_v36  ;;  %v5462_v36 = vld [vmem:[#allocation76_spill] sm:$0xff] }
 0x307   : > { %2621 = vrot.lane.b32.xlu0 %v2620_v1, %s2647_s19  ;;  %2294 = vmatpush1.bf16.msra.mxu0 %v2476_v44  ;;  %v2483_v20 = vcombine.high %v5462_v36, %v5461_v21  ;;  %v2482_v1 = vcombine.low %v5462_v36, %v5461_v21  ;;  %v5463_v44 = vld [vmem:[#allocation79_spill] sm:$0xff] }
 0x308   : > { %2295 = vmatprep.subr.bf16.mxu0 %v2479_v55  ;;  %v2485_v38 = vcombine.high %v5464_v48, %v5463_v44  ;;  %v2484_v55 = vcombine.low %v5464_v48, %v5463_v44 }
 0x30b   : > { %2296 = vmatpush1.bf16.msra.mxu0 %v2478_v61  ;;  %v5465_v61 = vld [vmem:[#allocation81_spill] sm:$0xff] }
 0x30c   : > { %2297 = vmatprep.subr.bf16.mxu0 %v2481_v37  ;;  %v2487_v2 = vcombine.high %v5466_v52, %v5465_v61  ;;  %v2486_v37 = vcombine.low %v5466_v52, %v5465_v61 }
 0x30f   : > { %2298 = vmatpush1.bf16.msra.mxu0 %v2480_v22  ;;  %v5467_v22 = vld [vmem:[#allocation83_spill] sm:$0xff] }
 0x310   : > { %2299 = vmatprep.subr.bf16.mxu0 %v2483_v20  ;;  %v2489_v4 = vcombine.high %v5468_v3, %v5467_v22  ;;  %v2488_v20 = vcombine.low %v5468_v3, %v5467_v22 }
 0x313   : > { %2300 = vmatpush1.bf16.msra.mxu0 %v2482_v1  ;;  %v5469_v1 = vld [vmem:[#allocation85_spill] sm:$0xff] }
 0x314   : > { %2301 = vmatprep.subr.bf16.mxu0 %v2485_v38  ;;  %v2491_v7 = vcombine.high %v5470_v6, %v5469_v1  ;;  %v2490_v38 = vcombine.low %v5470_v6, %v5469_v1  ;;  %v5478_v6 = vld [vmem:[#allocation92_spill] sm:$0xff] }
 0x317   : > { %2302 = vmatpush1.bf16.msra.mxu0 %v2484_v55  ;;  %v5471_v55 = vld [vmem:[#allocation87_spill] sm:$0xff] }
 0x318   : > { %2303 = vmatprep.subr.bf16.mxu0 %v2487_v2  ;;  %v2493_v9 = vcombine.high %v5472_v8, %v5471_v55  ;;  %v2492_v2 = vcombine.low %v5472_v8, %v5471_v55 }
 0x31b   : > { %2304 = vmatpush1.bf16.msra.mxu0 %v2486_v37  ;;  %v5473_v37 = vld [vmem:[#allocation89_spill] sm:$0xff] }
 0x31c   : > { %2305 = vmatprep.subr.bf16.mxu0 %v2489_v4  ;;  %v2495_v3 = vcombine.high %v5474_v10, %v5473_v37  ;;  %v2494_v4 = vcombine.low %v5474_v10, %v5473_v37 }
 0x31f   : > { %2306 = vmatpush1.bf16.msra.mxu0 %v2488_v20  ;;  %v5475_v20 = vld [vmem:[#allocation91_spill] sm:$0xff] }
 0x320   : > { %2307 = vmatprep.subr.bf16.mxu0 %v2491_v7  ;;  %v2497_v1 = vcombine.high %v5476_v12, %v5475_v20  ;;  %v2496_v7 = vcombine.low %v5476_v12, %v5475_v20  ;;  %v5482_v12 = vld [vmem:[#allocation96_spill] sm:$0xff]  ;;  %v5532_v20 = vld [vmem:[#allocation103_spill] sm:$0xff] }
 0x323   : > { %2308 = vmatpush1.bf16.msra.mxu0 %v2490_v38  ;;  %v5477_v38 = vld [vmem:[#allocation93_spill] sm:$0xff] }
 0x324   : > { %2309 = vmatprep.subr.bf16.mxu0 %v2493_v9  ;;  %v2499_v8 = vcombine.high %v5478_v6, %v5477_v38  ;;  %v2498_v9 = vcombine.low %v5478_v6, %v5477_v38  ;;  %v5484_v6 = vld [vmem:[#allocation98_spill] sm:$0xff] }
 0x327   : > { %2310 = vmatpush1.bf16.msra.mxu0 %v2492_v2  ;;  %v5479_v2 = vld [vmem:[#allocation95_spill] sm:$0xff] }
 0x328   : > { %2311 = vmatprep.subr.bf16.mxu0 %v2495_v3  ;;  %v2501_v10 = vcombine.high %v5480_v13, %v5479_v2  ;;  %v2500_v3 = vcombine.low %v5480_v13, %v5479_v2  ;;  %v5485_v2 = vld [vmem:[#allocation101_spill] sm:$0xff] }
 0x32b   : > { %2312 = vmatpush1.bf16.msra.mxu0 %v2494_v4  ;;  %v5481_v4 = vld [vmem:[#allocation97_spill] sm:$0xff] }
 0x32c   : > { %2313 = vmatprep.subr.bf16.mxu0 %v2497_v1  ;;  %v2503_v1 = vcombine.high %v5482_v12, %v5481_v4  ;;  %v2502_v15 = vcombine.low %v5482_v12, %v5481_v4  ;;  %v5487_v4 = vmax.f32 %v4640_v63, 0.0  ;;  %v5492_v63 = vunpack.i.l.bf16 %v4697_v0 }
 0x32f   : > { %2314 = vmatpush1.bf16.msra.mxu0 %v2496_v7  ;;  %v5483_v7 = vld [vmem:[#allocation99_spill] sm:$0xff] }
 0x330   : > { %2315 = vmatprep.subr.bf16.mxu0 %v2499_v8  ;;  %v2505_v8 = vcombine.high %v5484_v6, %v5483_v7  ;;  %v2504_v16 = vcombine.low %v5484_v6, %v5483_v7  ;;  %v5490_v6 = vmax.f32 %v4636_v54, 0.0 }
 0x333   : > { %2316 = vmatpush1.bf16.msra.mxu0 %v2498_v9 }
 0x334   : > { %2317 = vmatprep.subr.bf16.mxu0 %v2501_v10  ;;  %v5486_v10 = vld [vmem:[#allocation100_spill] sm:$0xff] }
 0x337   : > { %2318 = vmatpush1.bf16.msra.mxu0 %v2500_v3  ;;  %v2507_v3 = vcombine.high %v5486_v10, %v5485_v2 }
 0x338   : > { %2319 = vmatprep.subr.bf16.mxu0 %v2503_v1 }
 0x33a   : > { %v1584_v18 = vpop.permute.xlu1 %1583 }
 0x33b   : > { %2320 = vmatpush1.bf16.msra.mxu0 %v2502_v15 }
 0x33c   : > { %2321 = vmatprep.subr.bf16.mxu0 %v2505_v8 }
 0x33f   : > { %2322 = vmatpush1.bf16.msra.mxu0 %v2504_v16  ;;  %v5491_v16 = vmax.f32 %v4624_v31, 0.0 }
 0x340   : > { %2332 = vmatprep.subr.bf16.mxu0 %v2507_v3 }
 0x347   : > { %v2617_v9 = vpop.permute.xlu0 %2616 }
 0x348   : > { %v2619_v13 = vunpack.i.h.bf16 %v2617_v9  ;;  %v2618_v17 = vunpack.i.l.bf16 %v2617_v9 }
 0x34a   : > { %v4793_v1 = vmax.f32 %v5487_v4, %v2619_v13  ;;  %v1595_v15 = vsel %vm5488_vm0, %v2618_v17, %v2619_v13  ;;  %v1594_v12 = vsel %vm5489_vm3, %v1584_v18, %v2618_v17  ;;  %v1593_v13 = vsel %vm5493_vm1, %v5492_v63, %v1584_v18  ;;  %v5497_v63 = vld [vmem:[#allocation39_spill] sm:$0xff] }
 0x34b   : > { %v4799_v8 = vmax.f32 %v5490_v6, %v1595_v15  ;;  %v4803_v7 = vmax.f32 %v5491_v16, %v1594_v12  ;;  %v5494_v17 = vmax.f32 %v4601_v5, 0.0 }
 0x34d   : > { %v2625_v9 = vpack.i.bf16 %v4793_v1, %v4799_v8  ;;  %1625 = vrot.lane.b32.xlu1 %v4803_v7, %s2647_s19  ;;  %v4815_v54 = vmax.f32 %v5494_v17, %v1593_v13  ;;  %v5498_v13 = vld [vmem:[#allocation38_spill] sm:$0xff] }
 0x34e   : > { %v2445_v17 = vcombine.high %v5498_v13, %v5497_v63 }
 0x34f   : > { %2626 = vrot.lane.b32.xlu0 %v2625_v9, %s2647_s19  ;;  %v2442_v9 = vcombine.low %v5454_v41, %v5453_v11  ;;  %v5506_v11 = vld [vmem:[#allocation46_spill] sm:$0xff] }
 0x353   : > { %1623 = vrot.lane.b32.xlu0 %v4815_v54, %s2647_s19 }
 0x377   : > { %v1618_v4 = vpop.permute.xlu1 %1617 }
 0x379   : > { %v4819_v31 = vpop.permute.xlu0 %2621 }
 0x37a   : > { %v5125_v12 = vunpack.i.h.bf16 %v4819_v31  ;;  %v2623_v6 = vunpack.i.l.bf16 %v4819_v31 }
 0x37c   : > { %v1632_v0 = vsel %vm5495_vm15, %v1618_v4, %v2623_v6  ;;  %v1633_v18 = vsel %vm5496_vm7, %v2623_v6, %v5125_v12  ;;  %v2444_v4 = vcombine.low %v5498_v13, %v5497_v63  ;;  %v5499_v6 = vld [vmem:[#allocation41_spill] sm:$0xff]  ;;  %v5500_v12 = vld [vmem:[#allocation40_spill] sm:$0xff]  ;;  %v5510_v13 = vld [vmem:[#allocation50_spill] sm:$0xff] }
 0x37d   : > { %v1645_v5 = vmax.f32 %v4716_v14, %v1632_v0  ;;  %v1646_v3 = vmax.f32 %v4712_v43, %v1633_v18  ;;  %v2447_v14 = vcombine.high %v5500_v12, %v5499_v6  ;;  %v2446_v43 = vcombine.low %v5500_v12, %v5499_v6  ;;  %v5501_v0 = vld [vmem:[#allocation43_spill] sm:$0xff]  ;;  %v5502_v18 = vld [vmem:[#allocation42_spill] sm:$0xff]  ;;  %v5508_v12 = vld [vmem:[#allocation48_spill] sm:$0xff] }
 0x37f   : > { %v1653_v15 = vpack.c.bf16 %v1646_v3, %v1646_v3  ;;  %v1652_v16 = vpack.c.bf16 %v1645_v5, %v1645_v5  ;;  %v2449_v5 = vcombine.high %v5502_v18, %v5501_v0  ;;  %v2448_v3 = vcombine.low %v5502_v18, %v5501_v0  ;;  %v5516_v18 = vld [vmem:[#allocation56_spill] sm:$0xff] }
 0x381   : > { %2241 = vmatprep.mubr.bf16.mxu1 %v1653_v15  ;;  %v5503_v15 = vld [vmem:[#allocation45_spill] sm:$0xff] }
 0x382   : > { %2242 = vmatmul.mubr.bf16.vlgmr.msra.gmra.mrb[4].mxu1 %v1652_v16  ;;  %v5504_v16 = vld [vmem:[#allocation44_spill] sm:$0xff] }
 0x383   : > { %2251 = vmatpush1.bf16.msra.mxu1 %v2442_v9  ;;  %v2451_v9 = vcombine.high %v5504_v16, %v5503_v15 }
 0x384   : > { %2252 = vmatprep.subr.bf16.mxu1 %v2445_v17  ;;  %v2450_v17 = vcombine.low %v5504_v16, %v5503_v15  ;;  %v5512_v16 = vld [vmem:[#allocation52_spill] sm:$0xff] }
 0x387   : > { %2253 = vmatpush1.bf16.msra.mxu1 %v2444_v4  ;;  %v5505_v4 = vld [vmem:[#allocation47_spill] sm:$0xff] }
 0x388   : > { %2254 = vmatprep.subr.bf16.mxu1 %v2447_v14  ;;  %v2453_v6 = vcombine.high %v5506_v11, %v5505_v4  ;;  %v2452_v14 = vcombine.low %v5506_v11, %v5505_v4  ;;  %v5514_v11 = vld [vmem:[#allocation54_spill] sm:$0xff] }
 0x38b   : > { %2255 = vmatpush1.bf16.msra.mxu1 %v2446_v43  ;;  %v5507_v43 = vld [vmem:[#allocation49_spill] sm:$0xff] }
 0x38c   : > { %2256 = vmatprep.subr.bf16.mxu1 %v2449_v5  ;;  %v2455_v0 = vcombine.high %v5508_v12, %v5507_v43  ;;  %v2454_v5 = vcombine.low %v5508_v12, %v5507_v43 }
 0x38f   : > { %2257 = vmatpush1.bf16.msra.mxu1 %v2448_v3  ;;  %v5509_v3 = vld [vmem:[#allocation51_spill] sm:$0xff] }
 0x390   : > { %2258 = vmatprep.subr.bf16.mxu1 %v2451_v9  ;;  %v2457_v15 = vcombine.high %v5510_v13, %v5509_v3  ;;  %v2456_v9 = vcombine.low %v5510_v13, %v5509_v3  ;;  %v5518_v13 = vld [vmem:[#allocation58_spill] sm:$0xff] }
 0x393   : > { %2259 = vmatpush1.bf16.msra.mxu1 %v2450_v17  ;;  %v5511_v17 = vld [vmem:[#allocation53_spill] sm:$0xff] }
 0x394   : > { %2260 = vmatprep.subr.bf16.mxu1 %v2453_v6  ;;  %v2459_v4 = vcombine.high %v5512_v16, %v5511_v17  ;;  %v2458_v6 = vcombine.low %v5512_v16, %v5511_v17  ;;  %v5520_v17 = vld [vmem:[#allocation60_spill] sm:$0xff] }
 0x397   : > { %2261 = vmatpush1.bf16.msra.mxu1 %v2452_v14  ;;  %v5513_v14 = vld [vmem:[#allocation55_spill] sm:$0xff] }
 0x398   : > { %2262 = vmatprep.subr.bf16.mxu1 %v2455_v0  ;;  %v2461_v12 = vcombine.high %v5514_v11, %v5513_v14  ;;  %v2460_v0 = vcombine.low %v5514_v11, %v5513_v14  ;;  %v5522_v14 = vld [vmem:[#allocation62_spill] sm:$0xff] }
 0x39b   : > { %2263 = vmatpush1.bf16.msra.mxu1 %v2454_v5  ;;  %v5515_v5 = vld [vmem:[#allocation57_spill] sm:$0xff] }
 0x39c   : > { %2264 = vmatprep.subr.bf16.mxu1 %v2457_v15  ;;  %v2463_v3 = vcombine.high %v5516_v18, %v5515_v5  ;;  %v2462_v15 = vcombine.low %v5516_v18, %v5515_v5  ;;  %v5524_v18 = vld [vmem:[#allocation64_spill] sm:$0xff] }
 0x39f   : > { %2265 = vmatpush1.bf16.msra.mxu1 %v2456_v9  ;;  %v5517_v9 = vld [vmem:[#allocation59_spill] sm:$0xff] }
 0x3a0   : > { %2266 = vmatprep.subr.bf16.mxu1 %v2459_v4  ;;  %v2465_v16 = vcombine.high %v5518_v13, %v5517_v9  ;;  %v2464_v4 = vcombine.low %v5518_v13, %v5517_v9  ;;  %v5526_v13 = vld [vmem:[#allocation66_spill] sm:$0xff] }
 0x3a3   : > { %2267 = vmatpush1.bf16.msra.mxu1 %v2458_v6  ;;  %v5519_v6 = vld [vmem:[#allocation61_spill] sm:$0xff] }
 0x3a4   : > { %2268 = vmatprep.subr.bf16.mxu1 %v2461_v12  ;;  %v2467_v11 = vcombine.high %v5520_v17, %v5519_v6  ;;  %v2466_v12 = vcombine.low %v5520_v17, %v5519_v6 }
 0x3a7   : > { %2269 = vmatpush1.bf16.msra.mxu1 %v2460_v0  ;;  %v5521_v0 = vld [vmem:[#allocation63_spill] sm:$0xff] }
 0x3a8   : > { %2270 = vmatprep.subr.bf16.mxu1 %v2463_v3  ;;  %v2469_v5 = vcombine.high %v5522_v14, %v5521_v0  ;;  %v2468_v3 = vcombine.low %v5522_v14, %v5521_v0 }
 0x3ab   : > { %2271 = vmatpush1.bf16.msra.mxu1 %v2462_v15  ;;  %v5523_v15 = vld [vmem:[#allocation65_spill] sm:$0xff] }
 0x3ac   : > { %2272 = vmatprep.subr.bf16.mxu1 %v2465_v16  ;;  %v2471_v9 = vcombine.high %v5524_v18, %v5523_v15  ;;  %v2470_v16 = vcombine.low %v5524_v18, %v5523_v15 }
 0x3af   : > { %2273 = vmatpush1.bf16.msra.mxu1 %v2464_v4  ;;  %v5525_v4 = vld [vmem:[#allocation67_spill] sm:$0xff] }
 0x3b0   : > { %2274 = vmatprep.subr.bf16.mxu1 %v2467_v11  ;;  %v2473_v6 = vcombine.high %v5526_v13, %v5525_v4  ;;  %v2472_v11 = vcombine.low %v5526_v13, %v5525_v4 }
 0x3b3   : > { %2275 = vmatpush1.bf16.msra.mxu1 %v2466_v12 }
 0x3b4   : > { %2276 = vmatprep.subr.bf16.mxu1 %v2469_v5 }
 0x3b7   : > { %2277 = vmatpush1.bf16.msra.mxu1 %v2468_v3 }
 0x3b8   : > { %2278 = vmatprep.subr.bf16.mxu1 %v2471_v9 }
 0x3bb   : > { %2279 = vmatpush1.bf16.msra.mxu1 %v2470_v16  ;;  %v5529_v16 = vunpack.i.h.bf16 %v4819_v31 }
 0x3bc   : > { %2280 = vmatprep.subr.bf16.mxu1 %v2473_v6 }
 0x3bf   : > { %2281 = vmatpush1.bf16.msra.mxu1 %v2472_v11  ;;  %v1626_v14 = vpop.permute.xlu1 %1625  ;;  %v2506_v11 = vcombine.low %v5486_v10, %v5485_v2 }
 0x3c1   : > { %v2627_v12 = vpop.permute.xlu0 %2626 }
 0x3c2   : > { %v2629_v0 = vunpack.i.h.bf16 %v2627_v12  ;;  %v2628_v5 = vunpack.i.l.bf16 %v2627_v12 }
 0x3c4   : > { %v1636_v17 = vsel %vm5527_vm13, %v1626_v14, %v2628_v5  ;;  %v1637_v3 = vsel %vm5528_vm5, %v2628_v5, %v2629_v0 }
 0x3c5   : > { %v1649_v15 = vmax.f32 %v4803_v7, %v1636_v17  ;;  %v1624_v9 = vpop.permute.xlu0 %1623  ;;  %v1650_v18 = vmax.f32 %v4799_v8, %v1637_v3  ;;  %v5533_v7 = vld [vmem:[#allocation102_spill] sm:$0xff] }
 0x3c6   : > { %v1634_v19 = vsel %vm5530_vm9, %v5529_v16, %v1624_v9  ;;  %v1635_v6 = vsel %vm5531_vm2, %v1624_v9, %v1626_v14  ;;  %v2509_v17 = vcombine.high %v5533_v7, %v5532_v20  ;;  %v2508_v31 = vcombine.low %v5533_v7, %v5532_v20  ;;  %v5534_v14 = vld [vmem:[#allocation105_spill] sm:$0xff]  ;;  %v5540_v16 = vld [vmem:[#allocation108_spill] sm:$0xff] }
 0x3c7   : > { %v1647_v12 = vmax.f32 %v4720_v60, %v1634_v19  ;;  %v1648_v4 = vmax.f32 %v4815_v54, %v1635_v6  ;;  %v1657_v13 = vpack.c.bf16 %v1650_v18, %v1650_v18  ;;  %v1656_v5 = vpack.c.bf16 %v1649_v15, %v1649_v15  ;;  %v5535_v19 = vld [vmem:[#allocation104_spill] sm:$0xff]  ;;  %v5536_v18 = vld [vmem:[#allocation107_spill] sm:$0xff]  ;;  %v5539_v9 = vld [vmem:[#allocation109_spill] sm:$0xff] }
 0x3c8   : > { %v2511_v60 = vcombine.high %v5535_v19, %v5534_v14  ;;  %v2510_v54 = vcombine.low %v5535_v19, %v5534_v14  ;;  %v2515_v6 = vcombine.high %v5540_v16, %v5539_v9 }
 0x3c9   : > { %v1654_v21 = vpack.c.bf16 %v1647_v12, %v1647_v12  ;;  %v1655_v8 = vpack.c.bf16 %v1648_v4, %v1648_v4  ;;  %2323 = vmatprep.mubr.bf16.mxu0 %v1657_v13  ;;  %v5537_v13 = vld [vmem:[#allocation106_spill] sm:$0xff]  ;;  %v2663_v4 = vmov 65535  }
 0x3ca   : > { %2324 = vmatmul.mubr.bf16.vlgmr.msra.gmra.mrb[12].mxu0 %v1656_v5  ;;  %v2513_v15 = vcombine.high %v5537_v13, %v5536_v18  ;;  %v2201_v3 = vsel %vm5538_vm14, 4294967295, %v2663_v4 }
 0x3cb   : > { %2333 = vmatpush1.bf16.msra.mxu0 %v2506_v11  ;;  %2282 = vmatprep.mubr.bf16.mxu1 %v1655_v8  ;;  %v5542_v11 = vld [vmem:[#allocation110_spill] sm:$0xff]  ;;  %v2202_v5 = vsel %vm5543_vm12, %v2201_v3, 0 }
 0x3cc   : > { %2283 = vmatmul.mubr.bf16.vlgmr.msra.gmra.mrb[4].mxu1 %v1654_v21  ;;  %2334 = vmatprep.subr.bf16.mxu0 %v2509_v17  ;;  %v2512_v21 = vcombine.low %v5537_v13, %v5536_v18  ;;  %v2514_v17 = vcombine.low %v5540_v16, %v5539_v9 }
 0x3cd   : > { %2364 = vmatprep.mubr.bf16.mxu0 %v5361_v28  ;;  %v5541_v28 = vld [vmem:[#allocation111_spill] sm:$0xff] }
 0x3ce   : > { %v2517_v12 = vcombine.high %v5542_v11, %v5541_v28  ;;  %v2516_v8 = vcombine.low %v5542_v11, %v5541_v28 }
 0x3cf   : > { %2335 = vmatpush1.bf16.msra.mxu0 %v2508_v31 }
 0x3d0   : > { %2336 = vmatprep.subr.bf16.mxu0 %v2511_v60  ;;  %v2207_v31 = vand.u32 %v2517_v12, %v2202_v5  ;;  %v2204_v60 = vand.u32 %v2516_v8, %v2202_v5 }
 0x3d3   : > { %2337 = vmatpush1.bf16.msra.mxu0 %v2510_v54  ;;  %v1651_v54 = vmax.f32 %v4793_v1, %v2629_v0 }
 0x3d4   : > { %2338 = vmatprep.subr.bf16.mxu0 %v2513_v15 }
 0x3d5   : > { %v1658_v15 = vpack.c.bf16 %v1651_v54, %v1651_v54 }
 0x3d7   : > { %2339 = vmatpush1.bf16.msra.mxu0 %v2512_v21 }
 0x3d8   : > { %2340 = vmatprep.subr.bf16.mxu0 %v2515_v6 }
 0x3db   : > { %2341 = vmatpush1.bf16.msra.mxu0 %v2514_v17 }
 0x3dc   : > { %2342 = vmatprep.subr.bf16.mxu0 %v2207_v31 }
 0x3df   : > { %2343 = vmatpush1.bf16.msra.mxu0 %v2204_v60 }
 0x3e2   : > { %2518 = vmatmul.mubr.msk.bf16.vlgmr.msra.gmra.mrb[12].mxu0 %vm2197_vm4, %v1658_v15 }
 0x49f   : > { %v2284_v4 = vpop.f32.mrb[4].mxu1 }
 0x4a0   : > { %v2286_v3 = vpop.f32.mrb[5].mxu1 }
 0x4a1   : > { %v2288_v21 = vpop.f32.mrb[6].mxu1 }
 0x4a2   : > { %v2289_v2 = vpop.f32.mrb[7].mxu1 }
 0x4b5   : > { %v2366_v7 = vpop.f32.mrb[12].mxu0 }
 0x4b6   : > { %v2544_v9 = vadd.f32 %v2366_v7, %v2284_v4  ;;  %v2368_v10 = vpop.f32.mrb[13].mxu0 }
 0x4b7   : > { %v2545_v11 = vadd.f32 %v2368_v10, %v2286_v3  ;;  %v2370_v6 = vpop.f32.mrb[14].mxu0 }
 0x4b8   : > { %v2371_v12 = vpop.f32.mrb[15].mxu0  ;;  %v2373_v0 = vpack.c.bf16 %v2544_v9, %v2544_v9  ;;  %132 = sbr.rel (!%p130_p0) target bundleno = 57 (0x39), region = 45 }
 0x4b9   : > { %v2374_v1 = vpack.c.bf16 %v2545_v11, %v2545_v11 }
 0x4bb   : > { %v2378_v5 = vsel %vm2375_vm11, %v2374_v1, 0 }
 0x4bc   : > { %v2519_v17 = vcombine.low %v2373_v0, %v2378_v5 }
 0x4be   : > { %2390 = vst.msk [vmem:[%s2387_s7] sm:$0x77] %vm2389_vm10, %v2519_v17 }

</bundles_post_ra>
